<compile_context>
chip_gen: v7x
topology: tpu7x:2x2x1
jax: 0.10.0
libtpu: 0.0.40
codegen_flags: <defaults>
</compile_context>

<pallas_src>
import jax
import jax.numpy as jnp
from jax.experimental import pallas as pl
from jax.experimental.pallas import tpu as pltpu


NEG_BIG = -1e30  # fill value for padded vocab logit columns (dies in log_softmax)


def _vmem():
    return pl.BlockSpec(memory_space=pltpu.MemorySpace.VMEM)


# -----------------------------------------------------------------------------
# In-kernel helpers
# -----------------------------------------------------------------------------
def _embed(ids_ref, table_ref):
    """Embedding gather as one-hot matmul: (N,1) int32 ids -> (N, E)."""
    n = ids_ref.shape[0]
    v = table_ref.shape[0]
    iota = jax.lax.broadcasted_iota(jnp.int32, (n, v), 1)
    onehot = (ids_ref[...] == iota).astype(jnp.float32)
    return jnp.dot(onehot, table_ref[...], preferred_element_type=jnp.float32)


def _gru_unrolled(gi_all, h0, whh, bhh_row, n_steps, on_step):
    """PyTorch-GRU recurrence, fully unrolled (n_steps is small & static).

    gi_all: (n_steps*batch, 3H) time-major, already = x @ W_ih + b_ih.
    on_step(t, h) is called with the new hidden state after every step.
    """
    batch, H = h0.shape
    bhh = jnp.broadcast_to(bhh_row, (batch, 3 * H))   # hoisted broadcast
    whh = whh
    h = h0
    for t in range(n_steps):
        gi = gi_all[t * batch:(t + 1) * batch]
        gh = jnp.dot(h, whh, preferred_element_type=jnp.float32) + bhh
        r = jax.nn.sigmoid(gi[:, :H] + gh[:, :H])
        z = jax.nn.sigmoid(gi[:, H:2 * H] + gh[:, H:2 * H])
        n = jnp.tanh(gi[:, 2 * H:] + r * gh[:, 2 * H:])
        h = (1.0 - z) * n + z * h
        on_step(t, h)
    return h


# -----------------------------------------------------------------------------
# Single fused VHUS forward kernel
# -----------------------------------------------------------------------------
def _vhus_kernel(
        # int32 ids / target indices (all tiny, VMEM-resident)
        gid_ref, gtid_ref, sid_ref, ptid_ref, ctid_ref, ltid_ref, did_ref,
        # float inputs
        eps_ref,
        gemb_ref, gwih_ref, gwhh_ref, gbih_ref, gbhh_ref,
        semb_ref, swih_ref, swhh_ref, sbih_ref, sbhh_ref,
        cwih_ref, cwhh_ref, cbih_ref, cbhh_ref,
        hw_ref, hb_ref, mllw_ref, mllb_ref,
        cwc_ref, cwz_ref, cb_ref, tw2_ref, tb2_ref,
        uemb_ref, dwih_ref, dwhh_ref, dbih_ref, dbhh_ref,
        ow_ref, ob_ref,
        # outputs
        logp_ref, stats_ref, term_ref,
        # scratch
        hseq_ref):
    B, H = eps_ref.shape
    Lg = gid_ref.shape[0] // B          # goal sequence length
    NS = ptid_ref.shape[0]              # B * max_sen (flattened sentence batch)
    S = NS // B
    W = sid_ref.shape[0] // NS          # words per sentence
    T = did_ref.shape[0] // B           # decoder steps (resp_len - 1)

    # ---- goal encoder: only the length-selected hidden state survives -------
    xg = _embed(gid_ref, gemb_ref)                                      # (Lg*B, E)
    gi_g = jnp.dot(xg, gwih_ref[...],
                   preferred_element_type=jnp.float32) + gbih_ref[...]
    acc = {'goal': jnp.zeros((B, H), jnp.float32)}
    gtid = gtid_ref[...]

    def goal_step(t, h):
        acc['goal'] = jnp.where(gtid == t, h, acc['goal'])

    _gru_unrolled(gi_g, jnp.zeros((B, H), jnp.float32),
                  gwhh_ref[...], gbhh_ref[...], Lg, goal_step)
    goal_h = acc['goal']

    # ---- sys encoder over all B*S sentences in parallel ---------------------
    # Sentence rows are ordered n = s*B + b so that the context recurrence
    # below can slice contiguous (B, H) blocks per sentence step.
    # TODO(synk): on v7x the independent goal/sys encoder sections could be
    # split across the two TensorCores via pl.core_map; single-core here.
    xs = _embed(sid_ref, semb_ref)                                      # (W*NS, E)
    gi_s = jnp.dot(xs, swih_ref[...],
                   preferred_element_type=jnp.float32) + sbih_ref[...]
    acc['post'] = jnp.zeros((NS, H), jnp.float32)
    ptid = ptid_ref[...]

    def sys_step(w, h):
        acc['post'] = jnp.where(ptid == w, h, acc['post'])

    _gru_unrolled(gi_s, jnp.zeros((NS, H), jnp.float32),
                  swhh_ref[...], sbhh_ref[...], W, sys_step)
    post_h = acc['post']                                                # (S*B, H)

    # ---- context encoder (h0 = goal_h); select context / last_context -------
    gi_c = jnp.dot(post_h, cwih_ref[...],
                   preferred_element_type=jnp.float32) + cbih_ref[...]
    acc['ctx'] = jnp.zeros((B, H), jnp.float32)
    acc['lctx'] = jnp.zeros((B, H), jnp.float32)
    ctid = ctid_ref[...]
    ltid = ltid_ref[...]

    def ctx_step(s, h):
        acc['ctx'] = jnp.where(ctid == s, h, acc['ctx'])
        acc['lctx'] = jnp.where(ltid == s, h, acc['lctx'])

    _gru_unrolled(gi_c, goal_h, cwhh_ref[...], cbhh_ref[...], S, ctx_step)
    ctx = acc['ctx']
    lctx = acc['lctx']

    # ---- fused heads ---------------------------------------------------------
    # ctx-LHS heads stacked: cm = [mu | logvar | terminated layer-1]
    cm = jnp.dot(ctx, hw_ref[...],
                 preferred_element_type=jnp.float32) + hb_ref[...]       # (B, 3H)
    # last-context heads stacked: mll = [mu_last | logvar_last]
    mll = jnp.dot(lctx, mllw_ref[...],
                  preferred_element_type=jnp.float32) + mllb_ref[...]    # (B, 2H)
    mu_last = mll[:, :H]
    logvar_last = mll[:, H:]
    # reparameterize: z = eps * exp(0.5*logvar_last) + mu_last
    zlat = eps_ref[...] * jnp.exp(0.5 * logvar_last) + mu_last
    # concat_net without a lane concat: hidden = ctx @ W[:H] + z @ W[H:] + b
    hidden = (jnp.dot(ctx, cwc_ref[...], preferred_element_type=jnp.float32)
              + jnp.dot(zlat, cwz_ref[...], preferred_element_type=jnp.float32)
              + cb_ref[...])
    # terminated_net: ReLU of stacked layer-1 output, then Linear(H, 1)
    th = jnp.maximum(cm[:, 2 * H:], 0.0)
    term_ref[...] = (jnp.dot(th, tw2_ref[...],
                             preferred_element_type=jnp.float32) + tb2_ref[...])
    # stats slab (B, 4H) = [mu | logvar | mu_last | logvar_last] (lane-dense 128)
    stats_ref[:, :2 * H] = cm[:, :2 * H]
    stats_ref[:, 2 * H:] = mll

    # ---- usr decoder (teacher forcing) ---------------------------------------
    xd = _embed(did_ref, uemb_ref)                                      # (T*B, E)
    gi_d = jnp.dot(xd, dwih_ref[...],
                   preferred_element_type=jnp.float32) + dbih_ref[...]

    def dec_step(t, h):
        # stash hidden states batch-major (row = b*T + t) for one batched
        # projection afterwards; keeps the serial path to just h @ W_hh + gates.
        for b in range(B):
            hseq_ref[pl.ds(b * T + t, 1), :] = h[b:b + 1, :]

    _gru_unrolled(gi_d, hidden, dwhh_ref[...], dbhh_ref[...], T, dec_step)

    # one batched output projection + log_softmax (padded cols have bias -1e30)
    logits = (jnp.dot(hseq_ref[...], ow_ref[...],
                      preferred_element_type=jnp.float32) + ob_ref[...])  # (B*T, Vp)
    m = jnp.max(logits, axis=-1, keepdims=True)
    s = logits - m
    lse = jnp.log(jnp.sum(jnp.exp(s), axis=-1, keepdims=True))
    logp_ref[...] = s - lse


# -----------------------------------------------------------------------------
# Parameters (deterministic synthetic init); GRU gates stacked [r|z|n]
# -----------------------------------------------------------------------------
def init_params(key, cfg, voc_goal, voc_usr, voc_sys, v_pad=128):
    E, H = cfg['eu_dim'], cfg['hu_dim']
    keys = iter(jax.random.split(key, 64))

    def nrm(shape, scale=0.1):
        return (scale * jax.random.normal(next(keys), shape)).astype(jnp.float32)

    p = {}
    # goal encoder
    p['goal_emb'] = nrm((voc_goal, E))
    p['goal_wih'], p['goal_whh'] = nrm((E, 3 * H)), nrm((H, 3 * H))
    p['goal_bih'], p['goal_bhh'] = nrm((1, 3 * H)), nrm((1, 3 * H))
    # sys encoder
    p['sys_emb'] = nrm((voc_sys, E))
    p['sys_wih'], p['sys_whh'] = nrm((E, 3 * H)), nrm((H, 3 * H))
    p['sys_bih'], p['sys_bhh'] = nrm((1, 3 * H)), nrm((1, 3 * H))
    # context encoder (GRU H->H)
    p['ctx_wih'], p['ctx_whh'] = nrm((H, 3 * H)), nrm((H, 3 * H))
    p['ctx_bih'], p['ctx_bhh'] = nrm((1, 3 * H)), nrm((1, 3 * H))
    # ctx-LHS heads stacked [mu | logvar | terminated_net layer-1]
    p['head_w'], p['head_b'] = nrm((H, 3 * H)), nrm((1, 3 * H))
    # last-context heads stacked [mu_last | logvar_last]
    p['mll_w'], p['mll_b'] = nrm((H, 2 * H)), nrm((1, 2 * H))
    # concat_net weight split: hidden = ctx @ W_ctx + z @ W_z + b
    p['concat_w_ctx'], p['concat_w_z'] = nrm((H, H)), nrm((H, H))
    p['concat_b'] = nrm((1, H))
    # terminated_net second layer
    p['term_w2'], p['term_b2'] = nrm((H, 1)), nrm((1, 1))
    # usr decoder
    p['usr_emb'] = nrm((voc_usr, E))
    p['dec_wih'], p['dec_whh'] = nrm((E, 3 * H)), nrm((H, 3 * H))
    p['dec_bih'], p['dec_bhh'] = nrm((1, 3 * H)), nrm((1, 3 * H))
    # lane-dense padded output projection: cols [voc_usr:v_pad) are dead
    ow, ob = nrm((H, voc_usr)), nrm((1, voc_usr))
    p['out_w'] = jnp.concatenate(
        [ow, jnp.zeros((H, v_pad - voc_usr), jnp.float32)], axis=1)
    p['out_b'] = jnp.concatenate(
        [ob, jnp.full((1, v_pad - voc_usr), NEG_BIG, jnp.float32)], axis=1)
    return p


# -----------------------------------------------------------------------------
# VHUS forward (teacher-forcing path, origin_responses provided)
# -----------------------------------------------------------------------------
def vhus_forward(params, cfg, voc_usr, goals, goals_length, posts, posts_length,
                 origin_responses, eps):
    H = cfg['hu_dim']
    B, Lg = goals.shape
    _, S, W = posts.shape
    T = origin_responses.shape[1] - 1
    Vp = params['out_w'].shape[1]

    # Tiny index prep (fuses into one XLA prep fusion inside the jit).
    # Time-major token-id vectors + length-derived target indices; jnp.mod
    # reproduces PyTorch negative-index wrap of the reference gathers.
    gid = jnp.transpose(goals).reshape(Lg * B, 1).astype(jnp.int32)
    sid = jnp.transpose(posts, (2, 1, 0)).reshape(W * S * B, 1).astype(jnp.int32)
    did = jnp.transpose(origin_responses[:, :-1]).reshape(T * B, 1).astype(jnp.int32)
    gtid = jnp.mod(goals_length - 1, Lg).reshape(B, 1).astype(jnp.int32)
    ptid = jnp.mod(jnp.transpose(posts_length) - 1, W).reshape(S * B, 1).astype(jnp.int32)
    psl = jnp.sum((posts_length > 0).astype(jnp.int32), axis=1)
    ctid = jnp.mod(psl - 1, S).reshape(B, 1).astype(jnp.int32)
    ltid = jnp.mod(psl - 2, S).reshape(B, 1).astype(jnp.int32)

    # TODO(synk): if batch size grows past toy sizes, re-tile with a batch grid
    # and (8,128)-aligned BlockSpecs instead of whole-array VMEM residency.
    logp, stats, tval = pl.pallas_call(
        _vhus_kernel,
        out_shape=(jax.ShapeDtypeStruct((B * T, Vp), jnp.float32),   # log-probs
                   jax.ShapeDtypeStruct((B, 4 * H), jnp.float32),    # stats slab
                   jax.ShapeDtypeStruct((B, 1), jnp.float32)),       # terminated
        in_specs=[_vmem() for _ in range(38)],
        out_specs=(_vmem(), _vmem(), _vmem()),
        scratch_shapes=[pltpu.VMEM((B * T, H), jnp.float32)],
        compiler_params=pltpu.CompilerParams(vmem_limit_bytes=16 * 1024 * 1024),
    )(gid, gtid, sid, ptid, ctid, ltid, did,
      eps.astype(jnp.float32),
      params['goal_emb'], params['goal_wih'], params['goal_whh'],
      params['goal_bih'], params['goal_bhh'],
      params['sys_emb'], params['sys_wih'], params['sys_whh'],
      params['sys_bih'], params['sys_bhh'],
      params['ctx_wih'], params['ctx_whh'], params['ctx_bih'], params['ctx_bhh'],
      params['head_w'], params['head_b'], params['mll_w'], params['mll_b'],
      params['concat_w_ctx'], params['concat_w_z'], params['concat_b'],
      params['term_w2'], params['term_b2'],
      params['usr_emb'], params['dec_wih'], params['dec_whh'],
      params['dec_bih'], params['dec_bhh'],
      params['out_w'], params['out_b'])

    # a_weights[:, di, :] corresponds to PyTorch's decoder_outputs[di].
    a_weights = logp.reshape(B, T, Vp)[:, :, :voc_usr]
    t_weights = tval[:, 0]
    mu = stats[:, :H]
    logvar = stats[:, H:2 * H]
    mu_last = stats[:, 2 * H:3 * H]
    logvar_last = stats[:, 3 * H:]

    # TODO(synk): the Decoder's greedy-inference loop / sequence-symbol & length
    # bookkeeping (ret_dict) is host-side Python control flow and is not needed
    # for the returned a_weights in the teacher-forcing path.
    return a_weights, t_weights, (mu_last, logvar_last, mu, logvar)


# -----------------------------------------------------------------------------
# Main
# -----------------------------------------------------------------------------
if __name__ == "__main__":
    cfg = {'eu_dim': 32, 'hu_dim': 32, 'max_ulen': 8}
    voc_goal, voc_usr, voc_sys = 50, 40, 60

    key = jax.random.PRNGKey(0)
    pkey, dkey, ekey = jax.random.split(key, 3)
    params = init_params(pkey, cfg, voc_goal, voc_usr, voc_sys)

    B, goal_len, max_sen, max_word, resp_len = 2, 6, 3, 5, 8
    k1, k2, k3 = jax.random.split(dkey, 3)
    goals = jax.random.randint(k1, (B, goal_len), 1, voc_goal, dtype=jnp.int32)
    goals_length = jnp.array([6, 4], dtype=jnp.int32)
    posts = jax.random.randint(k2, (B, max_sen, max_word), 1, voc_sys,
                               dtype=jnp.int32)
    posts_length = jnp.array([[5, 3, 0], [4, 5, 2]], dtype=jnp.int32)
    origin_responses = jax.random.randint(k3, (B, resp_len), 0, voc_usr,
                                          dtype=jnp.int32)
    # deterministic stand-in for torch.randn_like in reparameterize
    eps = jax.random.normal(ekey, (B, cfg['hu_dim']), dtype=jnp.float32)

    fwd = jax.jit(lambda p, *args: vhus_forward(p, cfg, voc_usr, *args))
    a_weights, t_weights, (mu_last, logvar_last, mu, logvar) = fwd(
        params, goals, goals_length, posts, posts_length,
        origin_responses, eps)

    jax.block_until_ready(a_weights)
    jax.block_until_ready(t_weights)
    jax.block_until_ready(mu)
    jax.block_until_ready(logvar)
    jax.block_until_ready(mu_last)
    jax.block_until_ready(logvar_last)

    print("KERNEL_OK")
</pallas_src>

<mosaic_0001>
module attributes {stable_mosaic.version = 11 : i64} {
  func.func @_vhus_kernel(%arg0: memref<12x1xi32, #tpu.memory_space<vmem>>, %arg1: memref<2x1xi32, #tpu.memory_space<vmem>>, %arg2: memref<30x1xi32, #tpu.memory_space<vmem>>, %arg3: memref<6x1xi32, #tpu.memory_space<vmem>>, %arg4: memref<2x1xi32, #tpu.memory_space<vmem>>, %arg5: memref<2x1xi32, #tpu.memory_space<vmem>>, %arg6: memref<14x1xi32, #tpu.memory_space<vmem>>, %arg7: memref<2x32xf32, #tpu.memory_space<vmem>>, %arg8: memref<50x32xf32, #tpu.memory_space<vmem>>, %arg9: memref<32x96xf32, #tpu.memory_space<vmem>>, %arg10: memref<32x96xf32, #tpu.memory_space<vmem>>, %arg11: memref<1x96xf32, #tpu.memory_space<vmem>>, %arg12: memref<1x96xf32, #tpu.memory_space<vmem>>, %arg13: memref<60x32xf32, #tpu.memory_space<vmem>>, %arg14: memref<32x96xf32, #tpu.memory_space<vmem>>, %arg15: memref<32x96xf32, #tpu.memory_space<vmem>>, %arg16: memref<1x96xf32, #tpu.memory_space<vmem>>, %arg17: memref<1x96xf32, #tpu.memory_space<vmem>>, %arg18: memref<32x96xf32, #tpu.memory_space<vmem>>, %arg19: memref<32x96xf32, #tpu.memory_space<vmem>>, %arg20: memref<1x96xf32, #tpu.memory_space<vmem>>, %arg21: memref<1x96xf32, #tpu.memory_space<vmem>>, %arg22: memref<32x96xf32, #tpu.memory_space<vmem>>, %arg23: memref<1x96xf32, #tpu.memory_space<vmem>>, %arg24: memref<32x64xf32, #tpu.memory_space<vmem>>, %arg25: memref<1x64xf32, #tpu.memory_space<vmem>>, %arg26: memref<32x32xf32, #tpu.memory_space<vmem>>, %arg27: memref<32x32xf32, #tpu.memory_space<vmem>>, %arg28: memref<1x32xf32, #tpu.memory_space<vmem>>, %arg29: memref<32x1xf32, #tpu.memory_space<vmem>>, %arg30: memref<1x1xf32, #tpu.memory_space<vmem>>, %arg31: memref<40x32xf32, #tpu.memory_space<vmem>>, %arg32: memref<32x96xf32, #tpu.memory_space<vmem>>, %arg33: memref<32x96xf32, #tpu.memory_space<vmem>>, %arg34: memref<1x96xf32, #tpu.memory_space<vmem>>, %arg35: memref<1x96xf32, #tpu.memory_space<vmem>>, %arg36: memref<32x128xf32, #tpu.memory_space<vmem>>, %arg37: memref<1x128xf32, #tpu.memory_space<vmem>>, %arg38: memref<14x128xf32, #tpu.memory_space<vmem>>, %arg39: memref<2x128xf32, #tpu.memory_space<vmem>>, %arg40: memref<2x1xf32, #tpu.memory_space<vmem>>, %arg41: memref<14x32xf32, #tpu.memory_space<vmem>>) attributes {dimension_semantics = [], scalar_prefetch = 0 : i64, scratch_operands = 1 : i64, tpu.core_type = #tpu.core_type<tc>} {
    %0 = tpu.iota {dimensions = array<i32: 1>} : vector<12x50xi32>
    %c0 = arith.constant 0 : index
    %c0_0 = arith.constant 0 : index
    %1 = vector.load %arg0[%c0, %c0_0] : memref<12x1xi32, #tpu.memory_space<vmem>>, vector<12x1xi32>
    %2 = vector.broadcast %1 : vector<12x1xi32> to vector<12x50xi32>
    %3 = arith.cmpi eq, %2, %0 : vector<12x50xi32>
    %4 = arith.extui %3 : vector<12x50xi1> to vector<12x50xi32>
    %5 = arith.sitofp %4 : vector<12x50xi32> to vector<12x50xf32>
    %c0_1 = arith.constant 0 : index
    %c0_2 = arith.constant 0 : index
    %6 = vector.load %arg8[%c0_1, %c0_2] : memref<50x32xf32, #tpu.memory_space<vmem>>, vector<50x32xf32>
    %cst = arith.constant dense<0.000000e+00> : vector<12x32xf32>
    %7 = tpu.matmul %5, %6, %cst {dimension_numbers = #tpu.dot_dimension_numbers<[1], [0], [0], [1], [0, 0, 1, 1], [], []>} : vector<12x50xf32>, vector<50x32xf32>, vector<12x32xf32> -> vector<12x32xf32>
    %c0_3 = arith.constant 0 : index
    %c0_4 = arith.constant 0 : index
    %8 = vector.load %arg9[%c0_3, %c0_4] : memref<32x96xf32, #tpu.memory_space<vmem>>, vector<32x96xf32>
    %cst_5 = arith.constant dense<0.000000e+00> : vector<12x96xf32>
    %9 = tpu.matmul %7, %8, %cst_5 {dimension_numbers = #tpu.dot_dimension_numbers<[1], [0], [0], [1], [0, 0, 1, 1], [], []>} : vector<12x32xf32>, vector<32x96xf32>, vector<12x96xf32> -> vector<12x96xf32>
    %c0_6 = arith.constant 0 : index
    %c0_7 = arith.constant 0 : index
    %10 = vector.load %arg11[%c0_6, %c0_7] : memref<1x96xf32, #tpu.memory_space<vmem>>, vector<1x96xf32>
    %11 = vector.broadcast %10 : vector<1x96xf32> to vector<12x96xf32>
    %12 = arith.addf %9, %11 : vector<12x96xf32>
    %cst_8 = arith.constant 0.000000e+00 : f32
    %13 = vector.broadcast %cst_8 : f32 to vector<2x32xf32>
    %c0_9 = arith.constant 0 : index
    %c0_10 = arith.constant 0 : index
    %14 = vector.load %arg1[%c0_9, %c0_10] : memref<2x1xi32, #tpu.memory_space<vmem>>, vector<2x1xi32>
    %cst_11 = arith.constant 0.000000e+00 : f32
    %15 = vector.broadcast %cst_11 : f32 to vector<2x32xf32>
    %c0_12 = arith.constant 0 : index
    %c0_13 = arith.constant 0 : index
    %16 = vector.load %arg10[%c0_12, %c0_13] : memref<32x96xf32, #tpu.memory_space<vmem>>, vector<32x96xf32>
    %c0_14 = arith.constant 0 : index
    %c0_15 = arith.constant 0 : index
    %17 = vector.load %arg12[%c0_14, %c0_15] : memref<1x96xf32, #tpu.memory_space<vmem>>, vector<1x96xf32>
    %18 = vector.shape_cast %17 : vector<1x96xf32> to vector<1x96xf32>
    %19 = vector.broadcast %18 : vector<1x96xf32> to vector<2x96xf32>
    %20 = vector.extract_strided_slice %12 {offsets = [0, 0], sizes = [2, 96], strides = [1, 1]} : vector<12x96xf32> to vector<2x96xf32>
    %cst_16 = arith.constant dense<0.000000e+00> : vector<2x96xf32>
    %21 = tpu.matmul %15, %16, %cst_16 {dimension_numbers = #tpu.dot_dimension_numbers<[1], [0], [0], [1], [0, 0, 1, 1], [], []>} : vector<2x32xf32>, vector<32x96xf32>, vector<2x96xf32> -> vector<2x96xf32>
    %22 = arith.addf %21, %19 : vector<2x96xf32>
    %23 = vector.extract_strided_slice %20 {offsets = [0, 0], sizes = [2, 32], strides = [1, 1]} : vector<2x96xf32> to vector<2x32xf32>
    %24 = vector.extract_strided_slice %22 {offsets = [0, 0], sizes = [2, 32], strides = [1, 1]} : vector<2x96xf32> to vector<2x32xf32>
    %25 = arith.addf %23, %24 : vector<2x32xf32>
    %26 = arith.negf %25 : vector<2x32xf32>
    %27 = math.exp %26 : vector<2x32xf32>
    %cst_17 = arith.constant 1.000000e+00 : f32
    %28 = vector.broadcast %cst_17 : f32 to vector<2x32xf32>
    %29 = arith.addf %28, %27 : vector<2x32xf32>
    %30 = arith.divf %28, %29 : vector<2x32xf32>
    %31 = vector.extract_strided_slice %20 {offsets = [0, 32], sizes = [2, 32], strides = [1, 1]} : vector<2x96xf32> to vector<2x32xf32>
    %32 = vector.extract_strided_slice %22 {offsets = [0, 32], sizes = [2, 32], strides = [1, 1]} : vector<2x96xf32> to vector<2x32xf32>
    %33 = arith.addf %31, %32 : vector<2x32xf32>
    %34 = arith.negf %33 : vector<2x32xf32>
    %35 = math.exp %34 : vector<2x32xf32>
    %cst_18 = arith.constant 1.000000e+00 : f32
    %36 = vector.broadcast %cst_18 : f32 to vector<2x32xf32>
    %37 = arith.addf %36, %35 : vector<2x32xf32>
    %38 = arith.divf %36, %37 : vector<2x32xf32>
    %39 = vector.extract_strided_slice %20 {offsets = [0, 64], sizes = [2, 32], strides = [1, 1]} : vector<2x96xf32> to vector<2x32xf32>
    %40 = vector.extract_strided_slice %22 {offsets = [0, 64], sizes = [2, 32], strides = [1, 1]} : vector<2x96xf32> to vector<2x32xf32>
    %41 = arith.mulf %30, %40 : vector<2x32xf32>
    %42 = arith.addf %39, %41 : vector<2x32xf32>
    %43 = math.tanh %42 : vector<2x32xf32>
    %cst_19 = arith.constant 1.000000e+00 : f32
    %44 = vector.broadcast %cst_19 : f32 to vector<2x32xf32>
    %45 = arith.subf %44, %38 : vector<2x32xf32>
    %46 = arith.mulf %45, %43 : vector<2x32xf32>
    %47 = arith.mulf %38, %15 : vector<2x32xf32>
    %48 = arith.addf %46, %47 : vector<2x32xf32>
    %c0_i32 = arith.constant 0 : i32
    %49 = vector.broadcast %c0_i32 : i32 to vector<2x1xi32>
    %50 = arith.cmpi eq, %14, %49 : vector<2x1xi32>
    %51 = vector.shape_cast %50 : vector<2x1xi1> to vector<2x1xi1>
    %52 = vector.broadcast %51 : vector<2x1xi1> to vector<2x32xi1>
    %53 = arith.select %52, %48, %13 : vector<2x32xi1>, vector<2x32xf32>
    %54 = vector.extract_strided_slice %12 {offsets = [2, 0], sizes = [2, 96], strides = [1, 1]} : vector<12x96xf32> to vector<2x96xf32>
    %cst_20 = arith.constant dense<0.000000e+00> : vector<2x96xf32>
    %55 = tpu.matmul %48, %16, %cst_20 {dimension_numbers = #tpu.dot_dimension_numbers<[1], [0], [0], [1], [0, 0, 1, 1], [], []>} : vector<2x32xf32>, vector<32x96xf32>, vector<2x96xf32> -> vector<2x96xf32>
    %56 = arith.addf %55, %19 : vector<2x96xf32>
    %57 = vector.extract_strided_slice %54 {offsets = [0, 0], sizes = [2, 32], strides = [1, 1]} : vector<2x96xf32> to vector<2x32xf32>
    %58 = vector.extract_strided_slice %56 {offsets = [0, 0], sizes = [2, 32], strides = [1, 1]} : vector<2x96xf32> to vector<2x32xf32>
    %59 = arith.addf %57, %58 : vector<2x32xf32>
    %60 = arith.negf %59 : vector<2x32xf32>
    %61 = math.exp %60 : vector<2x32xf32>
    %cst_21 = arith.constant 1.000000e+00 : f32
    %62 = vector.broadcast %cst_21 : f32 to vector<2x32xf32>
    %63 = arith.addf %62, %61 : vector<2x32xf32>
    %64 = arith.divf %62, %63 : vector<2x32xf32>
    %65 = vector.extract_strided_slice %54 {offsets = [0, 32], sizes = [2, 32], strides = [1, 1]} : vector<2x96xf32> to vector<2x32xf32>
    %66 = vector.extract_strided_slice %56 {offsets = [0, 32], sizes = [2, 32], strides = [1, 1]} : vector<2x96xf32> to vector<2x32xf32>
    %67 = arith.addf %65, %66 : vector<2x32xf32>
    %68 = arith.negf %67 : vector<2x32xf32>
    %69 = math.exp %68 : vector<2x32xf32>
    %cst_22 = arith.constant 1.000000e+00 : f32
    %70 = vector.broadcast %cst_22 : f32 to vector<2x32xf32>
    %71 = arith.addf %70, %69 : vector<2x32xf32>
    %72 = arith.divf %70, %71 : vector<2x32xf32>
    %73 = vector.extract_strided_slice %54 {offsets = [0, 64], sizes = [2, 32], strides = [1, 1]} : vector<2x96xf32> to vector<2x32xf32>
    %74 = vector.extract_strided_slice %56 {offsets = [0, 64], sizes = [2, 32], strides = [1, 1]} : vector<2x96xf32> to vector<2x32xf32>
    %75 = arith.mulf %64, %74 : vector<2x32xf32>
    %76 = arith.addf %73, %75 : vector<2x32xf32>
    %77 = math.tanh %76 : vector<2x32xf32>
    %cst_23 = arith.constant 1.000000e+00 : f32
    %78 = vector.broadcast %cst_23 : f32 to vector<2x32xf32>
    %79 = arith.subf %78, %72 : vector<2x32xf32>
    %80 = arith.mulf %79, %77 : vector<2x32xf32>
    %81 = arith.mulf %72, %48 : vector<2x32xf32>
    %82 = arith.addf %80, %81 : vector<2x32xf32>
    %c1_i32 = arith.constant 1 : i32
    %83 = vector.broadcast %c1_i32 : i32 to vector<2x1xi32>
    %84 = arith.cmpi eq, %14, %83 : vector<2x1xi32>
    %85 = vector.shape_cast %84 : vector<2x1xi1> to vector<2x1xi1>
    %86 = vector.broadcast %85 : vector<2x1xi1> to vector<2x32xi1>
    %87 = arith.select %86, %82, %53 : vector<2x32xi1>, vector<2x32xf32>
    %88 = vector.extract_strided_slice %12 {offsets = [4, 0], sizes = [2, 96], strides = [1, 1]} : vector<12x96xf32> to vector<2x96xf32>
    %cst_24 = arith.constant dense<0.000000e+00> : vector<2x96xf32>
    %89 = tpu.matmul %82, %16, %cst_24 {dimension_numbers = #tpu.dot_dimension_numbers<[1], [0], [0], [1], [0, 0, 1, 1], [], []>} : vector<2x32xf32>, vector<32x96xf32>, vector<2x96xf32> -> vector<2x96xf32>
    %90 = arith.addf %89, %19 : vector<2x96xf32>
    %91 = vector.extract_strided_slice %88 {offsets = [0, 0], sizes = [2, 32], strides = [1, 1]} : vector<2x96xf32> to vector<2x32xf32>
    %92 = vector.extract_strided_slice %90 {offsets = [0, 0], sizes = [2, 32], strides = [1, 1]} : vector<2x96xf32> to vector<2x32xf32>
    %93 = arith.addf %91, %92 : vector<2x32xf32>
    %94 = arith.negf %93 : vector<2x32xf32>
    %95 = math.exp %94 : vector<2x32xf32>
    %cst_25 = arith.constant 1.000000e+00 : f32
    %96 = vector.broadcast %cst_25 : f32 to vector<2x32xf32>
    %97 = arith.addf %96, %95 : vector<2x32xf32>
    %98 = arith.divf %96, %97 : vector<2x32xf32>
    %99 = vector.extract_strided_slice %88 {offsets = [0, 32], sizes = [2, 32], strides = [1, 1]} : vector<2x96xf32> to vector<2x32xf32>
    %100 = vector.extract_strided_slice %90 {offsets = [0, 32], sizes = [2, 32], strides = [1, 1]} : vector<2x96xf32> to vector<2x32xf32>
    %101 = arith.addf %99, %100 : vector<2x32xf32>
    %102 = arith.negf %101 : vector<2x32xf32>
    %103 = math.exp %102 : vector<2x32xf32>
    %cst_26 = arith.constant 1.000000e+00 : f32
    %104 = vector.broadcast %cst_26 : f32 to vector<2x32xf32>
    %105 = arith.addf %104, %103 : vector<2x32xf32>
    %106 = arith.divf %104, %105 : vector<2x32xf32>
    %107 = vector.extract_strided_slice %88 {offsets = [0, 64], sizes = [2, 32], strides = [1, 1]} : vector<2x96xf32> to vector<2x32xf32>
    %108 = vector.extract_strided_slice %90 {offsets = [0, 64], sizes = [2, 32], strides = [1, 1]} : vector<2x96xf32> to vector<2x32xf32>
    %109 = arith.mulf %98, %108 : vector<2x32xf32>
    %110 = arith.addf %107, %109 : vector<2x32xf32>
    %111 = math.tanh %110 : vector<2x32xf32>
    %cst_27 = arith.constant 1.000000e+00 : f32
    %112 = vector.broadcast %cst_27 : f32 to vector<2x32xf32>
    %113 = arith.subf %112, %106 : vector<2x32xf32>
    %114 = arith.mulf %113, %111 : vector<2x32xf32>
    %115 = arith.mulf %106, %82 : vector<2x32xf32>
    %116 = arith.addf %114, %115 : vector<2x32xf32>
    %c2_i32 = arith.constant 2 : i32
    %117 = vector.broadcast %c2_i32 : i32 to vector<2x1xi32>
    %118 = arith.cmpi eq, %14, %117 : vector<2x1xi32>
    %119 = vector.shape_cast %118 : vector<2x1xi1> to vector<2x1xi1>
    %120 = vector.broadcast %119 : vector<2x1xi1> to vector<2x32xi1>
    %121 = arith.select %120, %116, %87 : vector<2x32xi1>, vector<2x32xf32>
    %122 = vector.extract_strided_slice %12 {offsets = [6, 0], sizes = [2, 96], strides = [1, 1]} : vector<12x96xf32> to vector<2x96xf32>
    %cst_28 = arith.constant dense<0.000000e+00> : vector<2x96xf32>
    %123 = tpu.matmul %116, %16, %cst_28 {dimension_numbers = #tpu.dot_dimension_numbers<[1], [0], [0], [1], [0, 0, 1, 1], [], []>} : vector<2x32xf32>, vector<32x96xf32>, vector<2x96xf32> -> vector<2x96xf32>
    %124 = arith.addf %123, %19 : vector<2x96xf32>
    %125 = vector.extract_strided_slice %122 {offsets = [0, 0], sizes = [2, 32], strides = [1, 1]} : vector<2x96xf32> to vector<2x32xf32>
    %126 = vector.extract_strided_slice %124 {offsets = [0, 0], sizes = [2, 32], strides = [1, 1]} : vector<2x96xf32> to vector<2x32xf32>
    %127 = arith.addf %125, %126 : vector<2x32xf32>
    %128 = arith.negf %127 : vector<2x32xf32>
    %129 = math.exp %128 : vector<2x32xf32>
    %cst_29 = arith.constant 1.000000e+00 : f32
    %130 = vector.broadcast %cst_29 : f32 to vector<2x32xf32>
    %131 = arith.addf %130, %129 : vector<2x32xf32>
    %132 = arith.divf %130, %131 : vector<2x32xf32>
    %133 = vector.extract_strided_slice %122 {offsets = [0, 32], sizes = [2, 32], strides = [1, 1]} : vector<2x96xf32> to vector<2x32xf32>
    %134 = vector.extract_strided_slice %124 {offsets = [0, 32], sizes = [2, 32], strides = [1, 1]} : vector<2x96xf32> to vector<2x32xf32>
    %135 = arith.addf %133, %134 : vector<2x32xf32>
    %136 = arith.negf %135 : vector<2x32xf32>
    %137 = math.exp %136 : vector<2x32xf32>
    %cst_30 = arith.constant 1.000000e+00 : f32
    %138 = vector.broadcast %cst_30 : f32 to vector<2x32xf32>
    %139 = arith.addf %138, %137 : vector<2x32xf32>
    %140 = arith.divf %138, %139 : vector<2x32xf32>
    %141 = vector.extract_strided_slice %122 {offsets = [0, 64], sizes = [2, 32], strides = [1, 1]} : vector<2x96xf32> to vector<2x32xf32>
    %142 = vector.extract_strided_slice %124 {offsets = [0, 64], sizes = [2, 32], strides = [1, 1]} : vector<2x96xf32> to vector<2x32xf32>
    %143 = arith.mulf %132, %142 : vector<2x32xf32>
    %144 = arith.addf %141, %143 : vector<2x32xf32>
    %145 = math.tanh %144 : vector<2x32xf32>
    %cst_31 = arith.constant 1.000000e+00 : f32
    %146 = vector.broadcast %cst_31 : f32 to vector<2x32xf32>
    %147 = arith.subf %146, %140 : vector<2x32xf32>
    %148 = arith.mulf %147, %145 : vector<2x32xf32>
    %149 = arith.mulf %140, %116 : vector<2x32xf32>
    %150 = arith.addf %148, %149 : vector<2x32xf32>
    %c3_i32 = arith.constant 3 : i32
    %151 = vector.broadcast %c3_i32 : i32 to vector<2x1xi32>
    %152 = arith.cmpi eq, %14, %151 : vector<2x1xi32>
    %153 = vector.shape_cast %152 : vector<2x1xi1> to vector<2x1xi1>
    %154 = vector.broadcast %153 : vector<2x1xi1> to vector<2x32xi1>
    %155 = arith.select %154, %150, %121 : vector<2x32xi1>, vector<2x32xf32>
    %156 = vector.extract_strided_slice %12 {offsets = [8, 0], sizes = [2, 96], strides = [1, 1]} : vector<12x96xf32> to vector<2x96xf32>
    %cst_32 = arith.constant dense<0.000000e+00> : vector<2x96xf32>
    %157 = tpu.matmul %150, %16, %cst_32 {dimension_numbers = #tpu.dot_dimension_numbers<[1], [0], [0], [1], [0, 0, 1, 1], [], []>} : vector<2x32xf32>, vector<32x96xf32>, vector<2x96xf32> -> vector<2x96xf32>
    %158 = arith.addf %157, %19 : vector<2x96xf32>
    %159 = vector.extract_strided_slice %156 {offsets = [0, 0], sizes = [2, 32], strides = [1, 1]} : vector<2x96xf32> to vector<2x32xf32>
    %160 = vector.extract_strided_slice %158 {offsets = [0, 0], sizes = [2, 32], strides = [1, 1]} : vector<2x96xf32> to vector<2x32xf32>
    %161 = arith.addf %159, %160 : vector<2x32xf32>
    %162 = arith.negf %161 : vector<2x32xf32>
    %163 = math.exp %162 : vector<2x32xf32>
    %cst_33 = arith.constant 1.000000e+00 : f32
    %164 = vector.broadcast %cst_33 : f32 to vector<2x32xf32>
    %165 = arith.addf %164, %163 : vector<2x32xf32>
    %166 = arith.divf %164, %165 : vector<2x32xf32>
    %167 = vector.extract_strided_slice %156 {offsets = [0, 32], sizes = [2, 32], strides = [1, 1]} : vector<2x96xf32> to vector<2x32xf32>
    %168 = vector.extract_strided_slice %158 {offsets = [0, 32], sizes = [2, 32], strides = [1, 1]} : vector<2x96xf32> to vector<2x32xf32>
    %169 = arith.addf %167, %168 : vector<2x32xf32>
    %170 = arith.negf %169 : vector<2x32xf32>
    %171 = math.exp %170 : vector<2x32xf32>
    %cst_34 = arith.constant 1.000000e+00 : f32
    %172 = vector.broadcast %cst_34 : f32 to vector<2x32xf32>
    %173 = arith.addf %172, %171 : vector<2x32xf32>
    %174 = arith.divf %172, %173 : vector<2x32xf32>
    %175 = vector.extract_strided_slice %156 {offsets = [0, 64], sizes = [2, 32], strides = [1, 1]} : vector<2x96xf32> to vector<2x32xf32>
    %176 = vector.extract_strided_slice %158 {offsets = [0, 64], sizes = [2, 32], strides = [1, 1]} : vector<2x96xf32> to vector<2x32xf32>
    %177 = arith.mulf %166, %176 : vector<2x32xf32>
    %178 = arith.addf %175, %177 : vector<2x32xf32>
    %179 = math.tanh %178 : vector<2x32xf32>
    %cst_35 = arith.constant 1.000000e+00 : f32
    %180 = vector.broadcast %cst_35 : f32 to vector<2x32xf32>
    %181 = arith.subf %180, %174 : vector<2x32xf32>
    %182 = arith.mulf %181, %179 : vector<2x32xf32>
    %183 = arith.mulf %174, %150 : vector<2x32xf32>
    %184 = arith.addf %182, %183 : vector<2x32xf32>
    %c4_i32 = arith.constant 4 : i32
    %185 = vector.broadcast %c4_i32 : i32 to vector<2x1xi32>
    %186 = arith.cmpi eq, %14, %185 : vector<2x1xi32>
    %187 = vector.shape_cast %186 : vector<2x1xi1> to vector<2x1xi1>
    %188 = vector.broadcast %187 : vector<2x1xi1> to vector<2x32xi1>
    %189 = arith.select %188, %184, %155 : vector<2x32xi1>, vector<2x32xf32>
    %190 = vector.extract_strided_slice %12 {offsets = [10, 0], sizes = [2, 96], strides = [1, 1]} : vector<12x96xf32> to vector<2x96xf32>
    %cst_36 = arith.constant dense<0.000000e+00> : vector<2x96xf32>
    %191 = tpu.matmul %184, %16, %cst_36 {dimension_numbers = #tpu.dot_dimension_numbers<[1], [0], [0], [1], [0, 0, 1, 1], [], []>} : vector<2x32xf32>, vector<32x96xf32>, vector<2x96xf32> -> vector<2x96xf32>
    %192 = arith.addf %191, %19 : vector<2x96xf32>
    %193 = vector.extract_strided_slice %190 {offsets = [0, 0], sizes = [2, 32], strides = [1, 1]} : vector<2x96xf32> to vector<2x32xf32>
    %194 = vector.extract_strided_slice %192 {offsets = [0, 0], sizes = [2, 32], strides = [1, 1]} : vector<2x96xf32> to vector<2x32xf32>
    %195 = arith.addf %193, %194 : vector<2x32xf32>
    %196 = arith.negf %195 : vector<2x32xf32>
    %197 = math.exp %196 : vector<2x32xf32>
    %cst_37 = arith.constant 1.000000e+00 : f32
    %198 = vector.broadcast %cst_37 : f32 to vector<2x32xf32>
    %199 = arith.addf %198, %197 : vector<2x32xf32>
    %200 = arith.divf %198, %199 : vector<2x32xf32>
    %201 = vector.extract_strided_slice %190 {offsets = [0, 32], sizes = [2, 32], strides = [1, 1]} : vector<2x96xf32> to vector<2x32xf32>
    %202 = vector.extract_strided_slice %192 {offsets = [0, 32], sizes = [2, 32], strides = [1, 1]} : vector<2x96xf32> to vector<2x32xf32>
    %203 = arith.addf %201, %202 : vector<2x32xf32>
    %204 = arith.negf %203 : vector<2x32xf32>
    %205 = math.exp %204 : vector<2x32xf32>
    %cst_38 = arith.constant 1.000000e+00 : f32
    %206 = vector.broadcast %cst_38 : f32 to vector<2x32xf32>
    %207 = arith.addf %206, %205 : vector<2x32xf32>
    %208 = arith.divf %206, %207 : vector<2x32xf32>
    %209 = vector.extract_strided_slice %190 {offsets = [0, 64], sizes = [2, 32], strides = [1, 1]} : vector<2x96xf32> to vector<2x32xf32>
    %210 = vector.extract_strided_slice %192 {offsets = [0, 64], sizes = [2, 32], strides = [1, 1]} : vector<2x96xf32> to vector<2x32xf32>
    %211 = arith.mulf %200, %210 : vector<2x32xf32>
    %212 = arith.addf %209, %211 : vector<2x32xf32>
    %213 = math.tanh %212 : vector<2x32xf32>
    %cst_39 = arith.constant 1.000000e+00 : f32
    %214 = vector.broadcast %cst_39 : f32 to vector<2x32xf32>
    %215 = arith.subf %214, %208 : vector<2x32xf32>
    %216 = arith.mulf %215, %213 : vector<2x32xf32>
    %217 = arith.mulf %208, %184 : vector<2x32xf32>
    %218 = arith.addf %216, %217 : vector<2x32xf32>
    %c5_i32 = arith.constant 5 : i32
    %219 = vector.broadcast %c5_i32 : i32 to vector<2x1xi32>
    %220 = arith.cmpi eq, %14, %219 : vector<2x1xi32>
    %221 = vector.shape_cast %220 : vector<2x1xi1> to vector<2x1xi1>
    %222 = vector.broadcast %221 : vector<2x1xi1> to vector<2x32xi1>
    %223 = arith.select %222, %218, %189 : vector<2x32xi1>, vector<2x32xf32>
    %224 = tpu.iota {dimensions = array<i32: 1>} : vector<30x60xi32>
    %c0_40 = arith.constant 0 : index
    %c0_41 = arith.constant 0 : index
    %225 = vector.load %arg2[%c0_40, %c0_41] : memref<30x1xi32, #tpu.memory_space<vmem>>, vector<30x1xi32>
    %226 = vector.broadcast %225 : vector<30x1xi32> to vector<30x60xi32>
    %227 = arith.cmpi eq, %226, %224 : vector<30x60xi32>
    %228 = arith.extui %227 : vector<30x60xi1> to vector<30x60xi32>
    %229 = arith.sitofp %228 : vector<30x60xi32> to vector<30x60xf32>
    %c0_42 = arith.constant 0 : index
    %c0_43 = arith.constant 0 : index
    %230 = vector.load %arg13[%c0_42, %c0_43] : memref<60x32xf32, #tpu.memory_space<vmem>>, vector<60x32xf32>
    %cst_44 = arith.constant dense<0.000000e+00> : vector<30x32xf32>
    %231 = tpu.matmul %229, %230, %cst_44 {dimension_numbers = #tpu.dot_dimension_numbers<[1], [0], [0], [1], [0, 0, 1, 1], [], []>} : vector<30x60xf32>, vector<60x32xf32>, vector<30x32xf32> -> vector<30x32xf32>
    %c0_45 = arith.constant 0 : index
    %c0_46 = arith.constant 0 : index
    %232 = vector.load %arg14[%c0_45, %c0_46] : memref<32x96xf32, #tpu.memory_space<vmem>>, vector<32x96xf32>
    %cst_47 = arith.constant dense<0.000000e+00> : vector<30x96xf32>
    %233 = tpu.matmul %231, %232, %cst_47 {dimension_numbers = #tpu.dot_dimension_numbers<[1], [0], [0], [1], [0, 0, 1, 1], [], []>} : vector<30x32xf32>, vector<32x96xf32>, vector<30x96xf32> -> vector<30x96xf32>
    %c0_48 = arith.constant 0 : index
    %c0_49 = arith.constant 0 : index
    %234 = vector.load %arg16[%c0_48, %c0_49] : memref<1x96xf32, #tpu.memory_space<vmem>>, vector<1x96xf32>
    %235 = vector.broadcast %234 : vector<1x96xf32> to vector<30x96xf32>
    %236 = arith.addf %233, %235 : vector<30x96xf32>
    %cst_50 = arith.constant 0.000000e+00 : f32
    %237 = vector.broadcast %cst_50 : f32 to vector<6x32xf32>
    %c0_51 = arith.constant 0 : index
    %c0_52 = arith.constant 0 : index
    %238 = vector.load %arg3[%c0_51, %c0_52] : memref<6x1xi32, #tpu.memory_space<vmem>>, vector<6x1xi32>
    %cst_53 = arith.constant 0.000000e+00 : f32
    %239 = vector.broadcast %cst_53 : f32 to vector<6x32xf32>
    %c0_54 = arith.constant 0 : index
    %c0_55 = arith.constant 0 : index
    %240 = vector.load %arg15[%c0_54, %c0_55] : memref<32x96xf32, #tpu.memory_space<vmem>>, vector<32x96xf32>
    %c0_56 = arith.constant 0 : index
    %c0_57 = arith.constant 0 : index
    %241 = vector.load %arg17[%c0_56, %c0_57] : memref<1x96xf32, #tpu.memory_space<vmem>>, vector<1x96xf32>
    %242 = vector.shape_cast %241 : vector<1x96xf32> to vector<1x96xf32>
    %243 = vector.broadcast %242 : vector<1x96xf32> to vector<6x96xf32>
    %244 = vector.extract_strided_slice %236 {offsets = [0, 0], sizes = [6, 96], strides = [1, 1]} : vector<30x96xf32> to vector<6x96xf32>
    %cst_58 = arith.constant dense<0.000000e+00> : vector<6x96xf32>
    %245 = tpu.matmul %239, %240, %cst_58 {dimension_numbers = #tpu.dot_dimension_numbers<[1], [0], [0], [1], [0, 0, 1, 1], [], []>} : vector<6x32xf32>, vector<32x96xf32>, vector<6x96xf32> -> vector<6x96xf32>
    %246 = arith.addf %245, %243 : vector<6x96xf32>
    %247 = vector.extract_strided_slice %244 {offsets = [0, 0], sizes = [6, 32], strides = [1, 1]} : vector<6x96xf32> to vector<6x32xf32>
    %248 = vector.extract_strided_slice %246 {offsets = [0, 0], sizes = [6, 32], strides = [1, 1]} : vector<6x96xf32> to vector<6x32xf32>
    %249 = arith.addf %247, %248 : vector<6x32xf32>
    %250 = arith.negf %249 : vector<6x32xf32>
    %251 = math.exp %250 : vector<6x32xf32>
    %cst_59 = arith.constant 1.000000e+00 : f32
    %252 = vector.broadcast %cst_59 : f32 to vector<6x32xf32>
    %253 = arith.addf %252, %251 : vector<6x32xf32>
    %254 = arith.divf %252, %253 : vector<6x32xf32>
    %255 = vector.extract_strided_slice %244 {offsets = [0, 32], sizes = [6, 32], strides = [1, 1]} : vector<6x96xf32> to vector<6x32xf32>
    %256 = vector.extract_strided_slice %246 {offsets = [0, 32], sizes = [6, 32], strides = [1, 1]} : vector<6x96xf32> to vector<6x32xf32>
    %257 = arith.addf %255, %256 : vector<6x32xf32>
    %258 = arith.negf %257 : vector<6x32xf32>
    %259 = math.exp %258 : vector<6x32xf32>
    %cst_60 = arith.constant 1.000000e+00 : f32
    %260 = vector.broadcast %cst_60 : f32 to vector<6x32xf32>
    %261 = arith.addf %260, %259 : vector<6x32xf32>
    %262 = arith.divf %260, %261 : vector<6x32xf32>
    %263 = vector.extract_strided_slice %244 {offsets = [0, 64], sizes = [6, 32], strides = [1, 1]} : vector<6x96xf32> to vector<6x32xf32>
    %264 = vector.extract_strided_slice %246 {offsets = [0, 64], sizes = [6, 32], strides = [1, 1]} : vector<6x96xf32> to vector<6x32xf32>
    %265 = arith.mulf %254, %264 : vector<6x32xf32>
    %266 = arith.addf %263, %265 : vector<6x32xf32>
    %267 = math.tanh %266 : vector<6x32xf32>
    %cst_61 = arith.constant 1.000000e+00 : f32
    %268 = vector.broadcast %cst_61 : f32 to vector<6x32xf32>
    %269 = arith.subf %268, %262 : vector<6x32xf32>
    %270 = arith.mulf %269, %267 : vector<6x32xf32>
    %271 = arith.mulf %262, %239 : vector<6x32xf32>
    %272 = arith.addf %270, %271 : vector<6x32xf32>
    %c0_i32_62 = arith.constant 0 : i32
    %273 = vector.broadcast %c0_i32_62 : i32 to vector<6x1xi32>
    %274 = arith.cmpi eq, %238, %273 : vector<6x1xi32>
    %275 = vector.shape_cast %274 : vector<6x1xi1> to vector<6x1xi1>
    %276 = vector.broadcast %275 : vector<6x1xi1> to vector<6x32xi1>
    %277 = arith.select %276, %272, %237 : vector<6x32xi1>, vector<6x32xf32>
    %278 = vector.extract_strided_slice %236 {offsets = [6, 0], sizes = [6, 96], strides = [1, 1]} : vector<30x96xf32> to vector<6x96xf32>
    %cst_63 = arith.constant dense<0.000000e+00> : vector<6x96xf32>
    %279 = tpu.matmul %272, %240, %cst_63 {dimension_numbers = #tpu.dot_dimension_numbers<[1], [0], [0], [1], [0, 0, 1, 1], [], []>} : vector<6x32xf32>, vector<32x96xf32>, vector<6x96xf32> -> vector<6x96xf32>
    %280 = arith.addf %279, %243 : vector<6x96xf32>
    %281 = vector.extract_strided_slice %278 {offsets = [0, 0], sizes = [6, 32], strides = [1, 1]} : vector<6x96xf32> to vector<6x32xf32>
    %282 = vector.extract_strided_slice %280 {offsets = [0, 0], sizes = [6, 32], strides = [1, 1]} : vector<6x96xf32> to vector<6x32xf32>
    %283 = arith.addf %281, %282 : vector<6x32xf32>
    %284 = arith.negf %283 : vector<6x32xf32>
    %285 = math.exp %284 : vector<6x32xf32>
    %cst_64 = arith.constant 1.000000e+00 : f32
    %286 = vector.broadcast %cst_64 : f32 to vector<6x32xf32>
    %287 = arith.addf %286, %285 : vector<6x32xf32>
    %288 = arith.divf %286, %287 : vector<6x32xf32>
    %289 = vector.extract_strided_slice %278 {offsets = [0, 32], sizes = [6, 32], strides = [1, 1]} : vector<6x96xf32> to vector<6x32xf32>
    %290 = vector.extract_strided_slice %280 {offsets = [0, 32], sizes = [6, 32], strides = [1, 1]} : vector<6x96xf32> to vector<6x32xf32>
    %291 = arith.addf %289, %290 : vector<6x32xf32>
    %292 = arith.negf %291 : vector<6x32xf32>
    %293 = math.exp %292 : vector<6x32xf32>
    %cst_65 = arith.constant 1.000000e+00 : f32
    %294 = vector.broadcast %cst_65 : f32 to vector<6x32xf32>
    %295 = arith.addf %294, %293 : vector<6x32xf32>
    %296 = arith.divf %294, %295 : vector<6x32xf32>
    %297 = vector.extract_strided_slice %278 {offsets = [0, 64], sizes = [6, 32], strides = [1, 1]} : vector<6x96xf32> to vector<6x32xf32>
    %298 = vector.extract_strided_slice %280 {offsets = [0, 64], sizes = [6, 32], strides = [1, 1]} : vector<6x96xf32> to vector<6x32xf32>
    %299 = arith.mulf %288, %298 : vector<6x32xf32>
    %300 = arith.addf %297, %299 : vector<6x32xf32>
    %301 = math.tanh %300 : vector<6x32xf32>
    %cst_66 = arith.constant 1.000000e+00 : f32
    %302 = vector.broadcast %cst_66 : f32 to vector<6x32xf32>
    %303 = arith.subf %302, %296 : vector<6x32xf32>
    %304 = arith.mulf %303, %301 : vector<6x32xf32>
    %305 = arith.mulf %296, %272 : vector<6x32xf32>
    %306 = arith.addf %304, %305 : vector<6x32xf32>
    %c1_i32_67 = arith.constant 1 : i32
    %307 = vector.broadcast %c1_i32_67 : i32 to vector<6x1xi32>
    %308 = arith.cmpi eq, %238, %307 : vector<6x1xi32>
    %309 = vector.shape_cast %308 : vector<6x1xi1> to vector<6x1xi1>
    %310 = vector.broadcast %309 : vector<6x1xi1> to vector<6x32xi1>
    %311 = arith.select %310, %306, %277 : vector<6x32xi1>, vector<6x32xf32>
    %312 = vector.extract_strided_slice %236 {offsets = [12, 0], sizes = [6, 96], strides = [1, 1]} : vector<30x96xf32> to vector<6x96xf32>
    %cst_68 = arith.constant dense<0.000000e+00> : vector<6x96xf32>
    %313 = tpu.matmul %306, %240, %cst_68 {dimension_numbers = #tpu.dot_dimension_numbers<[1], [0], [0], [1], [0, 0, 1, 1], [], []>} : vector<6x32xf32>, vector<32x96xf32>, vector<6x96xf32> -> vector<6x96xf32>
    %314 = arith.addf %313, %243 : vector<6x96xf32>
    %315 = vector.extract_strided_slice %312 {offsets = [0, 0], sizes = [6, 32], strides = [1, 1]} : vector<6x96xf32> to vector<6x32xf32>
    %316 = vector.extract_strided_slice %314 {offsets = [0, 0], sizes = [6, 32], strides = [1, 1]} : vector<6x96xf32> to vector<6x32xf32>
    %317 = arith.addf %315, %316 : vector<6x32xf32>
    %318 = arith.negf %317 : vector<6x32xf32>
    %319 = math.exp %318 : vector<6x32xf32>
    %cst_69 = arith.constant 1.000000e+00 : f32
    %320 = vector.broadcast %cst_69 : f32 to vector<6x32xf32>
    %321 = arith.addf %320, %319 : vector<6x32xf32>
    %322 = arith.divf %320, %321 : vector<6x32xf32>
    %323 = vector.extract_strided_slice %312 {offsets = [0, 32], sizes = [6, 32], strides = [1, 1]} : vector<6x96xf32> to vector<6x32xf32>
    %324 = vector.extract_strided_slice %314 {offsets = [0, 32], sizes = [6, 32], strides = [1, 1]} : vector<6x96xf32> to vector<6x32xf32>
    %325 = arith.addf %323, %324 : vector<6x32xf32>
    %326 = arith.negf %325 : vector<6x32xf32>
    %327 = math.exp %326 : vector<6x32xf32>
    %cst_70 = arith.constant 1.000000e+00 : f32
    %328 = vector.broadcast %cst_70 : f32 to vector<6x32xf32>
    %329 = arith.addf %328, %327 : vector<6x32xf32>
    %330 = arith.divf %328, %329 : vector<6x32xf32>
    %331 = vector.extract_strided_slice %312 {offsets = [0, 64], sizes = [6, 32], strides = [1, 1]} : vector<6x96xf32> to vector<6x32xf32>
    %332 = vector.extract_strided_slice %314 {offsets = [0, 64], sizes = [6, 32], strides = [1, 1]} : vector<6x96xf32> to vector<6x32xf32>
    %333 = arith.mulf %322, %332 : vector<6x32xf32>
    %334 = arith.addf %331, %333 : vector<6x32xf32>
    %335 = math.tanh %334 : vector<6x32xf32>
    %cst_71 = arith.constant 1.000000e+00 : f32
    %336 = vector.broadcast %cst_71 : f32 to vector<6x32xf32>
    %337 = arith.subf %336, %330 : vector<6x32xf32>
    %338 = arith.mulf %337, %335 : vector<6x32xf32>
    %339 = arith.mulf %330, %306 : vector<6x32xf32>
    %340 = arith.addf %338, %339 : vector<6x32xf32>
    %c2_i32_72 = arith.constant 2 : i32
    %341 = vector.broadcast %c2_i32_72 : i32 to vector<6x1xi32>
    %342 = arith.cmpi eq, %238, %341 : vector<6x1xi32>
    %343 = vector.shape_cast %342 : vector<6x1xi1> to vector<6x1xi1>
    %344 = vector.broadcast %343 : vector<6x1xi1> to vector<6x32xi1>
    %345 = arith.select %344, %340, %311 : vector<6x32xi1>, vector<6x32xf32>
    %346 = vector.extract_strided_slice %236 {offsets = [18, 0], sizes = [6, 96], strides = [1, 1]} : vector<30x96xf32> to vector<6x96xf32>
    %cst_73 = arith.constant dense<0.000000e+00> : vector<6x96xf32>
    %347 = tpu.matmul %340, %240, %cst_73 {dimension_numbers = #tpu.dot_dimension_numbers<[1], [0], [0], [1], [0, 0, 1, 1], [], []>} : vector<6x32xf32>, vector<32x96xf32>, vector<6x96xf32> -> vector<6x96xf32>
    %348 = arith.addf %347, %243 : vector<6x96xf32>
    %349 = vector.extract_strided_slice %346 {offsets = [0, 0], sizes = [6, 32], strides = [1, 1]} : vector<6x96xf32> to vector<6x32xf32>
    %350 = vector.extract_strided_slice %348 {offsets = [0, 0], sizes = [6, 32], strides = [1, 1]} : vector<6x96xf32> to vector<6x32xf32>
    %351 = arith.addf %349, %350 : vector<6x32xf32>
    %352 = arith.negf %351 : vector<6x32xf32>
    %353 = math.exp %352 : vector<6x32xf32>
    %cst_74 = arith.constant 1.000000e+00 : f32
    %354 = vector.broadcast %cst_74 : f32 to vector<6x32xf32>
    %355 = arith.addf %354, %353 : vector<6x32xf32>
    %356 = arith.divf %354, %355 : vector<6x32xf32>
    %357 = vector.extract_strided_slice %346 {offsets = [0, 32], sizes = [6, 32], strides = [1, 1]} : vector<6x96xf32> to vector<6x32xf32>
    %358 = vector.extract_strided_slice %348 {offsets = [0, 32], sizes = [6, 32], strides = [1, 1]} : vector<6x96xf32> to vector<6x32xf32>
    %359 = arith.addf %357, %358 : vector<6x32xf32>
    %360 = arith.negf %359 : vector<6x32xf32>
    %361 = math.exp %360 : vector<6x32xf32>
    %cst_75 = arith.constant 1.000000e+00 : f32
    %362 = vector.broadcast %cst_75 : f32 to vector<6x32xf32>
    %363 = arith.addf %362, %361 : vector<6x32xf32>
    %364 = arith.divf %362, %363 : vector<6x32xf32>
    %365 = vector.extract_strided_slice %346 {offsets = [0, 64], sizes = [6, 32], strides = [1, 1]} : vector<6x96xf32> to vector<6x32xf32>
    %366 = vector.extract_strided_slice %348 {offsets = [0, 64], sizes = [6, 32], strides = [1, 1]} : vector<6x96xf32> to vector<6x32xf32>
    %367 = arith.mulf %356, %366 : vector<6x32xf32>
    %368 = arith.addf %365, %367 : vector<6x32xf32>
    %369 = math.tanh %368 : vector<6x32xf32>
    %cst_76 = arith.constant 1.000000e+00 : f32
    %370 = vector.broadcast %cst_76 : f32 to vector<6x32xf32>
    %371 = arith.subf %370, %364 : vector<6x32xf32>
    %372 = arith.mulf %371, %369 : vector<6x32xf32>
    %373 = arith.mulf %364, %340 : vector<6x32xf32>
    %374 = arith.addf %372, %373 : vector<6x32xf32>
    %c3_i32_77 = arith.constant 3 : i32
    %375 = vector.broadcast %c3_i32_77 : i32 to vector<6x1xi32>
    %376 = arith.cmpi eq, %238, %375 : vector<6x1xi32>
    %377 = vector.shape_cast %376 : vector<6x1xi1> to vector<6x1xi1>
    %378 = vector.broadcast %377 : vector<6x1xi1> to vector<6x32xi1>
    %379 = arith.select %378, %374, %345 : vector<6x32xi1>, vector<6x32xf32>
    %380 = vector.extract_strided_slice %236 {offsets = [24, 0], sizes = [6, 96], strides = [1, 1]} : vector<30x96xf32> to vector<6x96xf32>
    %cst_78 = arith.constant dense<0.000000e+00> : vector<6x96xf32>
    %381 = tpu.matmul %374, %240, %cst_78 {dimension_numbers = #tpu.dot_dimension_numbers<[1], [0], [0], [1], [0, 0, 1, 1], [], []>} : vector<6x32xf32>, vector<32x96xf32>, vector<6x96xf32> -> vector<6x96xf32>
    %382 = arith.addf %381, %243 : vector<6x96xf32>
    %383 = vector.extract_strided_slice %380 {offsets = [0, 0], sizes = [6, 32], strides = [1, 1]} : vector<6x96xf32> to vector<6x32xf32>
    %384 = vector.extract_strided_slice %382 {offsets = [0, 0], sizes = [6, 32], strides = [1, 1]} : vector<6x96xf32> to vector<6x32xf32>
    %385 = arith.addf %383, %384 : vector<6x32xf32>
    %386 = arith.negf %385 : vector<6x32xf32>
    %387 = math.exp %386 : vector<6x32xf32>
    %cst_79 = arith.constant 1.000000e+00 : f32
    %388 = vector.broadcast %cst_79 : f32 to vector<6x32xf32>
    %389 = arith.addf %388, %387 : vector<6x32xf32>
    %390 = arith.divf %388, %389 : vector<6x32xf32>
    %391 = vector.extract_strided_slice %380 {offsets = [0, 32], sizes = [6, 32], strides = [1, 1]} : vector<6x96xf32> to vector<6x32xf32>
    %392 = vector.extract_strided_slice %382 {offsets = [0, 32], sizes = [6, 32], strides = [1, 1]} : vector<6x96xf32> to vector<6x32xf32>
    %393 = arith.addf %391, %392 : vector<6x32xf32>
    %394 = arith.negf %393 : vector<6x32xf32>
    %395 = math.exp %394 : vector<6x32xf32>
    %cst_80 = arith.constant 1.000000e+00 : f32
    %396 = vector.broadcast %cst_80 : f32 to vector<6x32xf32>
    %397 = arith.addf %396, %395 : vector<6x32xf32>
    %398 = arith.divf %396, %397 : vector<6x32xf32>
    %399 = vector.extract_strided_slice %380 {offsets = [0, 64], sizes = [6, 32], strides = [1, 1]} : vector<6x96xf32> to vector<6x32xf32>
    %400 = vector.extract_strided_slice %382 {offsets = [0, 64], sizes = [6, 32], strides = [1, 1]} : vector<6x96xf32> to vector<6x32xf32>
    %401 = arith.mulf %390, %400 : vector<6x32xf32>
    %402 = arith.addf %399, %401 : vector<6x32xf32>
    %403 = math.tanh %402 : vector<6x32xf32>
    %cst_81 = arith.constant 1.000000e+00 : f32
    %404 = vector.broadcast %cst_81 : f32 to vector<6x32xf32>
    %405 = arith.subf %404, %398 : vector<6x32xf32>
    %406 = arith.mulf %405, %403 : vector<6x32xf32>
    %407 = arith.mulf %398, %374 : vector<6x32xf32>
    %408 = arith.addf %406, %407 : vector<6x32xf32>
    %c4_i32_82 = arith.constant 4 : i32
    %409 = vector.broadcast %c4_i32_82 : i32 to vector<6x1xi32>
    %410 = arith.cmpi eq, %238, %409 : vector<6x1xi32>
    %411 = vector.shape_cast %410 : vector<6x1xi1> to vector<6x1xi1>
    %412 = vector.broadcast %411 : vector<6x1xi1> to vector<6x32xi1>
    %413 = arith.select %412, %408, %379 : vector<6x32xi1>, vector<6x32xf32>
    %c0_83 = arith.constant 0 : index
    %c0_84 = arith.constant 0 : index
    %414 = vector.load %arg18[%c0_83, %c0_84] : memref<32x96xf32, #tpu.memory_space<vmem>>, vector<32x96xf32>
    %cst_85 = arith.constant dense<0.000000e+00> : vector<6x96xf32>
    %415 = tpu.matmul %413, %414, %cst_85 {dimension_numbers = #tpu.dot_dimension_numbers<[1], [0], [0], [1], [0, 0, 1, 1], [], []>} : vector<6x32xf32>, vector<32x96xf32>, vector<6x96xf32> -> vector<6x96xf32>
    %c0_86 = arith.constant 0 : index
    %c0_87 = arith.constant 0 : index
    %416 = vector.load %arg20[%c0_86, %c0_87] : memref<1x96xf32, #tpu.memory_space<vmem>>, vector<1x96xf32>
    %417 = vector.broadcast %416 : vector<1x96xf32> to vector<6x96xf32>
    %418 = arith.addf %415, %417 : vector<6x96xf32>
    %cst_88 = arith.constant 0.000000e+00 : f32
    %419 = vector.broadcast %cst_88 : f32 to vector<2x32xf32>
    %cst_89 = arith.constant 0.000000e+00 : f32
    %420 = vector.broadcast %cst_89 : f32 to vector<2x32xf32>
    %c0_90 = arith.constant 0 : index
    %c0_91 = arith.constant 0 : index
    %421 = vector.load %arg4[%c0_90, %c0_91] : memref<2x1xi32, #tpu.memory_space<vmem>>, vector<2x1xi32>
    %c0_92 = arith.constant 0 : index
    %c0_93 = arith.constant 0 : index
    %422 = vector.load %arg5[%c0_92, %c0_93] : memref<2x1xi32, #tpu.memory_space<vmem>>, vector<2x1xi32>
    %c0_94 = arith.constant 0 : index
    %c0_95 = arith.constant 0 : index
    %423 = vector.load %arg19[%c0_94, %c0_95] : memref<32x96xf32, #tpu.memory_space<vmem>>, vector<32x96xf32>
    %c0_96 = arith.constant 0 : index
    %c0_97 = arith.constant 0 : index
    %424 = vector.load %arg21[%c0_96, %c0_97] : memref<1x96xf32, #tpu.memory_space<vmem>>, vector<1x96xf32>
    %425 = vector.shape_cast %424 : vector<1x96xf32> to vector<1x96xf32>
    %426 = vector.broadcast %425 : vector<1x96xf32> to vector<2x96xf32>
    %427 = vector.extract_strided_slice %418 {offsets = [0, 0], sizes = [2, 96], strides = [1, 1]} : vector<6x96xf32> to vector<2x96xf32>
    %cst_98 = arith.constant dense<0.000000e+00> : vector<2x96xf32>
    %428 = tpu.matmul %223, %423, %cst_98 {dimension_numbers = #tpu.dot_dimension_numbers<[1], [0], [0], [1], [0, 0, 1, 1], [], []>} : vector<2x32xf32>, vector<32x96xf32>, vector<2x96xf32> -> vector<2x96xf32>
    %429 = arith.addf %428, %426 : vector<2x96xf32>
    %430 = vector.extract_strided_slice %427 {offsets = [0, 0], sizes = [2, 32], strides = [1, 1]} : vector<2x96xf32> to vector<2x32xf32>
    %431 = vector.extract_strided_slice %429 {offsets = [0, 0], sizes = [2, 32], strides = [1, 1]} : vector<2x96xf32> to vector<2x32xf32>
    %432 = arith.addf %430, %431 : vector<2x32xf32>
    %433 = arith.negf %432 : vector<2x32xf32>
    %434 = math.exp %433 : vector<2x32xf32>
    %cst_99 = arith.constant 1.000000e+00 : f32
    %435 = vector.broadcast %cst_99 : f32 to vector<2x32xf32>
    %436 = arith.addf %435, %434 : vector<2x32xf32>
    %437 = arith.divf %435, %436 : vector<2x32xf32>
    %438 = vector.extract_strided_slice %427 {offsets = [0, 32], sizes = [2, 32], strides = [1, 1]} : vector<2x96xf32> to vector<2x32xf32>
    %439 = vector.extract_strided_slice %429 {offsets = [0, 32], sizes = [2, 32], strides = [1, 1]} : vector<2x96xf32> to vector<2x32xf32>
    %440 = arith.addf %438, %439 : vector<2x32xf32>
    %441 = arith.negf %440 : vector<2x32xf32>
    %442 = math.exp %441 : vector<2x32xf32>
    %cst_100 = arith.constant 1.000000e+00 : f32
    %443 = vector.broadcast %cst_100 : f32 to vector<2x32xf32>
    %444 = arith.addf %443, %442 : vector<2x32xf32>
    %445 = arith.divf %443, %444 : vector<2x32xf32>
    %446 = vector.extract_strided_slice %427 {offsets = [0, 64], sizes = [2, 32], strides = [1, 1]} : vector<2x96xf32> to vector<2x32xf32>
    %447 = vector.extract_strided_slice %429 {offsets = [0, 64], sizes = [2, 32], strides = [1, 1]} : vector<2x96xf32> to vector<2x32xf32>
    %448 = arith.mulf %437, %447 : vector<2x32xf32>
    %449 = arith.addf %446, %448 : vector<2x32xf32>
    %450 = math.tanh %449 : vector<2x32xf32>
    %cst_101 = arith.constant 1.000000e+00 : f32
    %451 = vector.broadcast %cst_101 : f32 to vector<2x32xf32>
    %452 = arith.subf %451, %445 : vector<2x32xf32>
    %453 = arith.mulf %452, %450 : vector<2x32xf32>
    %454 = arith.mulf %445, %223 : vector<2x32xf32>
    %455 = arith.addf %453, %454 : vector<2x32xf32>
    %c0_i32_102 = arith.constant 0 : i32
    %456 = vector.broadcast %c0_i32_102 : i32 to vector<2x1xi32>
    %457 = arith.cmpi eq, %421, %456 : vector<2x1xi32>
    %458 = vector.shape_cast %457 : vector<2x1xi1> to vector<2x1xi1>
    %459 = vector.broadcast %458 : vector<2x1xi1> to vector<2x32xi1>
    %460 = arith.select %459, %455, %419 : vector<2x32xi1>, vector<2x32xf32>
    %c0_i32_103 = arith.constant 0 : i32
    %461 = vector.broadcast %c0_i32_103 : i32 to vector<2x1xi32>
    %462 = arith.cmpi eq, %422, %461 : vector<2x1xi32>
    %463 = vector.shape_cast %462 : vector<2x1xi1> to vector<2x1xi1>
    %464 = vector.broadcast %463 : vector<2x1xi1> to vector<2x32xi1>
    %465 = arith.select %464, %455, %420 : vector<2x32xi1>, vector<2x32xf32>
    %466 = vector.extract_strided_slice %418 {offsets = [2, 0], sizes = [2, 96], strides = [1, 1]} : vector<6x96xf32> to vector<2x96xf32>
    %cst_104 = arith.constant dense<0.000000e+00> : vector<2x96xf32>
    %467 = tpu.matmul %455, %423, %cst_104 {dimension_numbers = #tpu.dot_dimension_numbers<[1], [0], [0], [1], [0, 0, 1, 1], [], []>} : vector<2x32xf32>, vector<32x96xf32>, vector<2x96xf32> -> vector<2x96xf32>
    %468 = arith.addf %467, %426 : vector<2x96xf32>
    %469 = vector.extract_strided_slice %466 {offsets = [0, 0], sizes = [2, 32], strides = [1, 1]} : vector<2x96xf32> to vector<2x32xf32>
    %470 = vector.extract_strided_slice %468 {offsets = [0, 0], sizes = [2, 32], strides = [1, 1]} : vector<2x96xf32> to vector<2x32xf32>
    %471 = arith.addf %469, %470 : vector<2x32xf32>
    %472 = arith.negf %471 : vector<2x32xf32>
    %473 = math.exp %472 : vector<2x32xf32>
    %cst_105 = arith.constant 1.000000e+00 : f32
    %474 = vector.broadcast %cst_105 : f32 to vector<2x32xf32>
    %475 = arith.addf %474, %473 : vector<2x32xf32>
    %476 = arith.divf %474, %475 : vector<2x32xf32>
    %477 = vector.extract_strided_slice %466 {offsets = [0, 32], sizes = [2, 32], strides = [1, 1]} : vector<2x96xf32> to vector<2x32xf32>
    %478 = vector.extract_strided_slice %468 {offsets = [0, 32], sizes = [2, 32], strides = [1, 1]} : vector<2x96xf32> to vector<2x32xf32>
    %479 = arith.addf %477, %478 : vector<2x32xf32>
    %480 = arith.negf %479 : vector<2x32xf32>
    %481 = math.exp %480 : vector<2x32xf32>
    %cst_106 = arith.constant 1.000000e+00 : f32
    %482 = vector.broadcast %cst_106 : f32 to vector<2x32xf32>
    %483 = arith.addf %482, %481 : vector<2x32xf32>
    %484 = arith.divf %482, %483 : vector<2x32xf32>
    %485 = vector.extract_strided_slice %466 {offsets = [0, 64], sizes = [2, 32], strides = [1, 1]} : vector<2x96xf32> to vector<2x32xf32>
    %486 = vector.extract_strided_slice %468 {offsets = [0, 64], sizes = [2, 32], strides = [1, 1]} : vector<2x96xf32> to vector<2x32xf32>
    %487 = arith.mulf %476, %486 : vector<2x32xf32>
    %488 = arith.addf %485, %487 : vector<2x32xf32>
    %489 = math.tanh %488 : vector<2x32xf32>
    %cst_107 = arith.constant 1.000000e+00 : f32
    %490 = vector.broadcast %cst_107 : f32 to vector<2x32xf32>
    %491 = arith.subf %490, %484 : vector<2x32xf32>
    %492 = arith.mulf %491, %489 : vector<2x32xf32>
    %493 = arith.mulf %484, %455 : vector<2x32xf32>
    %494 = arith.addf %492, %493 : vector<2x32xf32>
    %c1_i32_108 = arith.constant 1 : i32
    %495 = vector.broadcast %c1_i32_108 : i32 to vector<2x1xi32>
    %496 = arith.cmpi eq, %421, %495 : vector<2x1xi32>
    %497 = vector.shape_cast %496 : vector<2x1xi1> to vector<2x1xi1>
    %498 = vector.broadcast %497 : vector<2x1xi1> to vector<2x32xi1>
    %499 = arith.select %498, %494, %460 : vector<2x32xi1>, vector<2x32xf32>
    %c1_i32_109 = arith.constant 1 : i32
    %500 = vector.broadcast %c1_i32_109 : i32 to vector<2x1xi32>
    %501 = arith.cmpi eq, %422, %500 : vector<2x1xi32>
    %502 = vector.shape_cast %501 : vector<2x1xi1> to vector<2x1xi1>
    %503 = vector.broadcast %502 : vector<2x1xi1> to vector<2x32xi1>
    %504 = arith.select %503, %494, %465 : vector<2x32xi1>, vector<2x32xf32>
    %505 = vector.extract_strided_slice %418 {offsets = [4, 0], sizes = [2, 96], strides = [1, 1]} : vector<6x96xf32> to vector<2x96xf32>
    %cst_110 = arith.constant dense<0.000000e+00> : vector<2x96xf32>
    %506 = tpu.matmul %494, %423, %cst_110 {dimension_numbers = #tpu.dot_dimension_numbers<[1], [0], [0], [1], [0, 0, 1, 1], [], []>} : vector<2x32xf32>, vector<32x96xf32>, vector<2x96xf32> -> vector<2x96xf32>
    %507 = arith.addf %506, %426 : vector<2x96xf32>
    %508 = vector.extract_strided_slice %505 {offsets = [0, 0], sizes = [2, 32], strides = [1, 1]} : vector<2x96xf32> to vector<2x32xf32>
    %509 = vector.extract_strided_slice %507 {offsets = [0, 0], sizes = [2, 32], strides = [1, 1]} : vector<2x96xf32> to vector<2x32xf32>
    %510 = arith.addf %508, %509 : vector<2x32xf32>
    %511 = arith.negf %510 : vector<2x32xf32>
    %512 = math.exp %511 : vector<2x32xf32>
    %cst_111 = arith.constant 1.000000e+00 : f32
    %513 = vector.broadcast %cst_111 : f32 to vector<2x32xf32>
    %514 = arith.addf %513, %512 : vector<2x32xf32>
    %515 = arith.divf %513, %514 : vector<2x32xf32>
    %516 = vector.extract_strided_slice %505 {offsets = [0, 32], sizes = [2, 32], strides = [1, 1]} : vector<2x96xf32> to vector<2x32xf32>
    %517 = vector.extract_strided_slice %507 {offsets = [0, 32], sizes = [2, 32], strides = [1, 1]} : vector<2x96xf32> to vector<2x32xf32>
    %518 = arith.addf %516, %517 : vector<2x32xf32>
    %519 = arith.negf %518 : vector<2x32xf32>
    %520 = math.exp %519 : vector<2x32xf32>
    %cst_112 = arith.constant 1.000000e+00 : f32
    %521 = vector.broadcast %cst_112 : f32 to vector<2x32xf32>
    %522 = arith.addf %521, %520 : vector<2x32xf32>
    %523 = arith.divf %521, %522 : vector<2x32xf32>
    %524 = vector.extract_strided_slice %505 {offsets = [0, 64], sizes = [2, 32], strides = [1, 1]} : vector<2x96xf32> to vector<2x32xf32>
    %525 = vector.extract_strided_slice %507 {offsets = [0, 64], sizes = [2, 32], strides = [1, 1]} : vector<2x96xf32> to vector<2x32xf32>
    %526 = arith.mulf %515, %525 : vector<2x32xf32>
    %527 = arith.addf %524, %526 : vector<2x32xf32>
    %528 = math.tanh %527 : vector<2x32xf32>
    %cst_113 = arith.constant 1.000000e+00 : f32
    %529 = vector.broadcast %cst_113 : f32 to vector<2x32xf32>
    %530 = arith.subf %529, %523 : vector<2x32xf32>
    %531 = arith.mulf %530, %528 : vector<2x32xf32>
    %532 = arith.mulf %523, %494 : vector<2x32xf32>
    %533 = arith.addf %531, %532 : vector<2x32xf32>
    %c2_i32_114 = arith.constant 2 : i32
    %534 = vector.broadcast %c2_i32_114 : i32 to vector<2x1xi32>
    %535 = arith.cmpi eq, %421, %534 : vector<2x1xi32>
    %536 = vector.shape_cast %535 : vector<2x1xi1> to vector<2x1xi1>
    %537 = vector.broadcast %536 : vector<2x1xi1> to vector<2x32xi1>
    %538 = arith.select %537, %533, %499 : vector<2x32xi1>, vector<2x32xf32>
    %c2_i32_115 = arith.constant 2 : i32
    %539 = vector.broadcast %c2_i32_115 : i32 to vector<2x1xi32>
    %540 = arith.cmpi eq, %422, %539 : vector<2x1xi32>
    %541 = vector.shape_cast %540 : vector<2x1xi1> to vector<2x1xi1>
    %542 = vector.broadcast %541 : vector<2x1xi1> to vector<2x32xi1>
    %543 = arith.select %542, %533, %504 : vector<2x32xi1>, vector<2x32xf32>
    %c0_116 = arith.constant 0 : index
    %c0_117 = arith.constant 0 : index
    %544 = vector.load %arg22[%c0_116, %c0_117] : memref<32x96xf32, #tpu.memory_space<vmem>>, vector<32x96xf32>
    %cst_118 = arith.constant dense<0.000000e+00> : vector<2x96xf32>
    %545 = tpu.matmul %538, %544, %cst_118 {dimension_numbers = #tpu.dot_dimension_numbers<[1], [0], [0], [1], [0, 0, 1, 1], [], []>} : vector<2x32xf32>, vector<32x96xf32>, vector<2x96xf32> -> vector<2x96xf32>
    %c0_119 = arith.constant 0 : index
    %c0_120 = arith.constant 0 : index
    %546 = vector.load %arg23[%c0_119, %c0_120] : memref<1x96xf32, #tpu.memory_space<vmem>>, vector<1x96xf32>
    %547 = vector.broadcast %546 : vector<1x96xf32> to vector<2x96xf32>
    %548 = arith.addf %545, %547 : vector<2x96xf32>
    %c0_121 = arith.constant 0 : index
    %c0_122 = arith.constant 0 : index
    %549 = vector.load %arg24[%c0_121, %c0_122] : memref<32x64xf32, #tpu.memory_space<vmem>>, vector<32x64xf32>
    %cst_123 = arith.constant dense<0.000000e+00> : vector<2x64xf32>
    %550 = tpu.matmul %543, %549, %cst_123 {dimension_numbers = #tpu.dot_dimension_numbers<[1], [0], [0], [1], [0, 0, 1, 1], [], []>} : vector<2x32xf32>, vector<32x64xf32>, vector<2x64xf32> -> vector<2x64xf32>
    %c0_124 = arith.constant 0 : index
    %c0_125 = arith.constant 0 : index
    %551 = vector.load %arg25[%c0_124, %c0_125] : memref<1x64xf32, #tpu.memory_space<vmem>>, vector<1x64xf32>
    %552 = vector.broadcast %551 : vector<1x64xf32> to vector<2x64xf32>
    %553 = arith.addf %550, %552 : vector<2x64xf32>
    %554 = vector.extract_strided_slice %553 {offsets = [0, 0], sizes = [2, 32], strides = [1, 1]} : vector<2x64xf32> to vector<2x32xf32>
    %555 = vector.extract_strided_slice %553 {offsets = [0, 32], sizes = [2, 32], strides = [1, 1]} : vector<2x64xf32> to vector<2x32xf32>
    %c0_126 = arith.constant 0 : index
    %c0_127 = arith.constant 0 : index
    %556 = vector.load %arg7[%c0_126, %c0_127] : memref<2x32xf32, #tpu.memory_space<vmem>>, vector<2x32xf32>
    %cst_128 = arith.constant 5.000000e-01 : f32
    %557 = vector.broadcast %cst_128 : f32 to vector<2x32xf32>
    %558 = arith.mulf %557, %555 : vector<2x32xf32>
    %559 = math.exp %558 : vector<2x32xf32>
    %560 = arith.mulf %556, %559 : vector<2x32xf32>
    %561 = arith.addf %560, %554 : vector<2x32xf32>
    %c0_129 = arith.constant 0 : index
    %c0_130 = arith.constant 0 : index
    %562 = vector.load %arg26[%c0_129, %c0_130] : memref<32x32xf32, #tpu.memory_space<vmem>>, vector<32x32xf32>
    %cst_131 = arith.constant dense<0.000000e+00> : vector<2x32xf32>
    %563 = tpu.matmul %538, %562, %cst_131 {dimension_numbers = #tpu.dot_dimension_numbers<[1], [0], [0], [1], [0, 0, 1, 1], [], []>} : vector<2x32xf32>, vector<32x32xf32>, vector<2x32xf32> -> vector<2x32xf32>
    %c0_132 = arith.constant 0 : index
    %c0_133 = arith.constant 0 : index
    %564 = vector.load %arg27[%c0_132, %c0_133] : memref<32x32xf32, #tpu.memory_space<vmem>>, vector<32x32xf32>
    %cst_134 = arith.constant dense<0.000000e+00> : vector<2x32xf32>
    %565 = tpu.matmul %561, %564, %cst_134 {dimension_numbers = #tpu.dot_dimension_numbers<[1], [0], [0], [1], [0, 0, 1, 1], [], []>} : vector<2x32xf32>, vector<32x32xf32>, vector<2x32xf32> -> vector<2x32xf32>
    %566 = arith.addf %563, %565 : vector<2x32xf32>
    %c0_135 = arith.constant 0 : index
    %c0_136 = arith.constant 0 : index
    %567 = vector.load %arg28[%c0_135, %c0_136] : memref<1x32xf32, #tpu.memory_space<vmem>>, vector<1x32xf32>
    %568 = vector.broadcast %567 : vector<1x32xf32> to vector<2x32xf32>
    %569 = arith.addf %566, %568 : vector<2x32xf32>
    %570 = vector.extract_strided_slice %548 {offsets = [0, 64], sizes = [2, 32], strides = [1, 1]} : vector<2x96xf32> to vector<2x32xf32>
    %cst_137 = arith.constant 0.000000e+00 : f32
    %571 = vector.broadcast %cst_137 : f32 to vector<2x32xf32>
    %572 = arith.maximumf %570, %571 : vector<2x32xf32>
    %c0_138 = arith.constant 0 : index
    %c0_139 = arith.constant 0 : index
    %573 = vector.load %arg29[%c0_138, %c0_139] : memref<32x1xf32, #tpu.memory_space<vmem>>, vector<32x1xf32>
    %cst_140 = arith.constant dense<0.000000e+00> : vector<2x1xf32>
    %574 = tpu.matmul %572, %573, %cst_140 {dimension_numbers = #tpu.dot_dimension_numbers<[1], [0], [0], [1], [0, 0, 1, 1], [], []>} : vector<2x32xf32>, vector<32x1xf32>, vector<2x1xf32> -> vector<2x1xf32>
    %c0_141 = arith.constant 0 : index
    %c0_142 = arith.constant 0 : index
    %575 = vector.load %arg30[%c0_141, %c0_142] : memref<1x1xf32, #tpu.memory_space<vmem>>, vector<1x1xf32>
    %576 = vector.broadcast %575 : vector<1x1xf32> to vector<2x1xf32>
    %577 = arith.addf %574, %576 : vector<2x1xf32>
    %c0_143 = arith.constant 0 : index
    %c0_144 = arith.constant 0 : index
    %578 = vector.load %arg40[%c0_143, %c0_144] : memref<2x1xf32, #tpu.memory_space<vmem>>, vector<2x1xf32>
    tpu.vector_store %arg40[%c0_143, %c0_144], %577 {strides = array<i32>} : memref<2x1xf32, #tpu.memory_space<vmem>>, vector<2x1xf32>,
    %579 = vector.extract_strided_slice %548 {offsets = [0, 0], sizes = [2, 64], strides = [1, 1]} : vector<2x96xf32> to vector<2x64xf32>
    %c0_145 = arith.constant 0 : index
    %c0_146 = arith.constant 0 : index
    %580 = vector.load %arg39[%c0_145, %c0_146] : memref<2x128xf32, #tpu.memory_space<vmem>>, vector<2x64xf32>
    tpu.vector_store %arg39[%c0_145, %c0_146], %579 {strides = array<i32>} : memref<2x128xf32, #tpu.memory_space<vmem>>, vector<2x64xf32>,
    %c0_147 = arith.constant 0 : index
    %c64 = arith.constant 64 : index
    %581 = vector.load %arg39[%c0_147, %c64] : memref<2x128xf32, #tpu.memory_space<vmem>>, vector<2x64xf32>
    tpu.vector_store %arg39[%c0_147, %c64], %553 {strides = array<i32>} : memref<2x128xf32, #tpu.memory_space<vmem>>, vector<2x64xf32>,
    %582 = tpu.iota {dimensions = array<i32: 1>} : vector<14x40xi32>
    %c0_148 = arith.constant 0 : index
    %c0_149 = arith.constant 0 : index
    %583 = vector.load %arg6[%c0_148, %c0_149] : memref<14x1xi32, #tpu.memory_space<vmem>>, vector<14x1xi32>
    %584 = vector.broadcast %583 : vector<14x1xi32> to vector<14x40xi32>
    %585 = arith.cmpi eq, %584, %582 : vector<14x40xi32>
    %586 = arith.extui %585 : vector<14x40xi1> to vector<14x40xi32>
    %587 = arith.sitofp %586 : vector<14x40xi32> to vector<14x40xf32>
    %c0_150 = arith.constant 0 : index
    %c0_151 = arith.constant 0 : index
    %588 = vector.load %arg31[%c0_150, %c0_151] : memref<40x32xf32, #tpu.memory_space<vmem>>, vector<40x32xf32>
    %cst_152 = arith.constant dense<0.000000e+00> : vector<14x32xf32>
    %589 = tpu.matmul %587, %588, %cst_152 {dimension_numbers = #tpu.dot_dimension_numbers<[1], [0], [0], [1], [0, 0, 1, 1], [], []>} : vector<14x40xf32>, vector<40x32xf32>, vector<14x32xf32> -> vector<14x32xf32>
    %c0_153 = arith.constant 0 : index
    %c0_154 = arith.constant 0 : index
    %590 = vector.load %arg32[%c0_153, %c0_154] : memref<32x96xf32, #tpu.memory_space<vmem>>, vector<32x96xf32>
    %cst_155 = arith.constant dense<0.000000e+00> : vector<14x96xf32>
    %591 = tpu.matmul %589, %590, %cst_155 {dimension_numbers = #tpu.dot_dimension_numbers<[1], [0], [0], [1], [0, 0, 1, 1], [], []>} : vector<14x32xf32>, vector<32x96xf32>, vector<14x96xf32> -> vector<14x96xf32>
    %c0_156 = arith.constant 0 : index
    %c0_157 = arith.constant 0 : index
    %592 = vector.load %arg34[%c0_156, %c0_157] : memref<1x96xf32, #tpu.memory_space<vmem>>, vector<1x96xf32>
    %593 = vector.broadcast %592 : vector<1x96xf32> to vector<14x96xf32>
    %594 = arith.addf %591, %593 : vector<14x96xf32>
    %c0_158 = arith.constant 0 : index
    %c0_159 = arith.constant 0 : index
    %595 = vector.load %arg33[%c0_158, %c0_159] : memref<32x96xf32, #tpu.memory_space<vmem>>, vector<32x96xf32>
    %c0_160 = arith.constant 0 : index
    %c0_161 = arith.constant 0 : index
    %596 = vector.load %arg35[%c0_160, %c0_161] : memref<1x96xf32, #tpu.memory_space<vmem>>, vector<1x96xf32>
    %597 = vector.shape_cast %596 : vector<1x96xf32> to vector<1x96xf32>
    %598 = vector.broadcast %597 : vector<1x96xf32> to vector<2x96xf32>
    %599 = vector.extract_strided_slice %594 {offsets = [0, 0], sizes = [2, 96], strides = [1, 1]} : vector<14x96xf32> to vector<2x96xf32>
    %cst_162 = arith.constant dense<0.000000e+00> : vector<2x96xf32>
    %600 = tpu.matmul %569, %595, %cst_162 {dimension_numbers = #tpu.dot_dimension_numbers<[1], [0], [0], [1], [0, 0, 1, 1], [], []>} : vector<2x32xf32>, vector<32x96xf32>, vector<2x96xf32> -> vector<2x96xf32>
    %601 = arith.addf %600, %598 : vector<2x96xf32>
    %602 = vector.extract_strided_slice %599 {offsets = [0, 0], sizes = [2, 32], strides = [1, 1]} : vector<2x96xf32> to vector<2x32xf32>
    %603 = vector.extract_strided_slice %601 {offsets = [0, 0], sizes = [2, 32], strides = [1, 1]} : vector<2x96xf32> to vector<2x32xf32>
    %604 = arith.addf %602, %603 : vector<2x32xf32>
    %605 = arith.negf %604 : vector<2x32xf32>
    %606 = math.exp %605 : vector<2x32xf32>
    %cst_163 = arith.constant 1.000000e+00 : f32
    %607 = vector.broadcast %cst_163 : f32 to vector<2x32xf32>
    %608 = arith.addf %607, %606 : vector<2x32xf32>
    %609 = arith.divf %607, %608 : vector<2x32xf32>
    %610 = vector.extract_strided_slice %599 {offsets = [0, 32], sizes = [2, 32], strides = [1, 1]} : vector<2x96xf32> to vector<2x32xf32>
    %611 = vector.extract_strided_slice %601 {offsets = [0, 32], sizes = [2, 32], strides = [1, 1]} : vector<2x96xf32> to vector<2x32xf32>
    %612 = arith.addf %610, %611 : vector<2x32xf32>
    %613 = arith.negf %612 : vector<2x32xf32>
    %614 = math.exp %613 : vector<2x32xf32>
    %cst_164 = arith.constant 1.000000e+00 : f32
    %615 = vector.broadcast %cst_164 : f32 to vector<2x32xf32>
    %616 = arith.addf %615, %614 : vector<2x32xf32>
    %617 = arith.divf %615, %616 : vector<2x32xf32>
    %618 = vector.extract_strided_slice %599 {offsets = [0, 64], sizes = [2, 32], strides = [1, 1]} : vector<2x96xf32> to vector<2x32xf32>
    %619 = vector.extract_strided_slice %601 {offsets = [0, 64], sizes = [2, 32], strides = [1, 1]} : vector<2x96xf32> to vector<2x32xf32>
    %620 = arith.mulf %609, %619 : vector<2x32xf32>
    %621 = arith.addf %618, %620 : vector<2x32xf32>
    %622 = math.tanh %621 : vector<2x32xf32>
    %cst_165 = arith.constant 1.000000e+00 : f32
    %623 = vector.broadcast %cst_165 : f32 to vector<2x32xf32>
    %624 = arith.subf %623, %617 : vector<2x32xf32>
    %625 = arith.mulf %624, %622 : vector<2x32xf32>
    %626 = arith.mulf %617, %569 : vector<2x32xf32>
    %627 = arith.addf %625, %626 : vector<2x32xf32>
    %628 = vector.extract_strided_slice %627 {offsets = [0, 0], sizes = [1, 32], strides = [1, 1]} : vector<2x32xf32> to vector<1x32xf32>
    %c0_166 = arith.constant 0 : index
    %c0_167 = arith.constant 0 : index
    %629 = vector.load %arg41[%c0_166, %c0_167] : memref<14x32xf32, #tpu.memory_space<vmem>>, vector<1x32xf32>
    tpu.vector_store %arg41[%c0_166, %c0_167], %628 {strides = array<i32>} : memref<14x32xf32, #tpu.memory_space<vmem>>, vector<1x32xf32>,
    %630 = vector.extract_strided_slice %627 {offsets = [1, 0], sizes = [1, 32], strides = [1, 1]} : vector<2x32xf32> to vector<1x32xf32>
    %c7 = arith.constant 7 : index
    %c0_168 = arith.constant 0 : index
    %631 = vector.load %arg41[%c7, %c0_168] : memref<14x32xf32, #tpu.memory_space<vmem>>, vector<1x32xf32>
    tpu.vector_store %arg41[%c7, %c0_168], %630 {strides = array<i32>} : memref<14x32xf32, #tpu.memory_space<vmem>>, vector<1x32xf32>,
    %632 = vector.extract_strided_slice %594 {offsets = [2, 0], sizes = [2, 96], strides = [1, 1]} : vector<14x96xf32> to vector<2x96xf32>
    %cst_169 = arith.constant dense<0.000000e+00> : vector<2x96xf32>
    %633 = tpu.matmul %627, %595, %cst_169 {dimension_numbers = #tpu.dot_dimension_numbers<[1], [0], [0], [1], [0, 0, 1, 1], [], []>} : vector<2x32xf32>, vector<32x96xf32>, vector<2x96xf32> -> vector<2x96xf32>
    %634 = arith.addf %633, %598 : vector<2x96xf32>
    %635 = vector.extract_strided_slice %632 {offsets = [0, 0], sizes = [2, 32], strides = [1, 1]} : vector<2x96xf32> to vector<2x32xf32>
    %636 = vector.extract_strided_slice %634 {offsets = [0, 0], sizes = [2, 32], strides = [1, 1]} : vector<2x96xf32> to vector<2x32xf32>
    %637 = arith.addf %635, %636 : vector<2x32xf32>
    %638 = arith.negf %637 : vector<2x32xf32>
    %639 = math.exp %638 : vector<2x32xf32>
    %cst_170 = arith.constant 1.000000e+00 : f32
    %640 = vector.broadcast %cst_170 : f32 to vector<2x32xf32>
    %641 = arith.addf %640, %639 : vector<2x32xf32>
    %642 = arith.divf %640, %641 : vector<2x32xf32>
    %643 = vector.extract_strided_slice %632 {offsets = [0, 32], sizes = [2, 32], strides = [1, 1]} : vector<2x96xf32> to vector<2x32xf32>
    %644 = vector.extract_strided_slice %634 {offsets = [0, 32], sizes = [2, 32], strides = [1, 1]} : vector<2x96xf32> to vector<2x32xf32>
    %645 = arith.addf %643, %644 : vector<2x32xf32>
    %646 = arith.negf %645 : vector<2x32xf32>
    %647 = math.exp %646 : vector<2x32xf32>
    %cst_171 = arith.constant 1.000000e+00 : f32
    %648 = vector.broadcast %cst_171 : f32 to vector<2x32xf32>
    %649 = arith.addf %648, %647 : vector<2x32xf32>
    %650 = arith.divf %648, %649 : vector<2x32xf32>
    %651 = vector.extract_strided_slice %632 {offsets = [0, 64], sizes = [2, 32], strides = [1, 1]} : vector<2x96xf32> to vector<2x32xf32>
    %652 = vector.extract_strided_slice %634 {offsets = [0, 64], sizes = [2, 32], strides = [1, 1]} : vector<2x96xf32> to vector<2x32xf32>
    %653 = arith.mulf %642, %652 : vector<2x32xf32>
    %654 = arith.addf %651, %653 : vector<2x32xf32>
    %655 = math.tanh %654 : vector<2x32xf32>
    %cst_172 = arith.constant 1.000000e+00 : f32
    %656 = vector.broadcast %cst_172 : f32 to vector<2x32xf32>
    %657 = arith.subf %656, %650 : vector<2x32xf32>
    %658 = arith.mulf %657, %655 : vector<2x32xf32>
    %659 = arith.mulf %650, %627 : vector<2x32xf32>
    %660 = arith.addf %658, %659 : vector<2x32xf32>
    %661 = vector.extract_strided_slice %660 {offsets = [0, 0], sizes = [1, 32], strides = [1, 1]} : vector<2x32xf32> to vector<1x32xf32>
    %c1 = arith.constant 1 : index
    %c0_173 = arith.constant 0 : index
    %662 = vector.load %arg41[%c1, %c0_173] : memref<14x32xf32, #tpu.memory_space<vmem>>, vector<1x32xf32>
    tpu.vector_store %arg41[%c1, %c0_173], %661 {strides = array<i32>} : memref<14x32xf32, #tpu.memory_space<vmem>>, vector<1x32xf32>,
    %663 = vector.extract_strided_slice %660 {offsets = [1, 0], sizes = [1, 32], strides = [1, 1]} : vector<2x32xf32> to vector<1x32xf32>
    %c8 = arith.constant 8 : index
    %c0_174 = arith.constant 0 : index
    %664 = vector.load %arg41[%c8, %c0_174] : memref<14x32xf32, #tpu.memory_space<vmem>>, vector<1x32xf32>
    tpu.vector_store %arg41[%c8, %c0_174], %663 {strides = array<i32>} : memref<14x32xf32, #tpu.memory_space<vmem>>, vector<1x32xf32>,
    %665 = vector.extract_strided_slice %594 {offsets = [4, 0], sizes = [2, 96], strides = [1, 1]} : vector<14x96xf32> to vector<2x96xf32>
    %cst_175 = arith.constant dense<0.000000e+00> : vector<2x96xf32>
    %666 = tpu.matmul %660, %595, %cst_175 {dimension_numbers = #tpu.dot_dimension_numbers<[1], [0], [0], [1], [0, 0, 1, 1], [], []>} : vector<2x32xf32>, vector<32x96xf32>, vector<2x96xf32> -> vector<2x96xf32>
    %667 = arith.addf %666, %598 : vector<2x96xf32>
    %668 = vector.extract_strided_slice %665 {offsets = [0, 0], sizes = [2, 32], strides = [1, 1]} : vector<2x96xf32> to vector<2x32xf32>
    %669 = vector.extract_strided_slice %667 {offsets = [0, 0], sizes = [2, 32], strides = [1, 1]} : vector<2x96xf32> to vector<2x32xf32>
    %670 = arith.addf %668, %669 : vector<2x32xf32>
    %671 = arith.negf %670 : vector<2x32xf32>
    %672 = math.exp %671 : vector<2x32xf32>
    %cst_176 = arith.constant 1.000000e+00 : f32
    %673 = vector.broadcast %cst_176 : f32 to vector<2x32xf32>
    %674 = arith.addf %673, %672 : vector<2x32xf32>
    %675 = arith.divf %673, %674 : vector<2x32xf32>
    %676 = vector.extract_strided_slice %665 {offsets = [0, 32], sizes = [2, 32], strides = [1, 1]} : vector<2x96xf32> to vector<2x32xf32>
    %677 = vector.extract_strided_slice %667 {offsets = [0, 32], sizes = [2, 32], strides = [1, 1]} : vector<2x96xf32> to vector<2x32xf32>
    %678 = arith.addf %676, %677 : vector<2x32xf32>
    %679 = arith.negf %678 : vector<2x32xf32>
    %680 = math.exp %679 : vector<2x32xf32>
    %cst_177 = arith.constant 1.000000e+00 : f32
    %681 = vector.broadcast %cst_177 : f32 to vector<2x32xf32>
    %682 = arith.addf %681, %680 : vector<2x32xf32>
    %683 = arith.divf %681, %682 : vector<2x32xf32>
    %684 = vector.extract_strided_slice %665 {offsets = [0, 64], sizes = [2, 32], strides = [1, 1]} : vector<2x96xf32> to vector<2x32xf32>
    %685 = vector.extract_strided_slice %667 {offsets = [0, 64], sizes = [2, 32], strides = [1, 1]} : vector<2x96xf32> to vector<2x32xf32>
    %686 = arith.mulf %675, %685 : vector<2x32xf32>
    %687 = arith.addf %684, %686 : vector<2x32xf32>
    %688 = math.tanh %687 : vector<2x32xf32>
    %cst_178 = arith.constant 1.000000e+00 : f32
    %689 = vector.broadcast %cst_178 : f32 to vector<2x32xf32>
    %690 = arith.subf %689, %683 : vector<2x32xf32>
    %691 = arith.mulf %690, %688 : vector<2x32xf32>
    %692 = arith.mulf %683, %660 : vector<2x32xf32>
    %693 = arith.addf %691, %692 : vector<2x32xf32>
    %694 = vector.extract_strided_slice %693 {offsets = [0, 0], sizes = [1, 32], strides = [1, 1]} : vector<2x32xf32> to vector<1x32xf32>
    %c2 = arith.constant 2 : index
    %c0_179 = arith.constant 0 : index
    %695 = vector.load %arg41[%c2, %c0_179] : memref<14x32xf32, #tpu.memory_space<vmem>>, vector<1x32xf32>
    tpu.vector_store %arg41[%c2, %c0_179], %694 {strides = array<i32>} : memref<14x32xf32, #tpu.memory_space<vmem>>, vector<1x32xf32>,
    %696 = vector.extract_strided_slice %693 {offsets = [1, 0], sizes = [1, 32], strides = [1, 1]} : vector<2x32xf32> to vector<1x32xf32>
    %c9 = arith.constant 9 : index
    %c0_180 = arith.constant 0 : index
    %697 = vector.load %arg41[%c9, %c0_180] : memref<14x32xf32, #tpu.memory_space<vmem>>, vector<1x32xf32>
    tpu.vector_store %arg41[%c9, %c0_180], %696 {strides = array<i32>} : memref<14x32xf32, #tpu.memory_space<vmem>>, vector<1x32xf32>,
    %698 = vector.extract_strided_slice %594 {offsets = [6, 0], sizes = [2, 96], strides = [1, 1]} : vector<14x96xf32> to vector<2x96xf32>
    %cst_181 = arith.constant dense<0.000000e+00> : vector<2x96xf32>
    %699 = tpu.matmul %693, %595, %cst_181 {dimension_numbers = #tpu.dot_dimension_numbers<[1], [0], [0], [1], [0, 0, 1, 1], [], []>} : vector<2x32xf32>, vector<32x96xf32>, vector<2x96xf32> -> vector<2x96xf32>
    %700 = arith.addf %699, %598 : vector<2x96xf32>
    %701 = vector.extract_strided_slice %698 {offsets = [0, 0], sizes = [2, 32], strides = [1, 1]} : vector<2x96xf32> to vector<2x32xf32>
    %702 = vector.extract_strided_slice %700 {offsets = [0, 0], sizes = [2, 32], strides = [1, 1]} : vector<2x96xf32> to vector<2x32xf32>
    %703 = arith.addf %701, %702 : vector<2x32xf32>
    %704 = arith.negf %703 : vector<2x32xf32>
    %705 = math.exp %704 : vector<2x32xf32>
    %cst_182 = arith.constant 1.000000e+00 : f32
    %706 = vector.broadcast %cst_182 : f32 to vector<2x32xf32>
    %707 = arith.addf %706, %705 : vector<2x32xf32>
    %708 = arith.divf %706, %707 : vector<2x32xf32>
    %709 = vector.extract_strided_slice %698 {offsets = [0, 32], sizes = [2, 32], strides = [1, 1]} : vector<2x96xf32> to vector<2x32xf32>
    %710 = vector.extract_strided_slice %700 {offsets = [0, 32], sizes = [2, 32], strides = [1, 1]} : vector<2x96xf32> to vector<2x32xf32>
    %711 = arith.addf %709, %710 : vector<2x32xf32>
    %712 = arith.negf %711 : vector<2x32xf32>
    %713 = math.exp %712 : vector<2x32xf32>
    %cst_183 = arith.constant 1.000000e+00 : f32
    %714 = vector.broadcast %cst_183 : f32 to vector<2x32xf32>
    %715 = arith.addf %714, %713 : vector<2x32xf32>
    %716 = arith.divf %714, %715 : vector<2x32xf32>
    %717 = vector.extract_strided_slice %698 {offsets = [0, 64], sizes = [2, 32], strides = [1, 1]} : vector<2x96xf32> to vector<2x32xf32>
    %718 = vector.extract_strided_slice %700 {offsets = [0, 64], sizes = [2, 32], strides = [1, 1]} : vector<2x96xf32> to vector<2x32xf32>
    %719 = arith.mulf %708, %718 : vector<2x32xf32>
    %720 = arith.addf %717, %719 : vector<2x32xf32>
    %721 = math.tanh %720 : vector<2x32xf32>
    %cst_184 = arith.constant 1.000000e+00 : f32
    %722 = vector.broadcast %cst_184 : f32 to vector<2x32xf32>
    %723 = arith.subf %722, %716 : vector<2x32xf32>
    %724 = arith.mulf %723, %721 : vector<2x32xf32>
    %725 = arith.mulf %716, %693 : vector<2x32xf32>
    %726 = arith.addf %724, %725 : vector<2x32xf32>
    %727 = vector.extract_strided_slice %726 {offsets = [0, 0], sizes = [1, 32], strides = [1, 1]} : vector<2x32xf32> to vector<1x32xf32>
    %c3 = arith.constant 3 : index
    %c0_185 = arith.constant 0 : index
    %728 = vector.load %arg41[%c3, %c0_185] : memref<14x32xf32, #tpu.memory_space<vmem>>, vector<1x32xf32>
    tpu.vector_store %arg41[%c3, %c0_185], %727 {strides = array<i32>} : memref<14x32xf32, #tpu.memory_space<vmem>>, vector<1x32xf32>,
    %729 = vector.extract_strided_slice %726 {offsets = [1, 0], sizes = [1, 32], strides = [1, 1]} : vector<2x32xf32> to vector<1x32xf32>
    %c10 = arith.constant 10 : index
    %c0_186 = arith.constant 0 : index
    %730 = vector.load %arg41[%c10, %c0_186] : memref<14x32xf32, #tpu.memory_space<vmem>>, vector<1x32xf32>
    tpu.vector_store %arg41[%c10, %c0_186], %729 {strides = array<i32>} : memref<14x32xf32, #tpu.memory_space<vmem>>, vector<1x32xf32>,
    %731 = vector.extract_strided_slice %594 {offsets = [8, 0], sizes = [2, 96], strides = [1, 1]} : vector<14x96xf32> to vector<2x96xf32>
    %cst_187 = arith.constant dense<0.000000e+00> : vector<2x96xf32>
    %732 = tpu.matmul %726, %595, %cst_187 {dimension_numbers = #tpu.dot_dimension_numbers<[1], [0], [0], [1], [0, 0, 1, 1], [], []>} : vector<2x32xf32>, vector<32x96xf32>, vector<2x96xf32> -> vector<2x96xf32>
    %733 = arith.addf %732, %598 : vector<2x96xf32>
    %734 = vector.extract_strided_slice %731 {offsets = [0, 0], sizes = [2, 32], strides = [1, 1]} : vector<2x96xf32> to vector<2x32xf32>
    %735 = vector.extract_strided_slice %733 {offsets = [0, 0], sizes = [2, 32], strides = [1, 1]} : vector<2x96xf32> to vector<2x32xf32>
    %736 = arith.addf %734, %735 : vector<2x32xf32>
    %737 = arith.negf %736 : vector<2x32xf32>
    %738 = math.exp %737 : vector<2x32xf32>
    %cst_188 = arith.constant 1.000000e+00 : f32
    %739 = vector.broadcast %cst_188 : f32 to vector<2x32xf32>
    %740 = arith.addf %739, %738 : vector<2x32xf32>
    %741 = arith.divf %739, %740 : vector<2x32xf32>
    %742 = vector.extract_strided_slice %731 {offsets = [0, 32], sizes = [2, 32], strides = [1, 1]} : vector<2x96xf32> to vector<2x32xf32>
    %743 = vector.extract_strided_slice %733 {offsets = [0, 32], sizes = [2, 32], strides = [1, 1]} : vector<2x96xf32> to vector<2x32xf32>
    %744 = arith.addf %742, %743 : vector<2x32xf32>
    %745 = arith.negf %744 : vector<2x32xf32>
    %746 = math.exp %745 : vector<2x32xf32>
    %cst_189 = arith.constant 1.000000e+00 : f32
    %747 = vector.broadcast %cst_189 : f32 to vector<2x32xf32>
    %748 = arith.addf %747, %746 : vector<2x32xf32>
    %749 = arith.divf %747, %748 : vector<2x32xf32>
    %750 = vector.extract_strided_slice %731 {offsets = [0, 64], sizes = [2, 32], strides = [1, 1]} : vector<2x96xf32> to vector<2x32xf32>
    %751 = vector.extract_strided_slice %733 {offsets = [0, 64], sizes = [2, 32], strides = [1, 1]} : vector<2x96xf32> to vector<2x32xf32>
    %752 = arith.mulf %741, %751 : vector<2x32xf32>
    %753 = arith.addf %750, %752 : vector<2x32xf32>
    %754 = math.tanh %753 : vector<2x32xf32>
    %cst_190 = arith.constant 1.000000e+00 : f32
    %755 = vector.broadcast %cst_190 : f32 to vector<2x32xf32>
    %756 = arith.subf %755, %749 : vector<2x32xf32>
    %757 = arith.mulf %756, %754 : vector<2x32xf32>
    %758 = arith.mulf %749, %726 : vector<2x32xf32>
    %759 = arith.addf %757, %758 : vector<2x32xf32>
    %760 = vector.extract_strided_slice %759 {offsets = [0, 0], sizes = [1, 32], strides = [1, 1]} : vector<2x32xf32> to vector<1x32xf32>
    %c4 = arith.constant 4 : index
    %c0_191 = arith.constant 0 : index
    %761 = vector.load %arg41[%c4, %c0_191] : memref<14x32xf32, #tpu.memory_space<vmem>>, vector<1x32xf32>
    tpu.vector_store %arg41[%c4, %c0_191], %760 {strides = array<i32>} : memref<14x32xf32, #tpu.memory_space<vmem>>, vector<1x32xf32>,
    %762 = vector.extract_strided_slice %759 {offsets = [1, 0], sizes = [1, 32], strides = [1, 1]} : vector<2x32xf32> to vector<1x32xf32>
    %c11 = arith.constant 11 : index
    %c0_192 = arith.constant 0 : index
    %763 = vector.load %arg41[%c11, %c0_192] : memref<14x32xf32, #tpu.memory_space<vmem>>, vector<1x32xf32>
    tpu.vector_store %arg41[%c11, %c0_192], %762 {strides = array<i32>} : memref<14x32xf32, #tpu.memory_space<vmem>>, vector<1x32xf32>,
    %764 = vector.extract_strided_slice %594 {offsets = [10, 0], sizes = [2, 96], strides = [1, 1]} : vector<14x96xf32> to vector<2x96xf32>
    %cst_193 = arith.constant dense<0.000000e+00> : vector<2x96xf32>
    %765 = tpu.matmul %759, %595, %cst_193 {dimension_numbers = #tpu.dot_dimension_numbers<[1], [0], [0], [1], [0, 0, 1, 1], [], []>} : vector<2x32xf32>, vector<32x96xf32>, vector<2x96xf32> -> vector<2x96xf32>
    %766 = arith.addf %765, %598 : vector<2x96xf32>
    %767 = vector.extract_strided_slice %764 {offsets = [0, 0], sizes = [2, 32], strides = [1, 1]} : vector<2x96xf32> to vector<2x32xf32>
    %768 = vector.extract_strided_slice %766 {offsets = [0, 0], sizes = [2, 32], strides = [1, 1]} : vector<2x96xf32> to vector<2x32xf32>
    %769 = arith.addf %767, %768 : vector<2x32xf32>
    %770 = arith.negf %769 : vector<2x32xf32>
    %771 = math.exp %770 : vector<2x32xf32>
    %cst_194 = arith.constant 1.000000e+00 : f32
    %772 = vector.broadcast %cst_194 : f32 to vector<2x32xf32>
    %773 = arith.addf %772, %771 : vector<2x32xf32>
    %774 = arith.divf %772, %773 : vector<2x32xf32>
    %775 = vector.extract_strided_slice %764 {offsets = [0, 32], sizes = [2, 32], strides = [1, 1]} : vector<2x96xf32> to vector<2x32xf32>
    %776 = vector.extract_strided_slice %766 {offsets = [0, 32], sizes = [2, 32], strides = [1, 1]} : vector<2x96xf32> to vector<2x32xf32>
    %777 = arith.addf %775, %776 : vector<2x32xf32>
    %778 = arith.negf %777 : vector<2x32xf32>
    %779 = math.exp %778 : vector<2x32xf32>
    %cst_195 = arith.constant 1.000000e+00 : f32
    %780 = vector.broadcast %cst_195 : f32 to vector<2x32xf32>
    %781 = arith.addf %780, %779 : vector<2x32xf32>
    %782 = arith.divf %780, %781 : vector<2x32xf32>
    %783 = vector.extract_strided_slice %764 {offsets = [0, 64], sizes = [2, 32], strides = [1, 1]} : vector<2x96xf32> to vector<2x32xf32>
    %784 = vector.extract_strided_slice %766 {offsets = [0, 64], sizes = [2, 32], strides = [1, 1]} : vector<2x96xf32> to vector<2x32xf32>
    %785 = arith.mulf %774, %784 : vector<2x32xf32>
    %786 = arith.addf %783, %785 : vector<2x32xf32>
    %787 = math.tanh %786 : vector<2x32xf32>
    %cst_196 = arith.constant 1.000000e+00 : f32
    %788 = vector.broadcast %cst_196 : f32 to vector<2x32xf32>
    %789 = arith.subf %788, %782 : vector<2x32xf32>
    %790 = arith.mulf %789, %787 : vector<2x32xf32>
    %791 = arith.mulf %782, %759 : vector<2x32xf32>
    %792 = arith.addf %790, %791 : vector<2x32xf32>
    %793 = vector.extract_strided_slice %792 {offsets = [0, 0], sizes = [1, 32], strides = [1, 1]} : vector<2x32xf32> to vector<1x32xf32>
    %c5 = arith.constant 5 : index
    %c0_197 = arith.constant 0 : index
    %794 = vector.load %arg41[%c5, %c0_197] : memref<14x32xf32, #tpu.memory_space<vmem>>, vector<1x32xf32>
    tpu.vector_store %arg41[%c5, %c0_197], %793 {strides = array<i32>} : memref<14x32xf32, #tpu.memory_space<vmem>>, vector<1x32xf32>,
    %795 = vector.extract_strided_slice %792 {offsets = [1, 0], sizes = [1, 32], strides = [1, 1]} : vector<2x32xf32> to vector<1x32xf32>
    %c12 = arith.constant 12 : index
    %c0_198 = arith.constant 0 : index
    %796 = vector.load %arg41[%c12, %c0_198] : memref<14x32xf32, #tpu.memory_space<vmem>>, vector<1x32xf32>
    tpu.vector_store %arg41[%c12, %c0_198], %795 {strides = array<i32>} : memref<14x32xf32, #tpu.memory_space<vmem>>, vector<1x32xf32>,
    %797 = vector.extract_strided_slice %594 {offsets = [12, 0], sizes = [2, 96], strides = [1, 1]} : vector<14x96xf32> to vector<2x96xf32>
    %cst_199 = arith.constant dense<0.000000e+00> : vector<2x96xf32>
    %798 = tpu.matmul %792, %595, %cst_199 {dimension_numbers = #tpu.dot_dimension_numbers<[1], [0], [0], [1], [0, 0, 1, 1], [], []>} : vector<2x32xf32>, vector<32x96xf32>, vector<2x96xf32> -> vector<2x96xf32>
    %799 = arith.addf %798, %598 : vector<2x96xf32>
    %800 = vector.extract_strided_slice %797 {offsets = [0, 0], sizes = [2, 32], strides = [1, 1]} : vector<2x96xf32> to vector<2x32xf32>
    %801 = vector.extract_strided_slice %799 {offsets = [0, 0], sizes = [2, 32], strides = [1, 1]} : vector<2x96xf32> to vector<2x32xf32>
    %802 = arith.addf %800, %801 : vector<2x32xf32>
    %803 = arith.negf %802 : vector<2x32xf32>
    %804 = math.exp %803 : vector<2x32xf32>
    %cst_200 = arith.constant 1.000000e+00 : f32
    %805 = vector.broadcast %cst_200 : f32 to vector<2x32xf32>
    %806 = arith.addf %805, %804 : vector<2x32xf32>
    %807 = arith.divf %805, %806 : vector<2x32xf32>
    %808 = vector.extract_strided_slice %797 {offsets = [0, 32], sizes = [2, 32], strides = [1, 1]} : vector<2x96xf32> to vector<2x32xf32>
    %809 = vector.extract_strided_slice %799 {offsets = [0, 32], sizes = [2, 32], strides = [1, 1]} : vector<2x96xf32> to vector<2x32xf32>
    %810 = arith.addf %808, %809 : vector<2x32xf32>
    %811 = arith.negf %810 : vector<2x32xf32>
    %812 = math.exp %811 : vector<2x32xf32>
    %cst_201 = arith.constant 1.000000e+00 : f32
    %813 = vector.broadcast %cst_201 : f32 to vector<2x32xf32>
    %814 = arith.addf %813, %812 : vector<2x32xf32>
    %815 = arith.divf %813, %814 : vector<2x32xf32>
    %816 = vector.extract_strided_slice %797 {offsets = [0, 64], sizes = [2, 32], strides = [1, 1]} : vector<2x96xf32> to vector<2x32xf32>
    %817 = vector.extract_strided_slice %799 {offsets = [0, 64], sizes = [2, 32], strides = [1, 1]} : vector<2x96xf32> to vector<2x32xf32>
    %818 = arith.mulf %807, %817 : vector<2x32xf32>
    %819 = arith.addf %816, %818 : vector<2x32xf32>
    %820 = math.tanh %819 : vector<2x32xf32>
    %cst_202 = arith.constant 1.000000e+00 : f32
    %821 = vector.broadcast %cst_202 : f32 to vector<2x32xf32>
    %822 = arith.subf %821, %815 : vector<2x32xf32>
    %823 = arith.mulf %822, %820 : vector<2x32xf32>
    %824 = arith.mulf %815, %792 : vector<2x32xf32>
    %825 = arith.addf %823, %824 : vector<2x32xf32>
    %826 = vector.extract_strided_slice %825 {offsets = [0, 0], sizes = [1, 32], strides = [1, 1]} : vector<2x32xf32> to vector<1x32xf32>
    %c6 = arith.constant 6 : index
    %c0_203 = arith.constant 0 : index
    %827 = vector.load %arg41[%c6, %c0_203] : memref<14x32xf32, #tpu.memory_space<vmem>>, vector<1x32xf32>
    tpu.vector_store %arg41[%c6, %c0_203], %826 {strides = array<i32>} : memref<14x32xf32, #tpu.memory_space<vmem>>, vector<1x32xf32>,
    %828 = vector.extract_strided_slice %825 {offsets = [1, 0], sizes = [1, 32], strides = [1, 1]} : vector<2x32xf32> to vector<1x32xf32>
    %c13 = arith.constant 13 : index
    %c0_204 = arith.constant 0 : index
    %829 = vector.load %arg41[%c13, %c0_204] : memref<14x32xf32, #tpu.memory_space<vmem>>, vector<1x32xf32>
    tpu.vector_store %arg41[%c13, %c0_204], %828 {strides = array<i32>} : memref<14x32xf32, #tpu.memory_space<vmem>>, vector<1x32xf32>,
    %c0_205 = arith.constant 0 : index
    %c0_206 = arith.constant 0 : index
    %830 = vector.load %arg41[%c0_205, %c0_206] : memref<14x32xf32, #tpu.memory_space<vmem>>, vector<14x32xf32>
    %c0_207 = arith.constant 0 : index
    %c0_208 = arith.constant 0 : index
    %831 = vector.load %arg36[%c0_207, %c0_208] : memref<32x128xf32, #tpu.memory_space<vmem>>, vector<32x128xf32>
    %cst_209 = arith.constant dense<0.000000e+00> : vector<14x128xf32>
    %832 = tpu.matmul %830, %831, %cst_209 {dimension_numbers = #tpu.dot_dimension_numbers<[1], [0], [0], [1], [0, 0, 1, 1], [], []>} : vector<14x32xf32>, vector<32x128xf32>, vector<14x128xf32> -> vector<14x128xf32>
    %c0_210 = arith.constant 0 : index
    %c0_211 = arith.constant 0 : index
    %833 = vector.load %arg37[%c0_210, %c0_211] : memref<1x128xf32, #tpu.memory_space<vmem>>, vector<1x128xf32>
    %834 = vector.broadcast %833 : vector<1x128xf32> to vector<14x128xf32>
    %835 = arith.addf %832, %834 : vector<14x128xf32>
    %cst_212 = arith.constant dense<0xFF800000> : vector<14xf32>
    %836 = vector.multi_reduction <maximumf>, %835, %cst_212 [1] : vector<14x128xf32> to vector<14xf32>
    %837 = vector.shape_cast %836 : vector<14xf32> to vector<14x1xf32>
    %838 = vector.broadcast %837 : vector<14x1xf32> to vector<14x128xf32>
    %839 = arith.subf %835, %838 : vector<14x128xf32>
    %840 = math.exp %839 : vector<14x128xf32>
    %cst_213 = arith.constant dense<0.000000e+00> : vector<14xf32>
    %841 = vector.multi_reduction <add>, %840, %cst_213 [1] : vector<14x128xf32> to vector<14xf32>
    %842 = vector.shape_cast %841 : vector<14xf32> to vector<14x1xf32>
    %843 = math.log %842 : vector<14x1xf32>
    %844 = vector.broadcast %843 : vector<14x1xf32> to vector<14x128xf32>
    %845 = arith.subf %839, %844 : vector<14x128xf32>
    %c0_214 = arith.constant 0 : index
    %c0_215 = arith.constant 0 : index
    %846 = vector.load %arg38[%c0_214, %c0_215] : memref<14x128xf32, #tpu.memory_space<vmem>>, vector<14x128xf32>
    tpu.vector_store %arg38[%c0_214, %c0_215], %845 {strides = array<i32>} : memref<14x128xf32, #tpu.memory_space<vmem>>, vector<14x128xf32>,
    return
  }
}

</mosaic_0001>

<bundles_post_ra>
// kernel: _lambda_.1
= control target key start
LH: loop header
LB: loop body
LE: loop exit
PB: predicated region body
PF: predicated region fallthrough
CT: control target
= control target key end

     0   :  { %s5204_s6 = smov 1   ;;  %s5205_s10 = smov 2   ;;  %s6142_s0 = inlined_call_operand.smem [shape: u32[41], index: -1, kind: input, shape index: {}] }
   0x1   :  { %s5263_s5 = sld [smem:[%s6142_s0]]   ;;  %s5206_s14 = smov 3  }
   0x2   :  { %s5268_s9 = sld [smem:[%s6142_s0 + %s5204_s6]]   ;;  %s5207_s18 = smov 4  }
   0x3   :  { %s5273_s13 = sld [smem:[%s6142_s0 + %s5205_s10]]   ;;  %s5208_s22 = smov 5  }
   0x4   :  { %s5278_s17 = sld [smem:[%s6142_s0 + %s5206_s14]]   ;;  %s5209_s26 = smov 6  }
   0x5   :  { %s5283_s21 = sld [smem:[%s6142_s0 + %s5207_s18]]   ;;  %s5210_s30 = smov 7  }
   0x6   :  { %s5288_s25 = sld [smem:[%s6142_s0 + %s5208_s22]]   ;;  %s5211_s4 = smov 8  }
   0x7   :  { %s5293_s29 = sld [smem:[%s6142_s0 + %s5209_s26]]   ;;  %s5212_s10 = smov 9  }
   0x8   :  { %6153 = sst [smem:[#allocation11_spill]] %s5268_s9  ;;  %s5213_s15 = smov 10  }
   0x9   :  { %s5298_s3 = sld [smem:[%s6142_s0 + %s5210_s30]]   ;;  %s5214_s20 = smov 11  }
   0xa   :  { %6154 = sst [smem:[#allocation12_spill]] %s5278_s17  ;;  %s5215_s26 = smov 12  }
   0xb   :  { %6155 = sst [smem:[#allocation13_spill]] %s5283_s21  ;;  %s5216_s1 = smov 13  }
   0xc   :  { %6156 = sst [smem:[#allocation14_spill]] %s5288_s25  ;;  %s5217_s7 = smov 14  }
   0xd   :  { %6157 = sst [smem:[#allocation15_spill]] %s5293_s29  ;;  %s5219_s22 = smov 16  }
   0xe   :  { %s5303_s8 = sld [smem:[%s6142_s0 + %s5211_s4]]   ;;  %s5220_s28 = smov 17  }
   0xf   :  { %6158 = sst [smem:[#allocation16_spill]] %s5298_s3  ;;  %s5234_s16 = smov 31  }
  0x10   :  { %s5308_s14 = sld [smem:[%s6142_s0 + %s5212_s10]]   ;;  %s5235_s23 = smov 32  }
  0x11   :  { %s5313_s19 = sld [smem:[%s6142_s0 + %s5213_s15]]   ;;  %s5218_s15 = smov 15  }
  0x12   :  { %s5318_s24 = sld [smem:[%s6142_s0 + %s5214_s20]]   ;;  %s5237_s10 = smov 34  }
  0x13   :  { %s5323_s30 = sld [smem:[%s6142_s0 + %s5215_s26]]  }
  0x14   :  { %s5328_s6 = sld [smem:[%s6142_s0 + %s5216_s1]]   ;;  %s5236_s1 = smov 33  }
  0x15   :  { %s5333_s12 = sld [smem:[%s6142_s0 + %s5217_s7]]   ;;  %s5221_s7 = smov 18  }
  0x16   :  { %s5338_s20 = sld [smem:[%s6142_s0 + %s5218_s15]]   ;;  %s5222_s15 = smov 19  }
  0x17   :  { %s5343_s27 = sld [smem:[%s6142_s0 + %s5219_s22]]   ;;  %s5223_s22 = smov 20  }
  0x18   :  { %s5348_s4 = sld [smem:[%s6142_s0 + %s5220_s28]]   ;;  %s5224_s28 = smov 21  }
  0x19   :  { %s5353_s3 = sld [smem:[%s6142_s0 + %s5221_s7]]   ;;  %s5225_s7 = smov 22  }
  0x1a   :  { %s5358_s29 = sld [smem:[%s6142_s0 + %s5222_s15]]   ;;  %s5226_s15 = smov 23  }
  0x1b   :  { %s5363_s21 = sld [smem:[%s6142_s0 + %s5223_s22]]   ;;  %s5227_s22 = smov 24  }
  0x1c   :  { %s5368_s25 = sld [smem:[%s6142_s0 + %s5224_s28]]   ;;  %s5228_s28 = smov 25  }
  0x1d   :  { %6159 = sst [smem:[#allocation17_spill]] %s5343_s27 }
  0x1e   :  { %6160 = sst [smem:[#allocation18_spill]] %s5348_s4 }
  0x1f   :  { %6161 = sst [smem:[#allocation19_spill]] %s5353_s3 }
  0x20   :  { %6162 = sst [smem:[#allocation20_spill]] %s5358_s29 }
  0x21   :  { %s5373_s3 = sld [smem:[%s6142_s0 + %s5225_s7]]   ;;  %s5229_s7 = smov 26  }
  0x22   :  { %s5378_s29 = sld [smem:[%s6142_s0 + %s5226_s15]]   ;;  %s5230_s15 = smov 27  }
  0x23   :  { %s5383_s17 = sld [smem:[%s6142_s0 + %s5227_s22]]   ;;  %s5231_s22 = smov 28  }
  0x24   :  { %s5388_s9 = sld [smem:[%s6142_s0 + %s5228_s28]]   ;;  %s5232_s28 = smov 29  }
  0x25   :  { %s5421_s4 = sld [smem:[%s6142_s0 + %s5235_s23]]   ;;  %s5239_s23 = smov 36  }
  0x26   :  { %s5431_s27 = sld [smem:[%s6142_s0 + %s5237_s10]]   ;;  %s5241_s10 = smov 38  }
  0x27   :  { %6163 = sst [smem:[#allocation21_spill]] %s5373_s3 }
  0x28   :  { %6164 = sst [smem:[#allocation22_spill]] %s5378_s29 }
  0x29   :  { %6165 = sst [smem:[#allocation23_spill]] %s5383_s17 }
  0x2a   :  { %6166 = sst [smem:[#allocation24_spill]] %s5388_s9 }
  0x2b   :  { %s5393_s3 = sld [smem:[%s6142_s0 + %s5229_s7]]   ;;  %s5233_s7 = smov 30  }
  0x2c   :  { %s5398_s29 = sld [smem:[%s6142_s0 + %s5230_s15]]   ;;  %s5242_s15 = smov 39  }
  0x2d   :  { %s5403_s17 = sld [smem:[%s6142_s0 + %s5231_s22]]  }
  0x2e   :  { %s5408_s9 = sld [smem:[%s6142_s0 + %s5232_s28]]  }
  0x2f   :  { %6171 = sst [smem:[#allocation29_spill]] %s5421_s4 }
  0x30   :  { %6172 = sst [smem:[#allocation30_spill]] %s5431_s27 }
  0x31   :  { %6167 = sst [smem:[#allocation25_spill]] %s5393_s3 }
  0x32   :  { %6168 = sst [smem:[#allocation26_spill]] %s5398_s29 }
  0x33   :  { %s4016_s3 = sld [smem:[%s6142_s0 + %s5233_s7]]  }
  0x34   :  { %6169 = sst [smem:[#allocation27_spill]] %s5408_s9 }
  0x35   :  { %s5416_s29 = sld [smem:[%s6142_s0 + %s5234_s16]]   ;;  %s5238_s16 = smov 35  }
  0x36   :  { %s5426_s9 = sld [smem:[%s6142_s0 + %s5236_s1]]   ;;  %s5240_s1 = smov 37  }
  0x37   :  { %s5441_s4 = sld [smem:[%s6142_s0 + %s5239_s23]]  }
  0x38   :  { %s5446_s7 = sld [smem:[%s6142_s0 + %s5240_s1]]  }
  0x39   :  { %v87_v0 = vstv %s4016_s3  ;;  %s5456_s23 = sld [smem:[%s6142_s0 + %s5242_s15]]   ;;  %s5243_s3 = smov 40  }
  0x3a   :  { %88 = vst [vmem:[#allocation3] sm:$0x1] %v87_v0  ;;  %s5461_s28 = sld [smem:[%s6142_s0 + %s5243_s3]]  }
  0x3b   :  { %6170 = sst [smem:[#allocation28_spill]] %s5416_s29 }
  0x3c   :  { %s5436_s29 = sld [smem:[%s6142_s0 + %s5238_s16]]  }
  0x3d   :  { %s5451_s16 = sld [smem:[%s6142_s0 + %s5241_s10]]  }
  0x42   :  { %6173 = sst [smem:[#allocation31_spill]] %s5436_s29 }
  0x43   :  { %89 = vsyncpa [#allocation5], 0 }
  0x44   :  { %90 = vsyncpa [#allocation7], 0  ;;  %s5244_s27 = smov [#allocation6]   ;;  %s5245_s2 = smov [#allocation4]  }
  0x45   :  { %s147_s1 = sshll.u32 %s5244_s27, 4  ;;  %s137_s10 = sshll.u32 %s5245_s2, 4  ;;  %s148_s1 = int_to_ptr.vmem [resolvable:$true] %s147_s1  ;;  %s138_s10 = int_to_ptr.vmem [resolvable:$true] %s137_s10 }
  0x46   :  { %s5134_s29 = scalar_lea.hbm %s5368_s25, 16 }
  0x47   :  { %p5135_p0 = scmp.ne.s32.totalorder %s5368_s25, %s5134_s29  ;;  %p5138_p1 = scmp.lt.u32.totalorder %s5134_s29, %s5368_s25 }
  0x49   :  { %p5140_p2 = pnand %p5138_p1, %p5135_p0 }
  0x4b   :  { %5143 = shalt.err (!%p5140_p2)
}
  0x4c   :  { %s5144_s11 = scalar_lea.vmem %s148_s1, 16  ;;  %s5148_s0 = scalar_lea.vmem %s148_s1, 32 }
  0x4d   :  { %p5145_p3 = scmp.ne.s32.totalorder %s148_s1, %s5144_s11  ;;  %p5149_p4 = scmp.lt.s32.totalorder %s148_s1, %s148_s1 }
  0x4e   :  { %p5150_p5 = scmp.lt.s32.totalorder %s5148_s0, %s5144_s11 }
  0x50   :  { %p5151_p6 = por %p5150_p5, %p5149_p4 }
  0x52   :  { %p5152_p7 = pnand %p5151_p6, %p5145_p3 }
  0x54   :  { %5155 = shalt.err (!%p5152_p7)
}
  0x55   :  { %150 = dma.hbm_to_vmem [thread:$0]  %s5368_s25, 16, %s148_s1, [#allocation7]  }
  0x56   :  { %s5156_s15 = scalar_lea.hbm %s5363_s21, 16 }
  0x57   :  { %p5157_p8 = scmp.ne.s32.totalorder %s5363_s21, %s5156_s15  ;;  %p5160_p9 = scmp.lt.u32.totalorder %s5156_s15, %s5363_s21 }
  0x59   :  { %p5162_p10 = pnand %p5160_p9, %p5157_p8 }
  0x5b   :  { %5165 = shalt.err (!%p5162_p10)
}
  0x5c   :  { %s5166_s18 = scalar_lea.vmem %s138_s10, 16  ;;  %s5170_s3 = scalar_lea.vmem %s138_s10, 32 }
  0x5d   :  { %p5167_p11 = scmp.ne.s32.totalorder %s138_s10, %s5166_s18  ;;  %p5171_p12 = scmp.lt.s32.totalorder %s138_s10, %s138_s10 }
  0x5e   :  { %p5172_p13 = scmp.lt.s32.totalorder %s5170_s3, %s5166_s18 }
  0x60   :  { %p5173_p0 = por %p5172_p13, %p5171_p12 }
  0x62   :  { %p5174_p1 = pnand %p5173_p0, %p5167_p11 }
  0x64   :  { %5177 = shalt.err (!%p5174_p1)
}
  0x65   :  { %140 = dma.hbm_to_vmem [thread:$0]  %s5363_s21, 16, %s138_s10, [#allocation5]  }
  0x66   :  { %s5246_s22 = smov [#allocation8]   ;;  %s5178_s26 = scalar_lea.hbm %s5403_s17, 16 }
  0x67   :  { %s169_s25 = sshll.u32 %s5246_s22, 4  ;;  %p5179_p2 = scmp.ne.s32.totalorder %s5403_s17, %s5178_s26  ;;  %s170_s25 = int_to_ptr.vmem [resolvable:$true] %s169_s25 }
  0x68   :  { %p5182_p3 = scmp.lt.u32.totalorder %s5178_s26, %s5403_s17 }
  0x6a   :  { %p5184_p4 = pnand %p5182_p3, %p5179_p2 }
  0x6c   :  { %5187 = shalt.err (!%p5184_p4)
}
  0x6d   :  { %s5188_s27 = scalar_lea.vmem %s170_s25, 16  ;;  %s5192_s1 = scalar_lea.vmem %s170_s25, 32 }
  0x6e   :  { %p5189_p5 = scmp.ne.s32.totalorder %s170_s25, %s5188_s27  ;;  %p5193_p6 = scmp.lt.s32.totalorder %s170_s25, %s170_s25 }
  0x6f   :  { %p5194_p7 = scmp.lt.s32.totalorder %s5192_s1, %s5188_s27 }
  0x71   :  { %p5195_p8 = por %p5194_p7, %p5193_p6 }
  0x73   :  { %p5196_p9 = pnand %p5195_p8, %p5189_p5 }
  0x75   :  { %5199 = shalt.err (!%p5196_p9)
}
  0x76   :  { %172 = dma.hbm_to_vmem [thread:$0]  %s5403_s17, 16, %s170_s25, [#allocation7]  }
  0x77   :  { %5200 = dma.done.wait [#allocation5], 16  }
  0x78   :  { %5201 = vsyncadd [#allocation5], 4294967280 }
  0x79   :  { %5202 = dma.done.wait [#allocation7], 32  }
  0x7a   :  { %5203 = vsyncadd [#allocation7], 4294967264  ;;  %v5247_v1 = vmov 0   ;;  %v202_v2 = vld [vmem:[%s5263_s5] sm:$0xff]  ;;  %v217_v4 = vld [vmem:[%s5303_s8 + $0x8] sm:$0xff]  ;;  %vm230_vm0 = vcmask 1041408   ;;  %v200_v20 = vlaneseq }
  0x7b   :  { %4984 = vset.pattern.permute.xlu0 %v5247_v1  ;;  %4985 = vset.pattern.permute.xlu1 %v5247_v1  ;;  %v216_v3 = vld [vmem:[%s5303_s8] sm:$0xff]  ;;  %v218_v5 = vld [vmem:[%s5303_s8 + $0x10] sm:$0xff]  ;;  %v219_v6 = vld [vmem:[%s5303_s8 + $0x18] sm:$0xff]  ;;  %vm223_vm1 = vcmask 408576   ;;  %v5248_v23 = vmov 0.0   ;;  %v5249_v30 = vmov 0.0|0.0  }
  0x7c   :  { %205 = vperm.xlu0 %4984, %v202_v2   ;;  %v203_v7 = vld [vmem:[%s5263_s5 + $0x8] sm:$0xf]  ;;  %v4701_v8 = vpack.c.bf16 %v217_v4, %v216_v3  ;;  %v4705_v9 = vpack.c.bf16 %v219_v6, %v218_v5  ;;  %v220_v10 = vld [vmem:[%s5303_s8 + $0x20] sm:$0xff]  ;;  %v311_v15 = vld [vmem:[%s5308_s14 + $0x10] sm:$0xff]  ;;  %v5492_v21 = vand.u32 127, %v200_v20  ;;  %vm5250_vm4 = vmmov 0  }
  0x7d   :  { %v221_v11 = vld [vmem:[%s5303_s8 + $0x28] sm:$0xff]  ;;  %v309_v13 = vld [vmem:[%s5308_s14] sm:$0xff]  ;;  %v312_v17 = vld [vmem:[%s5308_s14 + $0x18] sm:$0xff]  ;;  %vm320_vm5 = vcmask 261120   ;;  %s5251_s5 = smov 64   ;;  %s5252_s17 = smov 96  }
  0x7e   :  { %4702 = vmatprep.subr.bf16.mxu0 %v4701_v8  ;;  %v4709_v12 = vpack.c.bf16 %v221_v11, %v220_v10  ;;  %v310_v14 = vld [vmem:[%s5308_s14 + $0x8] sm:$0xff]  ;;  %v4717_v18 = vpack.c.bf16 %v312_v17, %v311_v15  ;;  %v222_v19 = vld [vmem:[%s5303_s8 + $0x30] sm:$0x3]  ;;  %v403_v27 = vld [vmem:[%s5313_s19] sm:$0xff]  ;;  %vm1136_vm7 = vcmask 490496   ;;  %vm1149_vm8 = vcmask 1043456  }
  0x7f   :  { %4704 = vmatpush3.bf16.msra.mxu0 %v4701_v8  ;;  %v4713_v16 = vpack.c.bf16 %v310_v14, %v309_v13  ;;  %v404_v28 = vld [vmem:[%s5313_s19 + $0x8] sm:$0xff]  ;;  %v405_v31 = vld [vmem:[%s5313_s19 + $0x10] sm:$0xff]  ;;  %v406_v32 = vld [vmem:[%s5313_s19 + $0x18] sm:$0xff]  ;;  %vm5253_vm9 = vmmov 1   ;;  %s6175_s21 = sld [smem:[#allocation18_spill]]  ;;  %vm1725_vm14 = vcmask 1045504  }
  0x80   :  { %208 = vperm.xlu0 %4984, %v203_v7   ;;  %4706 = vmatprep.subr.bf16.mxu0 %v4705_v9  ;;  %v5500_v29 = vpack.c.bf16 %v404_v28, %v403_v27  ;;  %v5508_v33 = vpack.c.bf16 %v406_v32, %v405_v31  ;;  %v4032_v36 = vld [vmem:[%s5318_s24] ss:$0 sm:$0xff]  ;;  %vm4770_vm10 = vmpackc.low %vm1149_vm8, %vm5253_vm9  ;;  %s6176_s8 = sld [smem:[#allocation11_spill]]  ;;  %s6177_s14 = sld [smem:[#allocation12_spill]] }
  0x81   :  { %4714 = vmatprep.subr.bf16.mxu1 %v4713_v16  ;;  %v5533_v40 = vld [vmem:[%s5323_s30] ss:$0 sm:$0xff]  ;;  %s6178_s19 = sld [smem:[#allocation20_spill]]  ;;  %s5254_s24 = smov 32  }
  0x82   :  { %4716 = vmatpush3.bf16.msra.mxu1 %v4713_v16  ;;  %s6179_s30 = sld [smem:[#allocation19_spill]]  ;;  %s6183_s2 = sld [smem:[#allocation21_spill]] }
  0x83   :  { %4708 = vmatpush3.bf16.msra.mxu0 %v4705_v9  ;;  %4718 = vmatprep.subr.bf16.mxu1 %v4717_v18  ;;  %s6184_s10 = sld [smem:[#allocation15_spill]]  ;;  %s6185_s29 = sld [smem:[#allocation25_spill]] }
  0x84   :  { %4710 = vmatprep.subr.bf16.mxu0 %v4709_v12  ;;  %s6186_s11 = sld [smem:[#allocation26_spill]]  ;;  %s6187_s0 = sld [smem:[#allocation24_spill]] }
  0x85   :  { %s6188_s15 = sld [smem:[#allocation28_spill]]  ;;  %s6189_s18 = sld [smem:[#allocation22_spill]] }
  0x86   :  { %4720 = vmatpush3.bf16.msra.mxu1 %v4717_v18  ;;  %s6190_s3 = sld [smem:[#allocation16_spill]]  ;;  %s6191_s22 = sld [smem:[#allocation27_spill]] }
  0x87   :  { %4712 = vmatpush3.bf16.msra.mxu0 %v4709_v12  ;;  %4721 = vmatprep.subr.bf16.mxu1 %v5249_v30  ;;  %s6192_s25 = sld [smem:[#allocation29_spill]]  ;;  %s6194_s26 = sld [smem:[#allocation30_spill]] }
  0x88   :  { %4317 = vmatprep.subr.msk.mxu0 %vm230_vm0, %v222_v19 }
  0x8b   :  { %4318 = vmatpush3.msk.msra.mxu0 %vm230_vm0, %v222_v19 }
  0x8c   :  { %4727 = vmatprep.subr.bf16.mxu0 %v5249_v30 }
  0xfb   :  { %v206_v22 = vpop.permute.xlu0 %205 }
  0xfc   :  { %vm210_vm2 = vcmp.eq.s32.totalorder %v206_v22, %v5492_v21 }
  0xfd   :  { %v4027_v24 = vsel %vm210_vm2, 1.0, %v5248_v23 }
  0xfe   :  { %4319 = vmatprep.mubr.msk.f32.mxu0 %vm223_vm1, %v4027_v24 }
  0xff   :  { %v209_v25 = vpop.permute.xlu0 %208 }
 0x100   :  { %vm211_vm3 = vcmp.eq.s32.totalorder %v209_v25, %v5492_v21 }
 0x101   :  { %v4028_v26 = vsel %vm211_vm3, 1.0, %v5248_v23 }
 0x102   :  { %4320 = vmatmul.mubr.msk.f32.vlgmr.msra.gmra.mrb[0].mxu0 %vm223_vm1, %v4028_v26 }
 0x103   :  { %4729 = vmatpush3.bf16.msra.mxu0 %v5500_v29  ;;  %4352 = vmatprep.mubr.msk.f32.mxu0 %vm5250_vm4, %v5248_v23 }
 0x104   :  { %4730 = vmatprep.subr.bf16.mxu0 %v5249_v30 }
 0x107   :  { %4732 = vmatpush3.bf16.msra.mxu0 %v5508_v33 }
 0x108   :  { %4739 = vmatprep.subr.bf16.mxu0 %v5249_v30 }
 0x1d5   :  { %v4321_v34 = vpop.f32.mrb[0].mxu0 }
 0x1d6   :  { %v300_v35 = vpop.f32.mrb[1].mxu0 }
 0x1d7   :  { %4330 = vmatprep.mubr.msk.f32.mxu1 %vm320_vm5, %v300_v35 }
 0x1d8   :  { %4331 = vmatmul.mubr.msk.f32.vlgmr.msra.gmra.mrb[0].mxu1 %vm320_vm5, %v4321_v34 }
 0x1d9   :  { %4723 = vmatpush3.bf16.msra.mxu1 %v5500_v29  ;;  %4341 = vmatprep.mubr.msk.f32.mxu1 %vm5250_vm4, %v5248_v23 }
 0x1da   :  { %4724 = vmatprep.subr.bf16.mxu1 %v5249_v30 }
 0x1dd   :  { %4726 = vmatpush3.bf16.msra.mxu1 %v5508_v33 }
 0x1de   :  { %4733 = vmatprep.subr.bf16.mxu1 %v5249_v30 }
 0x1e0   :  { %4342 = vmatmul.mubr.f32.vlgmr.msra.gmra.mrb[2].mxu1 %v5248_v23 }
 0x1e1   :  { %4735 = vmatpush3.bf16.msra.mxu1 %v5500_v29  ;;  %4363 = vmatprep.mubr.msk.f32.mxu1 %vm5250_vm4, %v5248_v23 }
 0x1e2   :  { %4736 = vmatprep.subr.bf16.mxu1 %v5249_v30 }
 0x1e5   :  { %4738 = vmatpush3.bf16.msra.mxu1 %v5508_v33 }
 0x1e6   :  { %4745 = vmatprep.subr.bf16.mxu1 %v5249_v30 }
 0x2ab   :  { %v4332_v37 = vpop.f32.mrb[0].mxu1 }
 0x2ac   :  { %v5530_v38 = vadd.f32 %v4332_v37, %v4032_v36  ;;  %v393_v39 = vpop.f32.mrb[1].mxu1 }
 0x2ad   :  { %v5537_v44 = vadd.f32 %v4032_v36, %v393_v39 }
 0x2b3   :  { %v483_v41 = vpop.f32.mrb[2].mxu1 }
 0x2b4   :  { %v484_v42 = vadd.f32 %v5533_v40, %v483_v41  ;;  %v4343_v43 = vpop.f32.mrb[3].mxu1 }
 0x2b6   :  { %495 = vrot.lane.b32.xlu1 %v484_v42, %s5251_s5  ;;  %v487_v45 = vadd.f32 %v484_v42, %v5537_v44 }
 0x2b8   :  { %v4036_v46 = vmul.f32 -1.442695, %v487_v45 }
 0x2ba   :  { %4986 = vpow2.f32 %v4036_v46 }
 0x2c4   :  { %v4987_v47 = vpop.eup %4986 }
 0x2c5   :  { %v491_v48 = vadd.f32 1.0, %v4987_v47 }
 0x2c7   :  { %4988 = vrcp.f32 %v491_v48 }
 0x2d1   :  { %v4989_v49 = vpop.eup %4988 }
 0x2d2   :  { %v505_v55 = vsub.f32 1.0, %v4989_v49  ;;  %v511_v57 = vmul.f32 0.0, %v4989_v49 }
 0x328   :  { %v496_v50 = vpop.permute.xlu1 %495 }
 0x329   :  { %v498_v51 = vmul.f32 %v4989_v49, %v496_v50 }
 0x32b   :  { %500 = vrot.lane.b32.xlu1 %v498_v51, %s5251_s5 }
 0x39d   :  { %v501_v52 = vpop.permute.xlu1 %500 }
 0x39e   :  { %v503_v53 = vadd.f32 %v501_v52, %v5537_v44 }
 0x3a0   :  { %4990 = vtanh.f32 %v503_v53 }
 0x3aa   :  { %v4991_v54 = vpop.eup %4990 }
 0x3ab   :  { %507 = vrot.lane.b32.xlu0 %v4991_v54, %s5252_s17 }
 0x41d   :  { %v508_v56 = vpop.permute.xlu0 %507 }
 0x41e   :  { %v510_v58 = vmul.f32 %v508_v56, %v505_v55 }
 0x420   :  { %v5543_v59 = vadd.f32 %v511_v57, %v510_v58 }
 0x422   :  { %521 = vrot.lane.b32.xlu1 %v5543_v59, %s5252_s17  ;;  %v621_v13 = vrot.slane %v5543_v59, 6 }
 0x494   :  { %v522_v60 = vpop.permute.xlu1 %521 }
 0x495   :  { %4353 = vmatmul.mubr.msk.f32.vlgmr.msra.gmra.mrb[2].mxu0 %vm320_vm5, %v522_v60 }
 0x496   :  { %4741 = vmatpush3.bf16.msra.mxu0 %v5500_v29  ;;  %4374 = vmatprep.mubr.msk.f32.mxu0 %vm5250_vm4, %v5248_v23 }
 0x497   :  { %4742 = vmatprep.subr.bf16.mxu0 %v5249_v30 }
 0x49a   :  { %4744 = vmatpush3.bf16.msra.mxu0 %v5508_v33 }
 0x49b   :  { %4751 = vmatprep.subr.bf16.mxu0 %v5249_v30 }
 0x568   :  { %v591_v61 = vpop.f32.mrb[2].mxu0 }
 0x569   :  { %v592_v62 = vadd.f32 %v5533_v40, %v591_v61  ;;  %v4354_v63 = vpop.f32.mrb[3].mxu0 }
 0x56a   :  { %v1100_v63 = vld [vmem:[%s5273_s13] sm:$0xff] }
 0x56b   :  { %v596_v0 = vrot.slane %v592_v62, 6 }
 0x56d   :  { %605 = vrot.lane.b32.xlu0 %v596_v0, %s5251_s5  ;;  %v598_v2 = vadd.f32 %v596_v0, %v5537_v44  ;;  %v1102_v0 = vld [vmem:[%s5273_s13 + $0x10] sm:$0xff] }
 0x56f   :  { %v4038_v3 = vmul.f32 -1.442695, %v598_v2  ;;  %v1128_v2 = vld [vmem:[%s5328_s6] sm:$0xff] }
 0x571   :  { %4992 = vpow2.f32 %v4038_v3  ;;  %v1129_v3 = vld [vmem:[%s5328_s6 + $0x8] sm:$0xff] }
 0x57b   :  { %v4993_v4 = vpop.eup %4992 }
 0x57c   :  { %v602_v5 = vadd.f32 1.0, %v4993_v4  ;;  %v4757_v4 = vpack.c.bf16 %v1129_v3, %v1128_v2 }
 0x57e   :  { %4994 = vrcp.f32 %v602_v5 }
 0x588   :  { %v4995_v6 = vpop.eup %4994 }
 0x589   :  { %v615_v12 = vsub.f32 1.0, %v4995_v6  ;;  %v623_v16 = vmul.f32 %v4995_v6, %v621_v13  ;;  %v1130_v13 = vld [vmem:[%s5328_s6 + $0x10] sm:$0xff] }
 0x5df   :  { %v606_v7 = vpop.permute.xlu0 %605 }
 0x5e0   :  { %v608_v8 = vmul.f32 %v4995_v6, %v606_v7 }
 0x5e2   :  { %610 = vrot.lane.b32.xlu1 %v608_v8, %s5251_s5 }
 0x654   :  { %v611_v9 = vpop.permute.xlu1 %610 }
 0x655   :  { %v613_v10 = vadd.f32 %v611_v9, %v5537_v44 }
 0x657   :  { %4996 = vtanh.f32 %v613_v10 }
 0x661   :  { %v4997_v11 = vpop.eup %4996 }
 0x662   :  { %617 = vrot.lane.b32.xlu0 %v4997_v11, %s5252_s17  ;;  %v1101_v11 = vld [vmem:[%s5273_s13 + $0x8] sm:$0xff] }
 0x6d4   :  { %v618_v14 = vpop.permute.xlu0 %617 }
 0x6d5   :  { %v620_v15 = vmul.f32 %v618_v14, %v615_v12  ;;  %v1131_v14 = vld [vmem:[%s5328_s6 + $0x18] sm:$0xff] }
 0x6d7   :  { %v624_v17 = vadd.f32 %v623_v16, %v620_v15  ;;  %v4761_v15 = vpack.c.bf16 %v1131_v14, %v1130_v13 }
 0x6d9   :  { %v632_v18 = vrot.slane %v624_v17, 2  ;;  %v739_v41 = vrot.slane %v624_v17, 6  ;;  %v1132_v17 = vld [vmem:[%s5328_s6 + $0x20] sm:$0xff] }
 0x6db   :  { %633 = vrot.lane.b32.xlu1 %v632_v18, %s5252_s17  ;;  %v1133_v18 = vld [vmem:[%s5328_s6 + $0x28] sm:$0xff] }
 0x74d   :  { %v5562_v19 = vpop.permute.xlu1 %633 }
 0x74e   :  { %4364 = vmatmul.mubr.msk.f32.vlgmr.msra.gmra.mrb[4].mxu1 %vm320_vm5, %v5562_v19 }
 0x74f   :  { %4747 = vmatpush3.bf16.msra.mxu1 %v5500_v29  ;;  %4385 = vmatprep.mubr.msk.f32.mxu1 %vm5250_vm4, %v5248_v23 }
 0x750   :  { %4748 = vmatprep.subr.bf16.mxu1 %v5249_v30 }
 0x753   :  { %4750 = vmatpush3.bf16.msra.mxu1 %v5508_v33 }
 0x754   :  { %4758 = vmatprep.subr.bf16.mxu1 %v4757_v4 }
 0x821   :  { %v709_v20 = vpop.f32.mrb[4].mxu1 }
 0x822   :  { %v710_v22 = vadd.f32 %v5533_v40, %v709_v20  ;;  %v4365_v24 = vpop.f32.mrb[5].mxu1 }
 0x823   :  { %v1134_v24 = vld [vmem:[%s5328_s6 + $0x30] sm:$0xff] }
 0x824   :  { %v714_v25 = vrot.slane %v710_v22, 4  ;;  %v4765_v22 = vpack.c.bf16 %v1133_v18, %v1132_v17 }
 0x826   :  { %723 = vrot.lane.b32.xlu0 %v714_v25, %s5251_s5  ;;  %v716_v26 = vadd.f32 %v714_v25, %v5537_v44  ;;  %v1135_v25 = vld [vmem:[%s5328_s6 + $0x38] sm:$0xf]  ;;  %s6180_s6 = sld [smem:[#allocation14_spill]] }
 0x828   :  { %v4040_v27 = vmul.f32 -1.442695, %v716_v26  ;;  %v4769_v26 = vpack.c.bf16 %v1135_v25, %v1134_v24  ;;  %v5688_v25 = vld [vmem:[%s6175_s21] ss:$0 sm:$0xff] }
 0x82a   :  { %4998 = vpow2.f32 %v4040_v27 }
 0x834   :  { %v4999_v28 = vpop.eup %4998 }
 0x835   :  { %v720_v31 = vadd.f32 1.0, %v4999_v28 }
 0x837   :  { %5000 = vrcp.f32 %v720_v31 }
 0x841   :  { %v5001_v32 = vpop.eup %5000 }
 0x842   :  { %v733_v42 = vsub.f32 1.0, %v5001_v32  ;;  %v741_v45 = vmul.f32 %v5001_v32, %v739_v41 }
 0x898   :  { %v724_v34 = vpop.permute.xlu0 %723 }
 0x899   :  { %v726_v35 = vmul.f32 %v5001_v32, %v724_v34  ;;  %v1103_v34 = vld [vmem:[%s5273_s13 + $0x18] sm:$0x3f]  ;;  %s6174_s13 = sld [smem:[#allocation17_spill]] }
 0x89b   :  { %728 = vrot.lane.b32.xlu1 %v726_v35, %s5251_s5 }
 0x89f   :  { %v4056_v13 = vld [vmem:[%s6174_s13] ss:$0 sm:$0xff] }
 0x90d   :  { %v729_v36 = vpop.permute.xlu1 %728 }
 0x90e   :  { %v731_v37 = vadd.f32 %v729_v36, %v5537_v44 }
 0x910   :  { %5002 = vtanh.f32 %v731_v37 }
 0x91a   :  { %v5003_v39 = vpop.eup %5002 }
 0x91b   :  { %735 = vrot.lane.b32.xlu0 %v5003_v39, %s5252_s17 }
 0x98d   :  { %v736_v43 = vpop.permute.xlu0 %735 }
 0x98e   :  { %v738_v46 = vmul.f32 %v736_v43, %v733_v42 }
 0x990   :  { %v742_v47 = vadd.f32 %v741_v45, %v738_v46 }
 0x992   :  { %v750_v48 = vrot.slane %v742_v47, 4  ;;  %v853_v5 = vrot.slane %v742_v47, 6 }
 0x994   :  { %751 = vrot.lane.b32.xlu1 %v750_v48, %s5252_s17 }
 0xa06   :  { %v5578_v49 = vpop.permute.xlu1 %751 }
 0xa07   :  { %4375 = vmatmul.mubr.msk.f32.vlgmr.msra.gmra.mrb[4].mxu0 %vm320_vm5, %v5578_v49 }
 0xa08   :  { %4753 = vmatpush3.bf16.msra.mxu0 %v5500_v29  ;;  %4396 = vmatprep.mubr.msk.f32.mxu0 %vm5250_vm4, %v5248_v23 }
 0xa09   :  { %4754 = vmatprep.subr.bf16.mxu0 %v5249_v30 }
 0xa0c   :  { %4756 = vmatpush3.bf16.msra.mxu0 %v5508_v33 }
 0xada   :  { %v823_v50 = vpop.f32.mrb[4].mxu0 }
 0xadb   :  { %v824_v51 = vadd.f32 %v5533_v40, %v823_v50  ;;  %v4376_v52 = vpop.f32.mrb[5].mxu0 }
 0xadd   :  { %v828_v53 = vrot.slane %v824_v51, 2 }
 0xadf   :  { %837 = vrot.lane.b32.xlu0 %v828_v53, %s5251_s5  ;;  %v830_v54 = vadd.f32 %v828_v53, %v5537_v44 }
 0xae1   :  { %v4042_v55 = vmul.f32 -1.442695, %v830_v54  ;;  %v1238_v54 = vld [vmem:[%s5333_s12] sm:$0xff] }
 0xae3   :  { %5004 = vpow2.f32 %v4042_v55  ;;  %v1239_v55 = vld [vmem:[%s5333_s12 + $0x8] sm:$0xff] }
 0xaed   :  { %v5005_v29 = vpop.eup %5004 }
 0xaee   :  { %v834_v56 = vadd.f32 1.0, %v5005_v29 }
 0xaf0   :  { %5006 = vrcp.f32 %v834_v56  ;;  %v4775_v56 = vpack.c.bf16 %v1239_v55, %v1238_v54 }
 0xaf2   :  { %4776 = vmatprep.subr.bf16.mxu0 %v4775_v56 }
 0xafa   :  { %v5007_v57 = vpop.eup %5006 }
 0xafb   :  { %v847_v6 = vsub.f32 1.0, %v5007_v57 }
 0xb51   :  { %v838_v33 = vpop.permute.xlu0 %837 }
 0xb52   :  { %v840_v58 = vmul.f32 %v5007_v57, %v838_v33 }
 0xb54   :  { %842 = vrot.lane.b32.xlu1 %v840_v58, %s5251_s5 }
 0xbc6   :  { %v843_v60 = vpop.permute.xlu1 %842 }
 0xbc7   :  { %v845_v61 = vadd.f32 %v843_v60, %v5537_v44  ;;  %v855_v44 = vmul.f32 %v5007_v57, %v853_v5  ;;  %v1347_v60 = vld [vmem:[%s5338_s20] sm:$0xff]  ;;  %v1350_v5 = vld [vmem:[%s5338_s20 + $0x18] sm:$0xff] }
 0xbc9   :  { %5008 = vtanh.f32 %v845_v61  ;;  %v1348_v61 = vld [vmem:[%s5338_s20 + $0x8] sm:$0xff] }
 0xbd3   :  { %v5009_v62 = vpop.eup %5008 }
 0xbd4   :  { %849 = vrot.lane.b32.xlu0 %v5009_v62, %s5252_s17 }
 0xbd8   :  { %1105 = vperm.xlu0 %4984, %v1100_v63   ;;  %v5641_v63 = vpack.c.bf16 %v1348_v61, %v1347_v60 }
 0xbdc   :  { %1111 = vperm.xlu0 %4984, %v1102_v0  }
 0xc46   :  { %v850_v7 = vpop.permute.xlu0 %849 }
 0xc47   :  { %v852_v8 = vmul.f32 %v850_v7, %v847_v6 }
 0xc49   :  { %v5597_v9 = vadd.f32 %v855_v44, %v852_v8  ;;  %v1240_v44 = vld [vmem:[%s5333_s12 + $0x10] sm:$0xff]  ;;  %v1241_v8 = vld [vmem:[%s5333_s12 + $0x18] sm:$0xff]  ;;  %s6181_s12 = sld [smem:[#allocation13_spill]] }
 0xc4b   :  { %v864_v10 = vrot.slane %v5597_v9, 6  ;;  %v4779_v9 = vpack.c.bf16 %v1241_v8, %v1240_v44 }
 0xc4d   :  { %865 = vrot.lane.b32.xlu1 %v864_v10, %s5252_s17 }
 0xc51   :  { %1108 = vperm.xlu1 %4985, %v1101_v11  }
 0xc55   :  { %1114 = vperm.xlu1 %4985, %v1103_v34  }
 0xc57   :  { %v1106_v12 = vpop.permute.xlu0 %1105 }
 0xc58   :  { %vm1116_vm6 = vcmp.eq.s32.totalorder %v1106_v12, %v5492_v21 }
 0xc59   :  { %v4047_v20 = vsel %vm1116_vm6, 1.0, %v5248_v23 }
 0xc5b   :  { %v1112_v27 = vpop.permute.xlu0 %1111 }
 0xc5c   :  { %vm1118_vm11 = vcmp.eq.s32.totalorder %v1112_v27, %v5492_v21 }
 0xc5d   :  { %v4049_v32 = vsel %vm1118_vm11, 1.0, %v5248_v23 }
 0xcbf   :  { %v5607_v16 = vpop.permute.xlu1 %865 }
 0xcc0   :  { %4386 = vmatmul.mubr.msk.f32.vlgmr.msra.gmra.mrb[6].mxu1 %vm320_vm5, %v5607_v16 }
 0xcc1   :  { %4415 = vmatprep.mubr.msk.f32.mxu1 %vm1136_vm7, %v4047_v20  ;;  %4760 = vmatpush3.bf16.msra.mxu1 %v4757_v4  ;;  %v1349_v4 = vld [vmem:[%s5338_s20 + $0x10] sm:$0xff]  ;;  %s6182_s20 = sld [smem:[#allocation23_spill]] }
 0xcc2   :  { %4762 = vmatprep.subr.bf16.mxu1 %v4761_v15  ;;  %v5651_v7 = vpack.c.bf16 %v1350_v5, %v1349_v4 }
 0xcc5   :  { %4764 = vmatpush3.bf16.msra.mxu1 %v4761_v15 }
 0xcc6   :  { %4766 = vmatprep.subr.bf16.mxu1 %v4765_v22 }
 0xcc9   :  { %4768 = vmatpush3.bf16.msra.mxu1 %v4765_v22 }
 0xcca   :  { %4771 = vmatprep.subr.msk.bf16.mxu1 %vm4770_vm10, %v4769_v26 }
 0xccd   :  { %4774 = vmatpush3.bf16.msk.msra.mxu1 %vm4770_vm10, %v4769_v26 }
 0xcce   :  { %4789 = vmatprep.subr.bf16.mxu1 %v5249_v30 }
 0xcd0   :  { %v1109_v28 = vpop.permute.xlu1 %1108 }
 0xcd1   :  { %vm1117_vm12 = vcmp.eq.s32.totalorder %v1109_v28, %v5492_v21 }
 0xcd2   :  { %v4048_v31 = vsel %vm1117_vm12, 1.0, %v5248_v23 }
 0xcd3   :  { %4416 = vmatmul.mubr.msk.f32.vlgmr.msra.gmra.mrb[8].mxu1 %vm1136_vm7, %v4048_v31 }
 0xcd4   :  { %4418 = vmatprep.mubr.msk.f32.mxu1 %vm1136_vm7, %v4049_v32  ;;  %v1115_v39 = vpop.permute.xlu1 %1114  ;;  %4791 = vmatpush3.bf16.msra.mxu1 %v5641_v63 }
 0xcd5   :  { %vm1119_vm13 = vcmp.eq.s32.totalorder %v1115_v39, %v5492_v21  ;;  %4792 = vmatprep.subr.bf16.mxu1 %v5249_v30 }
 0xcd6   :  { %v4050_v41 = vsel %vm1119_vm13, 1.0, %v5248_v23 }
 0xcd7   :  { %4419 = vmatmul.mubr.msk.f32.gmra.mrb[10].mxu1 %vm1136_vm7, %v4050_v41 }
 0xcd8   :  { %4454 = vmatprep.mubr.msk.f32.mxu1 %vm5250_vm4, %v5248_v23  ;;  %4794 = vmatpush3.bf16.msra.mxu1 %v5651_v7 }
 0xcd9   :  { %4801 = vmatprep.subr.bf16.mxu1 %v5249_v30 }
 0xd93   :  { %v937_v35 = vpop.f32.mrb[6].mxu1 }
 0xd94   :  { %v938_v36 = vadd.f32 %v5533_v40, %v937_v35  ;;  %v4387_v37 = vpop.f32.mrb[7].mxu1 }
 0xd96   :  { %949 = vrot.lane.b32.xlu0 %v938_v36, %s5251_s5  ;;  %v941_v42 = vadd.f32 %v938_v36, %v5530_v38 }
 0xd98   :  { %v4044_v43 = vmul.f32 -1.442695, %v941_v42 }
 0xd9a   :  { %5010 = vpow2.f32 %v4044_v43 }
 0xda4   :  { %v5011_v45 = vpop.eup %5010 }
 0xda5   :  { %v945_v46 = vadd.f32 1.0, %v5011_v45 }
 0xda6   :  { %v4417_v53 = vpop.f32.mrb[8].mxu1 }
 0xda7   :  { %5012 = vrcp.f32 %v945_v46  ;;  %v1219_v29 = vpop.f32.mrb[9].mxu1 }
 0xdaa   :  { %v4420_v57 = vpop.f32.mrb[10].mxu1 }
 0xdab   :  { %v1229_v33 = vpop.f32.mrb[11].mxu1 }
 0xdb1   :  { %v5013_v47 = vpop.eup %5012 }
 0xdb2   :  { %v959_v62 = vsub.f32 1.0, %v5013_v47  ;;  %v966_v2 = vmul.f32 %v5013_v47, %v864_v10 }
 0xe08   :  { %v950_v48 = vpop.permute.xlu0 %949 }
 0xe09   :  { %v952_v50 = vmul.f32 %v5013_v47, %v950_v48 }
 0xe0b   :  { %954 = vrot.lane.b32.xlu1 %v952_v50, %s5251_s5 }
 0xe7d   :  { %v955_v51 = vpop.permute.xlu1 %954 }
 0xe7e   :  { %v957_v52 = vadd.f32 %v955_v51, %v5530_v38 }
 0xe80   :  { %5014 = vtanh.f32 %v957_v52 }
 0xe8a   :  { %v5015_v58 = vpop.eup %5014 }
 0xe8b   :  { %961 = vrot.lane.b32.xlu0 %v5015_v58, %s5252_s17 }
 0xefd   :  { %v962_v0 = vpop.permute.xlu0 %961 }
 0xefe   :  { %v964_v3 = vmul.f32 %v962_v0, %v959_v62 }
 0xf00   :  { %v5649_v6 = vadd.f32 %v966_v2, %v964_v3 }
 0xf02   :  { %980 = vrot.lane.b32.xlu1 %v5649_v6, %s5252_s17 }
 0xf74   :  { %v981_v10 = vpop.permute.xlu1 %980 }
 0xf75   :  { %4397 = vmatmul.mubr.msk.f32.vlgmr.msra.gmra.mrb[6].mxu0 %vm320_vm5, %v981_v10 }
 0xf76   :  { %4778 = vmatpush3.bf16.msra.mxu0 %v4775_v56  ;;  %4429 = vmatprep.mubr.msk.f32.mxu0 %vm320_vm5, %v1219_v29 }
 0xf77   :  { %4780 = vmatprep.subr.bf16.mxu0 %v4779_v9 }
 0xf7a   :  { %4782 = vmatpush3.bf16.msra.mxu0 %v4779_v9 }
 0xf7b   :  { %4783 = vmatprep.subr.bf16.mxu0 %v5249_v30 }
 0xf7d   :  { %4430 = vmatmul.mubr.msk.f32.vlgmr.msra.gmra.mrb[8].mxu0 %vm320_vm5, %v4417_v53 }
 0xf7e   :  { %4432 = vmatprep.mubr.msk.f32.mxu0 %vm320_vm5, %v1229_v33  ;;  %4785 = vmatpush3.bf16.msra.mxu0 %v5641_v63 }
 0xf7f   :  { %4786 = vmatprep.subr.bf16.mxu0 %v5249_v30 }
 0xf81   :  { %4433 = vmatmul.mubr.msk.f32.gmra.mrb[10].mxu0 %vm320_vm5, %v4420_v57 }
 0xf82   :  { %4788 = vmatpush3.bf16.msra.mxu0 %v5651_v7  ;;  %4443 = vmatprep.mubr.msk.f32.mxu0 %vm5250_vm4, %v5248_v23 }
 0xf83   :  { %4795 = vmatprep.subr.bf16.mxu0 %v5249_v30 }
 0xf85   :  { %4444 = vmatmul.mubr.f32.vlgmr.msra.gmra.mrb[12].mxu0 %v5248_v23 }
 0xf86   :  { %4797 = vmatpush3.bf16.msra.mxu0 %v5641_v63  ;;  %4465 = vmatprep.mubr.msk.f32.mxu0 %vm5250_vm4, %v5248_v23 }
 0xf87   :  { %4798 = vmatprep.subr.bf16.mxu0 %v5249_v30 }
 0xf8a   :  { %4800 = vmatpush3.bf16.msra.mxu0 %v5651_v7 }
 0xf8b   :  { %4807 = vmatprep.subr.bf16.mxu0 %v5249_v30 }
0x1048   :  { %v5678_v11 = vpop.f32.mrb[6].mxu0 }
0x1049   :  { %v4398_v12 = vpop.f32.mrb[7].mxu0 }
0x1050   :  { %v4431_v14 = vpop.f32.mrb[8].mxu0 }
0x1051   :  { %v5681_v15 = vadd.f32 %v4431_v14, %v4056_v13  ;;  %v1327_v17 = vpop.f32.mrb[9].mxu0 }
0x1052   :  { %v1328_v31 = vadd.f32 %v4056_v13, %v1327_v17 }
0x1054   :  { %v4434_v18 = vpop.f32.mrb[10].mxu0 }
0x1055   :  { %v5683_v20 = vadd.f32 %v4434_v18, %v4056_v13  ;;  %v1337_v22 = vpop.f32.mrb[11].mxu0 }
0x1056   :  { %v5685_v24 = vadd.f32 %v4056_v13, %v1337_v22 }
0x1058   :  { %v1424_v26 = vpop.f32.mrb[12].mxu0 }
0x1059   :  { %v1425_v27 = vadd.f32 %v5688_v25, %v1424_v26  ;;  %v4445_v28 = vpop.f32.mrb[13].mxu0 }
0x105b   :  { %1436 = vrot.lane.b32.xlu0 %v1425_v27, %s5251_s5  ;;  %v1428_v32 = vadd.f32 %v1425_v27, %v1328_v31 }
0x105d   :  { %v4062_v34 = vmul.f32 -1.442695, %v1428_v32 }
0x105f   :  { %5016 = vpow2.f32 %v4062_v34 }
0x1069   :  { %v5017_v35 = vpop.eup %5016 }
0x106a   :  { %v1432_v36 = vadd.f32 1.0, %v5017_v35 }
0x106c   :  { %5018 = vrcp.f32 %v1432_v36 }
0x1076   :  { %v5019_v37 = vpop.eup %5018 }
0x1077   :  { %v1446_v46 = vsub.f32 1.0, %v5019_v37  ;;  %v1452_v48 = vmul.f32 0.0, %v5019_v37 }
0x10cd   :  { %v1437_v39 = vpop.permute.xlu0 %1436 }
0x10ce   :  { %v1439_v41 = vmul.f32 %v5019_v37, %v1437_v39 }
0x10d0   :  { %1441 = vrot.lane.b32.xlu1 %v1439_v41, %s5251_s5 }
0x1142   :  { %v1442_v42 = vpop.permute.xlu1 %1441 }
0x1143   :  { %v1444_v43 = vadd.f32 %v1442_v42, %v1328_v31 }
0x1145   :  { %5020 = vtanh.f32 %v1444_v43 }
0x114f   :  { %v5021_v45 = vpop.eup %5020 }
0x1150   :  { %1448 = vrot.lane.b32.xlu0 %v5021_v45, %s5252_s17 }
0x11c2   :  { %v1449_v47 = vpop.permute.xlu0 %1448 }
0x11c3   :  { %v1451_v50 = vmul.f32 %v1449_v47, %v1446_v46 }
0x11c5   :  { %v5694_v51 = vadd.f32 %v1452_v48, %v1451_v50 }
0x11c7   :  { %1462 = vrot.lane.b32.xlu1 %v5694_v51, %s5252_s17  ;;  %v1582_v18 = vrot.slane %v5694_v51, 2 }
0x1239   :  { %v1463_v52 = vpop.permute.xlu1 %1462 }
0x123a   :  { %4455 = vmatmul.mubr.msk.f32.vlgmr.msra.gmra.mrb[12].mxu1 %vm320_vm5, %v1463_v52 }
0x123b   :  { %4803 = vmatpush3.bf16.msra.mxu1 %v5641_v63  ;;  %4476 = vmatprep.mubr.msk.f32.mxu1 %vm5250_vm4, %v5248_v23 }
0x123c   :  { %4804 = vmatprep.subr.bf16.mxu1 %v5249_v30 }
0x123f   :  { %4806 = vmatpush3.bf16.msra.mxu1 %v5651_v7 }
0x1240   :  { %4813 = vmatprep.subr.bf16.mxu1 %v5249_v30 }
0x130d   :  { %v1532_v53 = vpop.f32.mrb[12].mxu1 }
0x130e   :  { %v1533_v54 = vadd.f32 %v5688_v25, %v1532_v53  ;;  %v4456_v55 = vpop.f32.mrb[13].mxu1 }
0x1310   :  { %v1537_v29 = vrot.slane %v1533_v54, 2 }
0x1312   :  { %1553 = vrot.lane.b32.xlu0 %v1537_v29, %s5251_s5  ;;  %v1539_v56 = vadd.f32 %v1537_v29, %v1328_v31  ;;  %v1540_v57 = vadd.f32 %v1537_v29, %v5681_v15 }
0x1314   :  { %v4064_v33 = vmul.f32 -1.442695, %v1539_v56  ;;  %v4065_v58 = vmul.f32 -1.442695, %v1540_v57 }
0x1316   :  { %5022 = vpow2.f32 %v4064_v33 }
0x1317   :  { %5024 = vpow2.f32 %v4065_v58 }
0x1320   :  { %v5023_v60 = vpop.eup %5022 }
0x1321   :  { %v5025_v61 = vpop.eup %5024  ;;  %v1547_v62 = vadd.f32 1.0, %v5023_v60 }
0x1322   :  { %v1548_v0 = vadd.f32 1.0, %v5025_v61 }
0x1323   :  { %5026 = vrcp.f32 %v1547_v62 }
0x1324   :  { %5028 = vrcp.f32 %v1548_v0 }
0x132d   :  { %v5027_v2 = vpop.eup %5026 }
0x132e   :  { %v5029_v3 = vpop.eup %5028  ;;  %v1570_v26 = vsub.f32 1.0, %v5027_v2  ;;  %v1584_v35 = vmul.f32 %v5027_v2, %v1582_v18 }
0x132f   :  { %v1571_v17 = vsub.f32 1.0, %v5029_v3  ;;  %v1585_v28 = vmul.f32 %v5029_v3, %v1582_v18 }
0x1384   :  { %v1554_v4 = vpop.permute.xlu0 %1553 }
0x1385   :  { %v1556_v5 = vmul.f32 %v5027_v2, %v1554_v4  ;;  %v1557_v44 = vmul.f32 %v5029_v3, %v1554_v4 }
0x1387   :  { %1562 = vrot.lane.b32.xlu0 %v1557_v44, %s5251_s5  ;;  %1560 = vrot.lane.b32.xlu1 %v1556_v5, %s5251_s5 }
0x13f9   :  { %v1563_v8 = vpop.permute.xlu0 %1562  ;;  %v1561_v9 = vpop.permute.xlu1 %1560 }
0x13fa   :  { %v1567_v10 = vadd.f32 %v1563_v8, %v5681_v15  ;;  %v1566_v12 = vadd.f32 %v1561_v9, %v1328_v31 }
0x13fc   :  { %5030 = vtanh.f32 %v1567_v10 }
0x13fd   :  { %5032 = vtanh.f32 %v1566_v12 }
0x1406   :  { %v5031_v13 = vpop.eup %5030 }
0x1407   :  { %v5033_v14 = vpop.eup %5032  ;;  %1576 = vrot.lane.b32.xlu0 %v5031_v13, %s5252_s17 }
0x1408   :  { %1574 = vrot.lane.b32.xlu1 %v5033_v14, %s5252_s17 }
0x1479   :  { %v1577_v22 = vpop.permute.xlu0 %1576 }
0x147a   :  { %v1581_v27 = vmul.f32 %v1577_v22, %v1571_v17  ;;  %v1575_v32 = vpop.permute.xlu1 %1574 }
0x147b   :  { %v1580_v34 = vmul.f32 %v1575_v32, %v1570_v26 }
0x147c   :  { %v1587_v36 = vadd.f32 %v1585_v28, %v1581_v27 }
0x147d   :  { %v1586_v31 = vadd.f32 %v1584_v35, %v1580_v34 }
0x147e   :  { %v1597_v37 = vrot.slane %v1587_v36, 6  ;;  %v1727_v39 = vrot.slane %v1587_v36, 2 }
0x147f   :  { %v1596_v41 = vrot.slane %v1586_v31, 6  ;;  %v1726_v42 = vrot.slane %v1586_v31, 2 }
0x1481   :  { %v1598_v43 = vsel %vm230_vm0, %v1596_v41, %v1597_v37  ;;  %v1728_v45 = vsel %vm1725_vm14, %v1726_v42, %v1727_v39 }
0x1482   :  { %1599 = vrot.lane.b32.xlu1 %v1598_v43, %s5252_s17 }
0x14f4   :  { %v5717_v46 = vpop.permute.xlu1 %1599 }
0x14f5   :  { %4466 = vmatmul.mubr.msk.f32.vlgmr.msra.gmra.mrb[14].mxu0 %vm320_vm5, %v5717_v46 }
0x14f6   :  { %4809 = vmatpush3.bf16.msra.mxu0 %v5641_v63  ;;  %4487 = vmatprep.mubr.msk.f32.mxu0 %vm5250_vm4, %v5248_v23 }
0x14f7   :  { %4810 = vmatprep.subr.bf16.mxu0 %v5249_v30 }
0x14fa   :  { %4812 = vmatpush3.bf16.msra.mxu0 %v5651_v7 }
0x14fb   :  { %4819 = vmatprep.subr.bf16.mxu0 %v5249_v30 }
0x15c8   :  { %v1675_v47 = vpop.f32.mrb[14].mxu0 }
0x15c9   :  { %v1676_v48 = vadd.f32 %v5688_v25, %v1675_v47  ;;  %v4467_v50 = vpop.f32.mrb[15].mxu0 }
0x15cb   :  { %v1680_v52 = vrot.slane %v1676_v48, 4 }
0x15cd   :  { %1696 = vrot.lane.b32.xlu0 %v1680_v52, %s5251_s5  ;;  %v1682_v53 = vadd.f32 %v1680_v52, %v5681_v15  ;;  %v1683_v63 = vadd.f32 %v1680_v52, %v5685_v24 }
0x15cf   :  { %v4067_v54 = vmul.f32 -1.442695, %v1682_v53  ;;  %v4068_v55 = vmul.f32 -1.442695, %v1683_v63 }
0x15d1   :  { %5034 = vpow2.f32 %v4067_v54  ;;  %v1051_v54 = vadd.f32 %v5533_v40, %v5678_v11 }
0x15d2   :  { %5036 = vpow2.f32 %v4068_v55 }
0x15db   :  { %v5035_v29 = vpop.eup %5034 }
0x15dc   :  { %v5037_v56 = vpop.eup %5036  ;;  %v1690_v7 = vadd.f32 1.0, %v5035_v29  ;;  %v1055_v29 = vrot.slane %v1051_v54, 6 }
0x15dd   :  { %v1691_v57 = vadd.f32 1.0, %v5037_v56 }
0x15de   :  { %5038 = vrcp.f32 %v1690_v7 }
0x15df   :  { %5040 = vrcp.f32 %v1691_v57 }
0x15e8   :  { %v5039_v33 = vpop.eup %5038 }
0x15e9   :  { %v5041_v58 = vpop.eup %5040  ;;  %v1713_v8 = vsub.f32 1.0, %v5039_v33  ;;  %v1731_v12 = vmul.f32 %v5039_v33, %v1728_v45 }
0x15ea   :  { %v1714_v10 = vsub.f32 1.0, %v5041_v58  ;;  %v1732_v17 = vmul.f32 %v5041_v58, %v1727_v39 }
0x163f   :  { %v1697_v60 = vpop.permute.xlu0 %1696 }
0x1640   :  { %v1699_v61 = vmul.f32 %v5039_v33, %v1697_v60  ;;  %v1700_v62 = vmul.f32 %v5041_v58, %v1697_v60  ;;  %v5756_v58 = vld [vmem:[%s6176_s8] sm:$0x3] }
0x1641   :  { %vm513_vm15 = vcmp.eq.s32.totalorder %v5756_v58, 0  ;;  %vm625_vm1 = vcmp.eq.s32.totalorder %v5756_v58, 1  ;;  %vm857_vm2 = vcmp.eq.s32.totalorder %v5756_v58, 3  ;;  %vm743_vm3 = vcmp.eq.s32.totalorder %v5756_v58, 2 }
0x1642   :  { %1703 = vrot.lane.b32.xlu1 %v1699_v61, %s5251_s5  ;;  %1705 = vrot.lane.b32.xlu0 %v1700_v62, %s5251_s5  ;;  %v5763_v61 = vld [vmem:[%s6177_s14] sm:$0x3f]  ;;  %v514_v40 = vsel %vm513_vm15, 1, %v5247_v1  ;;  %v626_v62 = vsel %vm625_vm1, 1, %v5247_v1  ;;  %vm968_vm9 = vcmp.eq.s32.totalorder %v5756_v58, 4  ;;  %vm1084_vm1 = vcmp.eq.s32.totalorder %v5756_v58, 5 }
0x1643   :  { %vm1454_vm0 = vcmp.eq.s32.totalorder %v5763_v61, 0  ;;  %vm1588_vm7 = vcmp.eq.s32.totalorder %v5763_v61, 1  ;;  %vm1735_vm10 = vcmp.eq.s32.totalorder %v5763_v61, 2  ;;  %vm1965_vm12 = vcmp.eq.s32.totalorder %v5763_v61, 4  ;;  %v2067_v58 = vld [vmem:[%s6178_s19 + $0x18] sm:$0xff] }
0x1644   :  { %v1455_v11 = vsel %vm1454_vm0, 1, %v5247_v1 }
0x16b4   :  { %v1704_v0 = vpop.permute.xlu1 %1703  ;;  %v1706_v2 = vpop.permute.xlu0 %1705 }
0x16b5   :  { %v1709_v3 = vadd.f32 %v1704_v0, %v5681_v15  ;;  %v1710_v4 = vadd.f32 %v1706_v2, %v5685_v24  ;;  %v858_v0 = vsel %vm857_vm2, 1, %v5247_v1 }
0x16b7   :  { %5042 = vtanh.f32 %v1709_v3  ;;  %v1057_v3 = vadd.f32 %v1055_v29, %v5530_v38 }
0x16b8   :  { %5044 = vtanh.f32 %v1710_v4 }
0x16b9   :  { %v4046_v4 = vmul.f32 -1.442695, %v1057_v3  ;;  %v1976_v3 = vld [vmem:[%s6179_s30] sm:$0xff] }
0x16c1   :  { %v5043_v5 = vpop.eup %5042 }
0x16c2   :  { %v5045_v44 = vpop.eup %5044  ;;  %1717 = vrot.lane.b32.xlu1 %v5043_v5, %s5252_s17 }
0x16c3   :  { %1719 = vrot.lane.b32.xlu0 %v5045_v44, %s5252_s17 }
0x1734   :  { %v1718_v9 = vpop.permute.xlu1 %1717 }
0x1735   :  { %v1723_v13 = vmul.f32 %v1718_v9, %v1713_v8  ;;  %v1720_v14 = vpop.permute.xlu0 %1719 }
0x1736   :  { %v1724_v18 = vmul.f32 %v1720_v14, %v1714_v10 }
0x1737   :  { %v1733_v22 = vadd.f32 %v1731_v12, %v1723_v13 }
0x1738   :  { %v1734_v15 = vadd.f32 %v1732_v17, %v1724_v18  ;;  %v744_v18 = vsel %vm743_vm3, 1, %v5247_v1 }
0x1739   :  { %v1743_v26 = vrot.slane %v1733_v22, 4  ;;  %v1848_v27 = vrot.slane %v1733_v22, 2  ;;  %v1589_v22 = vsel %vm1588_vm7, 1, %v5247_v1 }
0x173a   :  { %v1744_v28 = vrot.slane %v1734_v15, 4  ;;  %v1849_v32 = vrot.slane %v1734_v15, 2 }
0x173c   :  { %v1745_v34 = vsel %vm1149_vm8, %v1743_v26, %v1744_v28  ;;  %v1850_v35 = vsel %vm1725_vm14, %v1848_v27, %v1849_v32  ;;  %vm1854_vm8 = vcmp.eq.s32.totalorder %v5763_v61, 3  ;;  %v969_v26 = vsel %vm968_vm9, 1, %v5247_v1 }
0x173d   :  { %1746 = vrot.lane.b32.xlu1 %v1745_v34, %s5252_s17  ;;  %v1855_v15 = vsel %vm1854_vm8, 1, %v5247_v1 }
0x17af   :  { %v5740_v36 = vpop.permute.xlu1 %1746 }
0x17b0   :  { %4477 = vmatmul.mubr.msk.f32.vlgmr.msra.gmra.mrb[14].mxu1 %vm320_vm5, %v5740_v36 }
0x17b1   :  { %4498 = vmatprep.mubr.msk.f32.mxu1 %vm5250_vm4, %v5248_v23 }
0x1883   :  { %v1818_v31 = vpop.f32.mrb[14].mxu1 }
0x1884   :  { %v1819_v37 = vadd.f32 %v5688_v25, %v1818_v31  ;;  %v4478_v39 = vpop.f32.mrb[15].mxu1 }
0x1886   :  { %v1823_v41 = vrot.slane %v1819_v37, 6 }
0x1888   :  { %1832 = vrot.lane.b32.xlu0 %v1823_v41, %s5251_s5  ;;  %v1825_v42 = vadd.f32 %v1823_v41, %v5685_v24  ;;  %v1736_v41 = vsel %vm1735_vm10, 1, %v5247_v1 }
0x188a   :  { %v4070_v43 = vmul.f32 -1.442695, %v1825_v42 }
0x188c   :  { %5046 = vpow2.f32 %v4070_v43 }
0x1896   :  { %v5047_v45 = vpop.eup %5046 }
0x1897   :  { %v1829_v47 = vadd.f32 1.0, %v5047_v45 }
0x1899   :  { %5048 = vrcp.f32 %v1829_v47 }
0x18a3   :  { %v5049_v48 = vpop.eup %5048 }
0x18a4   :  { %v1842_v56 = vsub.f32 1.0, %v5049_v48  ;;  %v1852_v57 = vmul.f32 %v5049_v48, %v1850_v35 }
0x18fa   :  { %v1833_v50 = vpop.permute.xlu0 %1832 }
0x18fb   :  { %v1835_v52 = vmul.f32 %v5049_v48, %v1833_v50  ;;  %v1966_v48 = vsel %vm1965_vm12, 1, %v5247_v1 }
0x18fd   :  { %1837 = vrot.lane.b32.xlu1 %v1835_v52, %s5251_s5 }
0x196f   :  { %v1838_v53 = vpop.permute.xlu1 %1837 }
0x1970   :  { %v1840_v63 = vadd.f32 %v1838_v53, %v5685_v24 }
0x1972   :  { %5050 = vtanh.f32 %v1840_v63 }
0x1973   :  { %5052 = vpow2.f32 %v4046_v4  ;;  %v1977_v4 = vld [vmem:[%s6179_s30 + $0x8] sm:$0xff] }
0x197c   :  { %v5051_v55 = vpop.eup %5050 }
0x197d   :  { %1844 = vrot.lane.b32.xlu0 %v5051_v55, %s5252_s17  ;;  %v5053_v5 = vpop.eup %5052 }
0x197e   :  { %v1061_v44 = vadd.f32 1.0, %v5053_v5  ;;  %v1978_v5 = vld [vmem:[%s6179_s30 + $0x10] sm:$0xff] }
0x1980   :  { %5054 = vrcp.f32 %v1061_v44 }
0x1981   :  { %1064 = vrot.lane.b32.xlu0 %v1055_v29, %s5251_s5 }
0x198a   :  { %v5784_v13 = vpop.eup %5054 }
0x198b   :  { %v1074_v44 = vsub.f32 1.0, %v5784_v13 }
0x19ef   :  { %v1845_v7 = vpop.permute.xlu0 %1844 }
0x19f0   :  { %v1847_v33 = vmul.f32 %v1845_v7, %v1842_v56  ;;  %v2064_v7 = vld [vmem:[%s6178_s19] sm:$0xff] }
0x19f2   :  { %v5758_v60 = vadd.f32 %v1852_v57, %v1847_v33 }
0x19f3   :  { %v1065_v12 = vpop.permute.xlu0 %1064 }
0x19f4   :  { %v1861_v24 = vrot.slane %v5758_v60, 2  ;;  %v1067_v14 = vmul.f32 %v5784_v13, %v1065_v12  ;;  %v1979_v12 = vld [vmem:[%s6179_s30 + $0x18] sm:$0xff] }
0x19f6   :  { %1862 = vrot.lane.b32.xlu1 %v1861_v24, %s5252_s17 }
0x19fa   :  { %516 = vperm.xlu1 %4985, %v514_v40  }
0x19fe   :  { %1457 = vperm.xlu1 %4985, %v1455_v11  }
0x1a02   :  { %628 = vperm.xlu1 %4985, %v626_v62  }
0x1a06   :  { %860 = vperm.xlu1 %4985, %v858_v0  }
0x1a68   :  { %v5775_v2 = vpop.permute.xlu1 %1862 }
0x1a69   :  { %4488 = vmatmul.mubr.msk.f32.vlgmr.msra.gmra.mrb[16].mxu0 %vm320_vm5, %v5775_v2 }
0x1a6a   :  { %4509 = vmatprep.mubr.msk.f32.mxu0 %vm5250_vm4, %v5248_v23 }
0x1a79   :  { %v517_v17 = vpop.permute.xlu1 %516 }
0x1a7a   :  { %vm518_vm6 = vcmp.eq.s32.totalorder %v517_v17, 1 }
0x1a7d   :  { %v1458_v37 = vpop.permute.xlu1 %1457 }
0x1a7e   :  { %vm1459_vm11 = vcmp.eq.s32.totalorder %v1458_v37, 1 }
0x1a7f   :  { %v1460_v43 = vsel %vm1459_vm11, %v5694_v51, 0.0 }
0x1a81   :  { %v629_v47 = vpop.permute.xlu1 %628 }
0x1a82   :  { %vm630_vm13 = vcmp.eq.s32.totalorder %v629_v47, 1 }
0x1a85   :  { %v861_v52 = vpop.permute.xlu1 %860 }
0x1a86   :  { %vm862_vm0 = vcmp.eq.s32.totalorder %v861_v52, 1 }
0x1b3c   :  { %v1934_v8 = vpop.f32.mrb[16].mxu0 }
0x1b3d   :  { %v1935_v9 = vadd.f32 %v5688_v25, %v1934_v8  ;;  %v4489_v10 = vpop.f32.mrb[17].mxu0  ;;  %v519_v25 = vsel %vm518_vm6, %v5543_v59, 0.0  ;;  %v1080_v8 = vrot.slane %v5649_v6, 6 }
0x1b3e   :  { %v4814_v10 = vpack.c.bf16 %v1977_v4, %v1976_v3 }
0x1b3f   :  { %1946 = vrot.lane.b32.xlu0 %v1935_v9, %s5251_s5  ;;  %v1938_v27 = vadd.f32 %v1935_v9, %v5683_v20 }
0x1b40   :  { %4815 = vmatpush3.bf16.msra.mxu1 %v4814_v10 }
0x1b41   :  { %v4072_v28 = vmul.f32 -1.442695, %v1938_v27  ;;  %4816 = vmatprep.subr.bf16.mxu1 %v5249_v30 }
0x1b43   :  { %1069 = vrot.lane.b32.xlu0 %v1067_v14, %s5251_s5  ;;  %5056 = vpow2.f32 %v4072_v28 }
0x1b47   :  { %746 = vperm.xlu0 %4984, %v744_v18  }
0x1b4b   :  { %637 = vrot.lane.b32.xlu0 %v519_v25, %s5252_s17 }
0x1b4d   :  { %v5057_v59 = vpop.eup %5056 }
0x1b4e   :  { %v1942_v32 = vadd.f32 1.0, %v5057_v59 }
0x1b4f   :  { %1591 = vperm.xlu0 %4984, %v1589_v22  }
0x1b50   :  { %5058 = vrcp.f32 %v1942_v32 }
0x1b53   :  { %1857 = vperm.xlu0 %4984, %v1855_v15  }
0x1b57   :  { %971 = vperm.xlu0 %4984, %v969_v26  }
0x1b5a   :  { %v5799_v34 = vpop.eup %5058 }
0x1bb1   :  { %v1947_v35 = vpop.permute.xlu0 %1946 }
0x1bb2   :  { %v1949_v31 = vmul.f32 %v5799_v34, %v1947_v35 }
0x1bb4   :  { %1951 = vrot.lane.b32.xlu1 %v1949_v31, %s5251_s5 }
0x1bb5   :  { %v1070_v39 = vpop.permute.xlu0 %1069 }
0x1bb6   :  { %v1072_v42 = vadd.f32 %v1070_v39, %v5530_v38 }
0x1bb8   :  { %5060 = vtanh.f32 %v1072_v42  ;;  %1738 = vperm.xlu1 %4985, %v1736_v41  }
0x1bbc   :  { %1603 = vrot.lane.b32.xlu1 %v1460_v43, %s5252_s17  ;;  %v4073_v43 = vld [vmem:[#allocation4] ss:$0 sm:$0xff] }
0x1bc2   :  { %v5061_v45 = vpop.eup %5060 }
0x1bc3   :  { %1076 = vrot.lane.b32.xlu1 %v5061_v45, %s5252_s17 }
0x1bc6   :  { %v747_v50 = vpop.permute.xlu0 %746 }
0x1bc7   :  { %1968 = vperm.xlu1 %4985, %v1966_v48   ;;  %vm748_vm15 = vcmp.eq.s32.totalorder %v747_v50, 1 }
0x1bca   :  { %v638_v38 = vpop.permute.xlu0 %637 }
0x1bcb   :  { %v640_v51 = vsel %vm630_vm13, %v5562_v19, %v638_v38  ;;  %v2065_v19 = vld [vmem:[%s6178_s19 + $0x8] sm:$0xff] }
0x1bcc   :  { %v754_v53 = vsel %vm748_vm15, %v5578_v49, %v640_v51  ;;  %v5820_v49 = vpack.c.bf16 %v2065_v19, %v2064_v7 }
0x1bcd   :  { %v868_v63 = vsel %vm862_vm0, %v5607_v16, %v754_v53  ;;  %v1085_v16 = vsel %vm1084_vm1, 1, %v5247_v1 }
0x1bce   :  { %975 = vrot.lane.b32.xlu0 %v868_v63, %s5254_s24  ;;  %v1592_v29 = vpop.permute.xlu0 %1591  ;;  %4821 = vmatpush3.bf16.msra.mxu0 %v5820_v49 }
0x1bcf   :  { %4822 = vmatprep.subr.bf16.mxu0 %v5249_v30  ;;  %vm1593_vm2 = vcmp.eq.s32.totalorder %v1592_v29, 1 }
0x1bd2   :  { %v1858_v57 = vpop.permute.xlu0 %1857 }
0x1bd3   :  { %vm1859_vm6 = vcmp.eq.s32.totalorder %v1858_v57, 1 }
0x1bd6   :  { %v972_v11 = vpop.permute.xlu0 %971 }
0x1bd7   :  { %vm973_vm7 = vcmp.eq.s32.totalorder %v972_v11, 1 }
0x1c26   :  { %v1952_v54 = vpop.permute.xlu1 %1951 }
0x1c27   :  { %v1954_v55 = vadd.f32 %v1952_v54, %v5683_v20  ;;  %v2066_v20 = vld [vmem:[%s6178_s19 + $0x10] sm:$0xff] }
0x1c28   :  { %v4823_v61 = vpack.c.bf16 %v2067_v58, %v2066_v20 }
0x1c29   :  { %5062 = vtanh.f32 %v1954_v55 }
0x1c2a   :  { %4824 = vmatpush3.bf16.msra.mxu0 %v4823_v61 }
0x1c2b   :  { %4831 = vmatprep.subr.bf16.mxu0 %v5249_v30 }
0x1c33   :  { %v5063_v56 = vpop.eup %5062 }
0x1c34   :  { %1958 = vrot.lane.b32.xlu0 %v5063_v56, %s5252_s17 }
0x1c37   :  { %v1739_v33 = vpop.permute.xlu1 %1738 }
0x1c38   :  { %1087 = vperm.xlu0 %4984, %v1085_v16   ;;  %vm1740_vm3 = vcmp.eq.s32.totalorder %v1739_v33, 1 }
0x1c3b   :  { %v1604_v40 = vpop.permute.xlu1 %1603 }
0x1c3c   :  { %v1606_v62 = vsel %vm1593_vm2, %v5717_v46, %v1604_v40  ;;  %v1082_v46 = vmul.f32 %v5784_v13, %v1080_v8  ;;  %v1956_v13 = vsub.f32 1.0, %v5799_v34 }
0x1c3d   :  { %v1749_v0 = vsel %vm1740_vm3, %v5740_v36, %v1606_v62  ;;  %v4817_v36 = vpack.c.bf16 %v1979_v12, %v1978_v5 }
0x1c3e   :  { %v1865_v9 = vsel %vm1859_vm6, %v5775_v2, %v1749_v0 }
0x1c3f   :  { %v1077_v14 = vpop.permute.xlu1 %1076  ;;  %1972 = vrot.lane.b32.xlu1 %v1865_v9, %s5254_s24  ;;  %4818 = vmatpush3.bf16.msra.mxu1 %v4817_v36 }
0x1c40   :  { %v1079_v17 = vmul.f32 %v1077_v14, %v1074_v44  ;;  %v976_v18 = vpop.permute.xlu0 %975  ;;  %4825 = vmatprep.subr.bf16.mxu1 %v5249_v30 }
0x1c41   :  { %v978_v25 = vsel %vm973_vm7, %v5649_v6, %v976_v18  ;;  %v1963_v6 = vmul.f32 %v5799_v34, %v1861_v24  ;;  %v5861_v24 = vld [vmem:[#allocation6] ss:$0 sm:$0xff] }
0x1c42   :  { %v1083_v22 = vadd.f32 %v1082_v46, %v1079_v17  ;;  %1096 = vrot.lane.b32.xlu0 %v978_v25, %s5252_s17 }
0x1c44   :  { %v1091_v2 = vrot.slane %v1083_v22, 2 }
0x1c46   :  { %1092 = vrot.lane.b32.xlu1 %v1091_v2, %s5252_s17  ;;  %v1969_v27 = vpop.permute.xlu1 %1968 }
0x1c47   :  { %vm1970_vm8 = vcmp.eq.s32.totalorder %v1969_v27, 1 }
0x1ca6   :  { %v1959_v15 = vpop.permute.xlu0 %1958 }
0x1ca7   :  { %v1961_v26 = vmul.f32 %v1959_v15, %v1956_v13  ;;  %v2063_v13 = vld [vmem:[%s6180_s6] sm:$0x3] }
0x1ca8   :  { %vm2184_vm10 = vcmp.eq.s32.totalorder %v2063_v13, 0  ;;  %vm2312_vm11 = vcmp.eq.s32.totalorder %v2063_v13, 1  ;;  %vm2437_vm0 = vcmp.eq.s32.totalorder %v2063_v13, 2 }
0x1ca9   :  { %v1964_v28 = vadd.f32 %v1963_v6, %v1961_v26 }
0x1cb1   :  { %v1973_v59 = vpop.permute.xlu1 %1972 }
0x1cb2   :  { %v1975_v32 = vsel %vm1970_vm8, %v1964_v28, %v1973_v59  ;;  %v2185_v28 = vsel %vm2184_vm10, 1, %v5247_v1  ;;  %v2313_v59 = vsel %vm2312_vm11, 1, %v5247_v1  ;;  %vm2870_vm11 = vcmask 517120  }
0x1cb3   :  { %1988 = vrot.lane.b32.xlu1 %v1975_v32, %s5252_s17 }
0x1cb7   :  { %v1088_v35 = vpop.permute.xlu0 %1087 }
0x1cb8   :  { %vm1089_vm9 = vcmp.eq.s32.totalorder %v1088_v35, 1  ;;  %v1093_v31 = vpop.permute.xlu1 %1092 }
0x1cbb   :  { %v1097_v37 = vpop.permute.xlu0 %1096 }
0x1cbc   :  { %v1099_v39 = vsel %vm1089_vm9, %v1093_v31, %v1097_v37  ;;  %vm2897_vm9 = vcmask 326656  }
0x1cbd   :  { %4510 = vmatmul.mubr.msk.f32.vlgmr.msra.gmra.mrb[18].mxu0 %vm320_vm5, %v1099_v39 }
0x1cbe   :  { %4833 = vmatpush3.bf16.msra.mxu0 %v5820_v49  ;;  %4531 = vmatprep.mubr.msk.f32.mxu0 %vm5250_vm4, %v5248_v23 }
0x1cbf   :  { %4834 = vmatprep.subr.bf16.mxu0 %v5249_v30 }
0x1cc2   :  { %4836 = vmatpush3.bf16.msra.mxu0 %v4823_v61 }
0x1cc3   :  { %4843 = vmatprep.subr.bf16.mxu0 %v5249_v30 }
0x1d25   :  { %v1989_v60 = vpop.permute.xlu1 %1988 }
0x1d26   :  { %4499 = vmatmul.mubr.msk.f32.vlgmr.msra.gmra.mrb[16].mxu1 %vm320_vm5, %v1989_v60 }
0x1d27   :  { %4827 = vmatpush3.bf16.msra.mxu1 %v5820_v49  ;;  %4520 = vmatprep.mubr.msk.f32.mxu1 %vm5250_vm4, %v5248_v23 }
0x1d28   :  { %4828 = vmatprep.subr.bf16.mxu1 %v5249_v30 }
0x1d2b   :  { %4830 = vmatpush3.bf16.msra.mxu1 %v4823_v61 }
0x1d2c   :  { %4837 = vmatprep.subr.bf16.mxu1 %v5249_v30 }
0x1d90   :  { %v2144_v34 = vpop.f32.mrb[18].mxu0 }
0x1d91   :  { %v2145_v41 = vadd.f32 %v5861_v24, %v2144_v34  ;;  %v4511_v42 = vpop.f32.mrb[19].mxu0  ;;  %v2062_v34 = vld [vmem:[%s6181_s12] sm:$0x3] }
0x1d92   :  { %vm2177_vm13 = vcmp.eq.s32.totalorder %v2062_v34, 0  ;;  %vm2425_vm15 = vcmp.eq.s32.totalorder %v2062_v34, 2  ;;  %vm2296_vm1 = vcmp.eq.s32.totalorder %v2062_v34, 1 }
0x1d93   :  { %2156 = vrot.lane.b32.xlu0 %v2145_v41, %s5251_s5 }
0x1df9   :  { %v2058_v45 = vpop.f32.mrb[16].mxu1 }
0x1dfa   :  { %v5865_v47 = vadd.f32 %v4073_v43, %v2058_v45  ;;  %v4500_v48 = vpop.f32.mrb[17].mxu1  ;;  %v2178_v43 = vsel %vm2177_vm13, 1, %v5247_v1  ;;  %v2426_v45 = vsel %vm2425_vm15, 1, %v5247_v1  ;;  %vm2868_vm13 = vcmask 1024  }
0x1dfb   :  { %vm3188_vm15 = vcmask 253952  }
0x1dfc   :  { %v2148_v50 = vadd.f32 %v2145_v41, %v5865_v47 }
0x1dfe   :  { %v4077_v52 = vmul.f32 -1.442695, %v2148_v50 }
0x1e00   :  { %5064 = vpow2.f32 %v4077_v52 }
0x1e05   :  { %v2157_v63 = vpop.permute.xlu0 %2156 }
0x1e0a   :  { %v5065_v38 = vpop.eup %5064 }
0x1e0b   :  { %v2152_v51 = vadd.f32 1.0, %v5065_v38  ;;  %v2438_v38 = vsel %vm2437_vm0, 1, %v5247_v1  ;;  %vm3190_vm0 = vcmask 254977  }
0x1e0d   :  { %5066 = vrcp.f32 %v2152_v51  ;;  %v2528_v51 = vld [vmem:[%s6182_s20] sm:$0xff] }
0x1e17   :  { %v5067_v53 = vpop.eup %5066 }
0x1e18   :  { %v2159_v54 = vmul.f32 %v5067_v53, %v2157_v63  ;;  %v2166_v19 = vsub.f32 1.0, %v5067_v53  ;;  %v2530_v63 = vld [vmem:[%s6182_s20 + $0x10] sm:$0xff] }
0x1e1a   :  { %2161 = vrot.lane.b32.xlu1 %v2159_v54, %s5251_s5 }
0x1e1e   :  { %2172 = vrot.lane.b32.xlu1 %v1099_v39, %s5254_s24 }
0x1e8c   :  { %v2162_v55 = vpop.permute.xlu1 %2161 }
0x1e8d   :  { %v2164_v29 = vadd.f32 %v2162_v55, %v5865_v47  ;;  %v2531_v55 = vld [vmem:[%s6182_s20 + $0x18] sm:$0xff] }
0x1e8f   :  { %5068 = vtanh.f32 %v2164_v29  ;;  %v4847_v29 = vpack.c.bf16 %v2531_v55, %v2530_v63  ;;  %v2896_v55 = vld [vmem:[%s6188_s15 + $0x20] sm:$0xff] }
0x1e90   :  { %v2173_v7 = vpop.permute.xlu1 %2172 }
0x1e91   :  { %v2175_v16 = vmul.f32 %v5067_v53, %v2173_v7  ;;  %v2529_v53 = vld [vmem:[%s6182_s20 + $0x8] sm:$0xff] }
0x1e92   :  { %v4844_v54 = vpack.c.bf16 %v2529_v53, %v2528_v51  ;;  %v2879_v51 = vld [vmem:[%s6184_s10 + $0x8] sm:$0x3f]  ;;  %v4082_v53 = vld [vmem:[%s6189_s18] ss:$0 sm:$0xff] }
0x1e99   :  { %v5069_v56 = vpop.eup %5068 }
0x1e9a   :  { %2168 = vrot.lane.b32.xlu0 %v5069_v56, %s5252_s17  ;;  %v2445_v56 = vld [vmem:[%s6183_s2 + $0x8] sm:$0xff] }
0x1f0c   :  { %v2169_v49 = vpop.permute.xlu0 %2168 }
0x1f0d   :  { %v2171_v57 = vmul.f32 %v2169_v49, %v2166_v19 }
0x1f0f   :  { %v5872_v33 = vadd.f32 %v2175_v16, %v2171_v57 }
0x1f11   :  { %2192 = vrot.lane.b32.xlu0 %v5872_v33, %s5252_s17  ;;  %v2292_v46 = vrot.slane %v5872_v33, 6 }
0x1f83   :  { %v2193_v20 = vpop.permute.xlu0 %2192 }
0x1f84   :  { %4521 = vmatmul.mubr.msk.f32.vlgmr.msra.gmra.mrb[18].mxu1 %vm320_vm5, %v2193_v20 }
0x1f85   :  { %4542 = vmatprep.mubr.msk.f32.mxu1 %vm5250_vm4, %v5248_v23 }
0x2057   :  { %v2262_v58 = vpop.f32.mrb[18].mxu1 }
0x2058   :  { %v2263_v61 = vadd.f32 %v5861_v24, %v2262_v58  ;;  %v4522_v40 = vpop.f32.mrb[19].mxu1 }
0x205a   :  { %v2267_v11 = vrot.slane %v2263_v61, 6 }
0x205c   :  { %2276 = vrot.lane.b32.xlu1 %v2267_v11, %s5251_s5  ;;  %v2269_v62 = vadd.f32 %v2267_v11, %v5865_v47 }
0x205e   :  { %v4079_v0 = vmul.f32 -1.442695, %v2269_v62 }
0x2060   :  { %5070 = vpow2.f32 %v4079_v0  ;;  %v2297_v0 = vsel %vm2296_vm1, 1, %v5247_v1  ;;  %vm3300_vm1 = vcmask 257027  }
0x206a   :  { %v5071_v3 = vpop.eup %5070 }
0x206b   :  { %v2273_v4 = vadd.f32 1.0, %v5071_v3  ;;  %v2446_v3 = vld [vmem:[%s6183_s2 + $0x10] sm:$0xff] }
0x206d   :  { %5072 = vrcp.f32 %v2273_v4  ;;  %v2447_v4 = vld [vmem:[%s6183_s2 + $0x18] sm:$0xff] }
0x2077   :  { %v5073_v5 = vpop.eup %5072 }
0x2078   :  { %v2286_v14 = vsub.f32 1.0, %v5073_v5  ;;  %v2294_v18 = vmul.f32 %v5073_v5, %v2292_v46 }
0x20ce   :  { %v2277_v44 = vpop.permute.xlu1 %2276 }
0x20cf   :  { %v2279_v8 = vmul.f32 %v5073_v5, %v2277_v44  ;;  %v4841_v5 = vpack.c.bf16 %v2447_v4, %v2446_v3  ;;  %v3071_v3 = vld [vmem:[%s5426_s9] sm:$0xff]  ;;  %v3072_v4 = vld [vmem:[%s5426_s9 + $0x8] sm:$0xff] }
0x20d1   :  { %2281 = vrot.lane.b32.xlu0 %v2279_v8, %s5251_s5  ;;  %v2878_v8 = vld [vmem:[%s6184_s10] sm:$0xff] }
0x2143   :  { %v2282_v9 = vpop.permute.xlu0 %2281 }
0x2144   :  { %v2284_v10 = vadd.f32 %v2282_v9, %v5865_v47 }
0x2146   :  { %5074 = vtanh.f32 %v2284_v10  ;;  %v2622_v10 = vld [vmem:[%s6185_s29] sm:$0xff] }
0x2150   :  { %v5075_v12 = vpop.eup %5074 }
0x2151   :  { %2288 = vrot.lane.b32.xlu1 %v5075_v12, %s5252_s17  ;;  %v2623_v12 = vld [vmem:[%s6185_s29 + $0x8] sm:$0xff] }
0x2152   :  { %v4856_v1 = vpack.c.bf16 %v2623_v12, %v2622_v10  ;;  %v3074_v10 = vld [vmem:[%s5426_s9 + $0x18] sm:$0xff] }
0x21c3   :  { %v2289_v17 = vpop.permute.xlu1 %2288 }
0x21c4   :  { %v2291_v36 = vmul.f32 %v2289_v17, %v2286_v14  ;;  %v2624_v17 = vld [vmem:[%s6185_s29 + $0x10] sm:$0xff] }
0x21c6   :  { %v5886_v25 = vadd.f32 %v2294_v18, %v2291_v36  ;;  %v2625_v18 = vld [vmem:[%s6185_s29 + $0x18] sm:$0xff] }
0x21c8   :  { %v2303_v22 = vrot.slane %v5886_v25, 2  ;;  %v2421_v19 = vrot.slane %v5886_v25, 6 }
0x21ca   :  { %2304 = vrot.lane.b32.xlu0 %v2303_v22, %s5252_s17 }
0x223c   :  { %v5890_v2 = vpop.permute.xlu0 %2304 }
0x223d   :  { %4532 = vmatmul.mubr.msk.f32.vlgmr.msra.gmra.mrb[20].mxu0 %vm320_vm5, %v5890_v2 }
0x223e   :  { %4553 = vmatprep.mubr.msk.f32.mxu0 %vm5250_vm4, %v5248_v23  ;;  %4845 = vmatpush3.bf16.msra.mxu0 %v4844_v54 }
0x223f   :  { %4846 = vmatprep.subr.bf16.mxu0 %v5249_v30 }
0x2242   :  { %4848 = vmatpush3.bf16.msra.mxu0 %v4847_v29 }
0x2243   :  { %4855 = vmatprep.subr.bf16.mxu0 %v5249_v30 }
0x2310   :  { %v2391_v15 = vpop.f32.mrb[20].mxu0 }
0x2311   :  { %v2392_v26 = vadd.f32 %v5861_v24, %v2391_v15  ;;  %v4533_v27 = vpop.f32.mrb[21].mxu0 }
0x2313   :  { %v2396_v6 = vrot.slane %v2392_v26, 4 }
0x2315   :  { %2405 = vrot.lane.b32.xlu1 %v2396_v6, %s5251_s5  ;;  %v2398_v32 = vadd.f32 %v2396_v6, %v5865_v47 }
0x2317   :  { %v4081_v35 = vmul.f32 -1.442695, %v2398_v32  ;;  %v4084_v32 = vld [vmem:[%s6187_s0] ss:$0 sm:$0xff] }
0x2319   :  { %2187 = vperm.xlu1 %4985, %v2185_v28   ;;  %5076 = vpow2.f32 %v4081_v35  ;;  %v2626_v28 = vld [vmem:[%s6186_s11] sm:$0xff] }
0x231d   :  { %2315 = vperm.xlu1 %4985, %v2313_v59  }
0x2323   :  { %v5077_v31 = vpop.eup %5076 }
0x2324   :  { %v2402_v37 = vadd.f32 1.0, %v5077_v31 }
0x2326   :  { %5078 = vrcp.f32 %v2402_v37 }
0x2330   :  { %v5079_v39 = vpop.eup %5078 }
0x2331   :  { %v2415_v49 = vsub.f32 1.0, %v5079_v39  ;;  %v2423_v20 = vmul.f32 %v5079_v39, %v2421_v19  ;;  %v2612_v19 = vld [vmem:[%s6190_s3] sm:$0x3] }
0x2387   :  { %v2406_v60 = vpop.permute.xlu1 %2405 }
0x2388   :  { %v2408_v24 = vmul.f32 %v5079_v39, %v2406_v60  ;;  %v2628_v39 = vld [vmem:[%s6186_s11 + $0x10] sm:$0xff]  ;;  %v2629_v60 = vld [vmem:[%s6186_s11 + $0x18] sm:$0xff] }
0x2389   :  { %v4853_v34 = vpack.c.bf16 %v2629_v60, %v2628_v39  ;;  %v4095_v39 = vld [vmem:[%s6194_s26] ss:$0 sm:$0xff] }
0x238a   :  { %2410 = vrot.lane.b32.xlu0 %v2408_v24, %s5251_s5 }
0x2398   :  { %v2188_v41 = vpop.permute.xlu1 %2187 }
0x2399   :  { %vm2189_vm12 = vcmp.eq.s32.totalorder %v2188_v41, 1 }
0x239a   :  { %v2190_v42 = vsel %vm2189_vm12, %v5872_v33, 0.0 }
0x239b   :  { %2319 = vrot.lane.b32.xlu1 %v2190_v42, %s5252_s17  ;;  %v2892_v42 = vld [vmem:[%s6188_s15] sm:$0xff] }
0x239c   :  { %v2316_v16 = vpop.permute.xlu1 %2315 }
0x239d   :  { %vm2317_vm3 = vcmp.eq.s32.totalorder %v2316_v16, 1  ;;  %v2783_v16 = vld [vmem:[%s6191_s22 + $0x8] sm:$0xff] }
0x239f   :  { %2180 = vperm.xlu1 %4985, %v2178_v43   ;;  %v2893_v43 = vld [vmem:[%s6188_s15 + $0x8] sm:$0xff] }
0x23a3   :  { %2428 = vperm.xlu1 %4985, %v2426_v45   ;;  %v4867_v45 = vpack.c.bf16 %v2893_v43, %v2892_v42 }
0x23fc   :  { %v2411_v48 = vpop.permute.xlu0 %2410 }
0x23fd   :  { %v2413_v50 = vadd.f32 %v2411_v48, %v5865_v47  ;;  %v2444_v47 = vld [vmem:[%s6183_s2] sm:$0xff]  ;;  %v2894_v48 = vld [vmem:[%s6188_s15 + $0x10] sm:$0xff] }
0x23fe   :  { %v4838_v7 = vpack.c.bf16 %v2445_v56, %v2444_v47 }
0x23ff   :  { %5080 = vtanh.f32 %v2413_v50  ;;  %v2895_v50 = vld [vmem:[%s6188_s15 + $0x18] sm:$0xff] }
0x2400   :  { %4839 = vmatpush3.bf16.msra.mxu1 %v4838_v7 }
0x2401   :  { %4840 = vmatprep.subr.bf16.mxu1 %v5249_v30 }
0x2404   :  { %4842 = vmatpush3.bf16.msra.mxu1 %v4841_v5 }
0x2405   :  { %4849 = vmatprep.subr.bf16.mxu1 %v5249_v30 }
0x2409   :  { %v5081_v52 = vpop.eup %5080 }
0x240a   :  { %2417 = vrot.lane.b32.xlu0 %v5081_v52, %s5252_s17 }
0x240d   :  { %v2320_v40 = vpop.permute.xlu1 %2319 }
0x240e   :  { %2440 = vperm.xlu0 %4984, %v2438_v38   ;;  %v2322_v14 = vsel %vm2317_vm3, %v5890_v2, %v2320_v40  ;;  %v4871_v38 = vpack.c.bf16 %v2895_v50, %v2894_v48  ;;  %v2784_v40 = vld [vmem:[%s6191_s22 + $0x10] sm:$0xff]  ;;  %vm3526_vm3 = vcmask 261127  }
0x241e   :  { %v2181_v62 = vpop.permute.xlu1 %2180 }
0x241f   :  { %vm2182_vm2 = vcmp.eq.s32.totalorder %v2181_v62, 1 }
0x2420   :  { %v2183_v44 = vsel %vm2182_vm2, %v5872_v33, 0.0  ;;  %v4859_v33 = vpack.c.bf16 %v2625_v18, %v2624_v17  ;;  %v2982_v17 = vld [vmem:[%s6192_s25 + $0x18] sm:$0xff]  ;;  %vm3524_vm2 = vcmask 260102  }
0x2422   :  { %v2429_v22 = vpop.permute.xlu1 %2428 }
0x2423   :  { %vm2430_vm8 = vcmp.eq.s32.totalorder %v2429_v22, 1 }
0x247c   :  { %v2418_v57 = vpop.permute.xlu0 %2417 }
0x247d   :  { %v2420_v58 = vmul.f32 %v2418_v57, %v2415_v49  ;;  %v2782_v49 = vld [vmem:[%s6191_s22] sm:$0xff] }
0x247f   :  { %v2424_v61 = vadd.f32 %v2423_v20, %v2420_v58  ;;  %v4862_v58 = vpack.c.bf16 %v2783_v16, %v2782_v49 }
0x2481   :  { %v2432_v11 = vrot.slane %v2424_v61, 4 }
0x2483   :  { %2433 = vrot.lane.b32.xlu0 %v2432_v11, %s5252_s17  ;;  %v2785_v11 = vld [vmem:[%s6191_s22 + $0x18] sm:$0xff] }
0x2484   :  { %v4865_v62 = vpack.c.bf16 %v2785_v11, %v2784_v40 }
0x2487   :  { %2299 = vperm.xlu0 %4984, %v2297_v0  }
0x248b   :  { %2308 = vrot.lane.b32.xlu0 %v2183_v44, %s5252_s17  ;;  %v5980_v44 = vpack.c.bf16 %v3072_v4, %v3071_v3 }
0x248d   :  { %v2441_v9 = vpop.permute.xlu0 %2440 }
0x248e   :  { %vm2442_vm6 = vcmp.eq.s32.totalorder %v2441_v9, 1  ;;  %v3073_v9 = vld [vmem:[%s5426_s9 + $0x10] sm:$0xff]  ;;  %s6193_s9 = sld [smem:[#allocation31_spill]] }
0x248f   :  { %2881 = vperm.xlu0 %4984, %v2878_v8   ;;  %v5991_v12 = vpack.c.bf16 %v3074_v10, %v3073_v9 }
0x24f5   :  { %v2434_v46 = vpop.permute.xlu0 %2433 }
0x24f6   :  { %v2443_v36 = vsel %vm2442_vm6, %v2434_v46, %v2322_v14  ;;  %vm3411_vm6 = vcmask 258052  }
0x24f7   :  { %4554 = vmatmul.mubr.msk.f32.vlgmr.msra.gmra.mrb[22].mxu0 %vm320_vm5, %v2443_v36 }
0x24f8   :  { %4857 = vmatpush3.bf16.msra.mxu0 %v4856_v1  ;;  %4575 = vmatprep.mubr.msk.f32.mxu0 %vm5250_vm4, %v5248_v23  ;;  %v2980_v1 = vld [vmem:[%s6192_s25 + $0x8] sm:$0xff] }
0x24f9   :  { %4858 = vmatprep.subr.bf16.mxu0 %v5249_v30 }
0x24fc   :  { %4860 = vmatpush3.bf16.msra.mxu0 %v4859_v33  ;;  %v4088_v33 = vld [vmem:[#allocation8] ss:$0 sm:$0xff] }
0x24fd   :  { %4868 = vmatprep.subr.bf16.mxu0 %v4867_v45 }
0x2506   :  { %v2300_v25 = vpop.permute.xlu0 %2299 }
0x2507   :  { %vm2301_vm7 = vcmp.eq.s32.totalorder %v2300_v25, 1 }
0x250a   :  { %v2309_v15 = vpop.permute.xlu0 %2308 }
0x250b   :  { %v2311_v13 = vsel %vm2301_vm7, %v5890_v2, %v2309_v15  ;;  %v2627_v2 = vld [vmem:[%s6186_s11 + $0x8] sm:$0xff]  ;;  %vm3413_vm7 = vcmask 259077  }
0x250c   :  { %v2436_v26 = vsel %vm2430_vm8, %v2434_v46, %v2311_v13  ;;  %v4850_v59 = vpack.c.bf16 %v2627_v2, %v2626_v28  ;;  %v2981_v46 = vld [vmem:[%s6192_s25 + $0x10] sm:$0xff]  ;;  %vm2876_vm8 = vcmask 1041920  }
0x250d   :  { %4543 = vmatmul.mubr.msk.f32.vlgmr.msra.gmra.mrb[20].mxu1 %vm320_vm5, %v2436_v26  ;;  %4576 = vmatmul.mubr.msk.f32.vlgmr.msra.gmra.mrb[24].mxu0 %vm320_vm5, %v2436_v26  ;;  %v4879_v18 = vpack.c.bf16 %v2982_v17, %v2981_v46  ;;  %v4089_v13 = vld [vmem:[#allocation3] ss:$0 sm:$0xff] }
0x250e   :  { %v2882_v27 = vpop.permute.xlu0 %2881  ;;  %4564 = vmatprep.mubr.msk.f32.mxu1 %vm5250_vm4, %v5248_v23  ;;  %4851 = vmatpush3.bf16.msra.mxu1 %v4850_v59  ;;  %v6017_v59 = vld [vmem:[%s6193_s9] ss:$0 sm:$0xff] }
0x250f   :  { %vm2886_vm10 = vcmp.eq.s32.totalorder %v2882_v27, %v5492_v21  ;;  %4852 = vmatprep.subr.bf16.mxu1 %v5249_v30  ;;  %4870 = vmatpush3.bf16.msra.mxu0 %v4867_v45 }
0x2510   :  { %v4091_v6 = vsel %vm2886_vm10, 1.0, %v5248_v23  ;;  %4872 = vmatprep.subr.bf16.mxu0 %v4871_v38 }
0x2511   :  { %4599 = vmatprep.mubr.msk.f32.mxu0 %vm2897_vm9, %v4091_v6 }
0x2512   :  { %4854 = vmatpush3.bf16.msra.mxu1 %v4853_v34 }
0x2513   :  { %4861 = vmatprep.subr.bf16.mxu1 %v5249_v30  ;;  %4874 = vmatpush3.bf16.msra.mxu0 %v4871_v38 }
0x2514   :  { %4597 = vmatprep.subr.mxu0 %v2896_v55 }
0x2517   :  { %4598 = vmatpush3.msra.mxu0 %v2896_v55 }
0x2518   :  { %4883 = vmatprep.subr.bf16.mxu0 %v5249_v30 }
0x25ca   :  { %v2608_v35 = vpop.f32.mrb[22].mxu0 }
0x25cb   :  { %v5950_v31 = vadd.f32 %v4084_v32, %v2608_v35  ;;  %v4555_v37 = vpop.f32.mrb[23].mxu0 }
0x25cd   :  { %v2613_v24 = vmul.f32 0.5, %v5950_v31 }
0x25cf   :  { %v2614_v41 = vmul.f32 1.442695, %v2613_v24 }
0x25d1   :  { %5082 = vpow2.f32 %v2614_v41 }
0x25db   :  { %v5083_v52 = vpop.eup %5082 }
0x25dc   :  { %2617 = vrot.lane.b32.xlu1 %v5083_v52, %s5252_s17 }
0x25e0   :  { %2884 = vperm.xlu1 %4985, %v2879_v51   ;;  %v2524_v63 = vpop.f32.mrb[20].mxu1  ;;  %v2769_v54 = vpop.f32.mrb[24].mxu0 }
0x25e1   :  { %v2525_v29 = vadd.f32 %v4082_v53, %v2524_v63  ;;  %v4544_v47 = vpop.f32.mrb[21].mxu1  ;;  %v4577_v56 = vpop.f32.mrb[25].mxu0 }
0x25e3   :  { %v2781_v7 = vmax.f32 %v2525_v29, 0.0  ;;  %2871 = vst.msk [vmem:[%s5456_s23] sm:$0x3] %vm2870_vm11, %v2525_v29 }
0x25e5   :  { %2794 = vrot.lane.b32.xlu0 %v2781_v7, %s5251_s5 }
0x264e   :  { %v2618_v57 = vpop.permute.xlu1 %2617 }
0x264f   :  { %v2620_v20 = vmul.f32 %v2618_v57, %v2612_v19 }
0x2651   :  { %v2621_v61 = vadd.f32 %v2620_v20, %v5950_v31 }
0x2653   :  { %4565 = vmatmul.mubr.msk.f32.vlgmr.msra.gmra.mrb[22].mxu1 %vm320_vm5, %v2621_v61 }
0x2654   :  { %4863 = vmatpush3.bf16.msra.mxu1 %v4862_v58  ;;  %4586 = vmatprep.mubr.msk.f32.mxu1 %vm5250_vm4, %v5248_v23 }
0x2655   :  { %4864 = vmatprep.subr.bf16.mxu1 %v5249_v30 }
0x2657   :  { %v2795_v0 = vpop.permute.xlu0 %2794 }
0x2658   :  { %4866 = vmatpush3.bf16.msra.mxu1 %v4865_v62 }
0x265b   :  { %4587 = vmatmul.mubr.msk.f32.vlgmr.msra.gmra.mrb[24].mxu1 %vm320_vm5, %v2795_v0 }
0x265f   :  { %v2885_v5 = vpop.permute.xlu1 %2884 }
0x2660   :  { %vm2887_vm12 = vcmp.eq.s32.totalorder %v2885_v5, %v5492_v21  ;;  %v2979_v21 = vld [vmem:[%s6192_s25] sm:$0xff] }
0x2661   :  { %v4092_v8 = vsel %vm2887_vm12, 1.0, %v5248_v23  ;;  %v4875_v14 = vpack.c.bf16 %v2980_v1, %v2979_v21 }
0x2662   :  { %4600 = vmatmul.mubr.msk.f32.vlgmr.msra.gmra.mrb[26].mxu0 %vm2897_vm9, %v4092_v8 }
0x2663   :  { %4885 = vmatpush3.bf16.msra.mxu0 %v5980_v44  ;;  %4621 = vmatprep.mubr.msk.f32.mxu0 %vm5250_vm4, %v5248_v23 }
0x2664   :  { %4886 = vmatprep.subr.bf16.mxu0 %v5249_v30  ;;  %4876 = vmatprep.subr.bf16.mxu1 %v4875_v14 }
0x2665   :  { %4878 = vmatpush3.bf16.msra.mxu1 %v4875_v14 }
0x2666   :  { %4880 = vmatprep.subr.bf16.mxu1 %v4879_v18 }
0x2667   :  { %4888 = vmatpush3.bf16.msra.mxu0 %v5991_v12 }
0x2668   :  { %4895 = vmatprep.subr.bf16.mxu0 %v5249_v30 }
0x2669   :  { %4882 = vmatpush3.bf16.msra.mxu1 %v4879_v18 }
0x266a   :  { %4889 = vmatprep.subr.bf16.mxu1 %v5249_v30 }
0x2726   :  { %v2699_v36 = vpop.f32.mrb[22].mxu1 }
0x2727   :  { %v2770_v25 = vadd.f32 %v2769_v54, %v2699_v36  ;;  %v4566_v22 = vpop.f32.mrb[23].mxu1 }
0x2729   :  { %v2780_v15 = vadd.f32 %v4088_v33, %v2770_v25 }
0x272b   :  { %4622 = vmatmul.mubr.msk.f32.vlgmr.msra.gmra.mrb[28].mxu0 %vm320_vm5, %v2780_v15 }
0x272c   :  { %4897 = vmatpush3.bf16.msra.mxu0 %v5980_v44  ;;  %4643 = vmatprep.mubr.msk.f32.mxu0 %vm5250_vm4, %v5248_v23 }
0x272d   :  { %4898 = vmatprep.subr.bf16.mxu0 %v5249_v30 }
0x272e   :  { %v2864_v26 = vpop.f32.mrb[24].mxu1 }
0x272f   :  { %v2865_v27 = vadd.f32 %v4089_v13, %v2864_v26  ;;  %v4588_v6 = vpop.f32.mrb[25].mxu1 }
0x2730   :  { %4900 = vmatpush3.bf16.msra.mxu0 %v5991_v12 }
0x2731   :  { %2869 = vst.msk [vmem:[%s5461_s28] sm:$0x3] %vm2868_vm13, %v2865_v27  ;;  %4907 = vmatprep.subr.bf16.mxu0 %v5249_v30 }
0x2735   :  { %v4601_v28 = vpop.f32.mrb[26].mxu0 }
0x2736   :  { %v2970_v2 = vpop.f32.mrb[27].mxu0 }
0x2737   :  { %4610 = vmatprep.mubr.msk.f32.mxu1 %vm320_vm5, %v2970_v2 }
0x2738   :  { %4611 = vmatmul.mubr.msk.f32.vlgmr.msra.gmra.mrb[26].mxu1 %vm320_vm5, %v4601_v28 }
0x2739   :  { %4891 = vmatpush3.bf16.msra.mxu1 %v5980_v44  ;;  %4632 = vmatprep.mubr.msk.f32.mxu1 %vm5250_vm4, %v5248_v23 }
0x273a   :  { %4892 = vmatprep.subr.bf16.mxu1 %v5249_v30 }
0x273d   :  { %4894 = vmatpush3.bf16.msra.mxu1 %v5991_v12 }
0x273e   :  { %4901 = vmatprep.subr.bf16.mxu1 %v5249_v30 }
0x27fe   :  { %v3151_v32 = vpop.f32.mrb[28].mxu0 }
0x27ff   :  { %v3152_v35 = vadd.f32 %v6017_v59, %v3151_v32  ;;  %v4623_v37 = vpop.f32.mrb[29].mxu0 }
0x2801   :  { %3163 = vrot.lane.b32.xlu1 %v3152_v35, %s5251_s5 }
0x280b   :  { %v4612_v60 = vpop.f32.mrb[26].mxu1 }
0x280c   :  { %v6022_v24 = vadd.f32 %v4612_v60, %v4095_v39  ;;  %v3062_v34 = vpop.f32.mrb[27].mxu1 }
0x280d   :  { %v6024_v41 = vadd.f32 %v4095_v39, %v3062_v34 }
0x280f   :  { %v3155_v42 = vadd.f32 %v3152_v35, %v6024_v41 }
0x2811   :  { %v4100_v43 = vmul.f32 -1.442695, %v3155_v42 }
0x2813   :  { %5084 = vpow2.f32 %v4100_v43 }
0x281d   :  { %v5085_v45 = vpop.eup %5084 }
0x281e   :  { %v3159_v48 = vadd.f32 1.0, %v5085_v45 }
0x2820   :  { %5086 = vrcp.f32 %v3159_v48 }
0x282a   :  { %v5087_v50 = vpop.eup %5086 }
0x282b   :  { %v3173_v55 = vsub.f32 1.0, %v5087_v50 }
0x2873   :  { %v3164_v52 = vpop.permute.xlu1 %3163 }
0x2874   :  { %v3166_v38 = vmul.f32 %v5087_v50, %v3164_v52 }
0x2876   :  { %3168 = vrot.lane.b32.xlu0 %v3166_v38, %s5251_s5 }
0x287a   :  { %3179 = vrot.lane.b32.xlu0 %v2780_v15, %s5254_s24 }
0x28e8   :  { %v3169_v51 = vpop.permute.xlu0 %3168 }
0x28e9   :  { %v3171_v53 = vadd.f32 %v3169_v51, %v6024_v41 }
0x28eb   :  { %5088 = vtanh.f32 %v3171_v53 }
0x28ec   :  { %v3180_v54 = vpop.permute.xlu0 %3179 }
0x28ed   :  { %v3182_v47 = vmul.f32 %v5087_v50, %v3180_v54 }
0x28f5   :  { %v5089_v63 = vpop.eup %5088 }
0x28f6   :  { %3175 = vrot.lane.b32.xlu1 %v5089_v63, %s5252_s17 }
0x2968   :  { %v3176_v29 = vpop.permute.xlu1 %3175 }
0x2969   :  { %v3178_v56 = vmul.f32 %v3176_v29, %v3173_v55 }
0x296b   :  { %v3183_v7 = vadd.f32 %v3182_v47, %v3178_v56 }
0x296d   :  { %3185 = vrot.lane.b32.xlu1 %v3183_v7, %s5252_s17  ;;  %v3290_v9 = vrot.slane %v3183_v7, 6 }
0x29df   :  { %v3186_v19 = vpop.permute.xlu1 %3185 }
0x29e0   :  { %3189 = vst.msk [vmem:[#allocation2] sm:$0x1] %vm3188_vm15, %v3186_v19  ;;  %4633 = vmatmul.mubr.msk.f32.vlgmr.msra.gmra.mrb[28].mxu1 %vm320_vm5, %v3186_v19 }
0x29e1   :  { %3191 = vst.msk [vmem:[#allocation2 + $0x6] sm:$0x2] %vm3190_vm0, %v3186_v19  ;;  %4903 = vmatpush3.bf16.msra.mxu1 %v5980_v44  ;;  %4654 = vmatprep.mubr.msk.f32.mxu1 %vm5250_vm4, %v5248_v23 }
0x29e2   :  { %4904 = vmatprep.subr.bf16.mxu1 %v5249_v30 }
0x29e5   :  { %4906 = vmatpush3.bf16.msra.mxu1 %v5991_v12 }
0x29e6   :  { %4913 = vmatprep.subr.bf16.mxu1 %v5249_v30 }
0x2ab3   :  { %v3260_v49 = vpop.f32.mrb[28].mxu1 }
0x2ab4   :  { %v3261_v16 = vadd.f32 %v6017_v59, %v3260_v49  ;;  %v4634_v57 = vpop.f32.mrb[29].mxu1 }
0x2ab6   :  { %v3265_v20 = vrot.slane %v3261_v16, 6 }
0x2ab8   :  { %3274 = vrot.lane.b32.xlu0 %v3265_v20, %s5251_s5  ;;  %v3267_v58 = vadd.f32 %v3265_v20, %v6024_v41 }
0x2aba   :  { %v4102_v61 = vmul.f32 -1.442695, %v3267_v58 }
0x2abc   :  { %5090 = vpow2.f32 %v4102_v61 }
0x2ac6   :  { %v5091_v40 = vpop.eup %5090 }
0x2ac7   :  { %v3271_v11 = vadd.f32 1.0, %v5091_v40 }
0x2ac9   :  { %5092 = vrcp.f32 %v3271_v11 }
0x2ad3   :  { %v5093_v62 = vpop.eup %5092 }
0x2ad4   :  { %v3284_v10 = vsub.f32 1.0, %v5093_v62  ;;  %v3292_v14 = vmul.f32 %v5093_v62, %v3290_v9 }
0x2b2a   :  { %v3275_v0 = vpop.permute.xlu0 %3274 }
0x2b2b   :  { %v3277_v3 = vmul.f32 %v5093_v62, %v3275_v0 }
0x2b2d   :  { %3279 = vrot.lane.b32.xlu1 %v3277_v3, %s5251_s5 }
0x2b9f   :  { %v3280_v4 = vpop.permute.xlu1 %3279 }
0x2ba0   :  { %v3282_v5 = vadd.f32 %v3280_v4, %v6024_v41 }
0x2ba2   :  { %5094 = vtanh.f32 %v3282_v5 }
0x2bac   :  { %v5095_v8 = vpop.eup %5094 }
0x2bad   :  { %3286 = vrot.lane.b32.xlu0 %v5095_v8, %s5252_s17 }
0x2c1f   :  { %v3287_v21 = vpop.permute.xlu0 %3286 }
0x2c20   :  { %v3289_v1 = vmul.f32 %v3287_v21, %v3284_v10 }
0x2c22   :  { %v6047_v46 = vadd.f32 %v3292_v14, %v3289_v1 }
0x2c24   :  { %v3302_v17 = vrot.slane %v6047_v46, 2  ;;  %v3403_v60 = vrot.slane %v6047_v46, 6 }
0x2c26   :  { %3303 = vrot.lane.b32.xlu1 %v3302_v17, %s5252_s17 }
0x2c98   :  { %v3304_v18 = vpop.permute.xlu1 %3303 }
0x2c99   :  { %4644 = vmatmul.mubr.msk.f32.vlgmr.msra.gmra.mrb[30].mxu0 %vm320_vm5, %v3304_v18 }
0x2c9a   :  { %4909 = vmatpush3.bf16.msra.mxu0 %v5980_v44  ;;  %4665 = vmatprep.mubr.msk.f32.mxu0 %vm5250_vm4, %v5248_v23 }
0x2c9b   :  { %4910 = vmatprep.subr.bf16.mxu0 %v5249_v30 }
0x2c9e   :  { %4912 = vmatpush3.bf16.msra.mxu0 %v5991_v12 }
0x2c9f   :  { %4919 = vmatprep.subr.bf16.mxu0 %v5249_v30 }
0x2d6c   :  { %v3373_v36 = vpop.f32.mrb[30].mxu0 }
0x2d6d   :  { %v3374_v33 = vadd.f32 %v6017_v59, %v3373_v36  ;;  %v4645_v25 = vpop.f32.mrb[31].mxu0 }
0x2d6f   :  { %v3378_v22 = vrot.slane %v3374_v33, 4 }
0x2d71   :  { %3387 = vrot.lane.b32.xlu0 %v3378_v22, %s5251_s5  ;;  %v3380_v15 = vadd.f32 %v3378_v22, %v6024_v41 }
0x2d73   :  { %v4104_v13 = vmul.f32 -1.442695, %v3380_v15 }
0x2d75   :  { %5096 = vpow2.f32 %v4104_v13 }
0x2d7f   :  { %v5097_v26 = vpop.eup %5096 }
0x2d80   :  { %v3384_v27 = vadd.f32 1.0, %v5097_v26 }
0x2d82   :  { %5098 = vrcp.f32 %v3384_v27 }
0x2d8c   :  { %v5099_v6 = vpop.eup %5098 }
0x2d8d   :  { %v3397_v39 = vsub.f32 1.0, %v5099_v6  ;;  %v3405_v42 = vmul.f32 %v5099_v6, %v3403_v60 }
0x2de3   :  { %v3388_v28 = vpop.permute.xlu0 %3387 }
0x2de4   :  { %v3390_v2 = vmul.f32 %v5099_v6, %v3388_v28 }
0x2de6   :  { %3392 = vrot.lane.b32.xlu1 %v3390_v2, %s5251_s5 }
0x2e58   :  { %v3393_v32 = vpop.permute.xlu1 %3392 }
0x2e59   :  { %v3395_v35 = vadd.f32 %v3393_v32, %v6024_v41 }
0x2e5b   :  { %5100 = vtanh.f32 %v3395_v35 }
0x2e65   :  { %v5101_v37 = vpop.eup %5100 }
0x2e66   :  { %3399 = vrot.lane.b32.xlu0 %v5101_v37, %s5252_s17 }
0x2ed8   :  { %v3400_v34 = vpop.permute.xlu0 %3399 }
0x2ed9   :  { %v3402_v43 = vmul.f32 %v3400_v34, %v3397_v39 }
0x2edb   :  { %v6065_v45 = vadd.f32 %v3405_v42, %v3402_v43 }
0x2edd   :  { %v3415_v48 = vrot.slane %v6065_v45, 4  ;;  %v3516_v20 = vrot.slane %v6065_v45, 6 }
0x2edf   :  { %3416 = vrot.lane.b32.xlu1 %v3415_v48, %s5252_s17 }
0x2f51   :  { %v3417_v50 = vpop.permute.xlu1 %3416 }
0x2f52   :  { %4655 = vmatmul.mubr.msk.f32.vlgmr.msra.gmra.mrb[30].mxu1 %vm320_vm5, %v3417_v50 }
0x2f53   :  { %4915 = vmatpush3.bf16.msra.mxu1 %v5980_v44  ;;  %4676 = vmatprep.mubr.msk.f32.mxu1 %vm5250_vm4, %v5248_v23 }
0x2f54   :  { %4916 = vmatprep.subr.bf16.mxu1 %v5249_v30 }
0x2f57   :  { %4918 = vmatpush3.bf16.msra.mxu1 %v5991_v12 }
0x3025   :  { %v3486_v52 = vpop.f32.mrb[30].mxu1 }
0x3026   :  { %v3487_v38 = vadd.f32 %v6017_v59, %v3486_v52  ;;  %v4656_v51 = vpop.f32.mrb[31].mxu1 }
0x3028   :  { %v3491_v53 = vrot.slane %v3487_v38, 2 }
0x302a   :  { %3500 = vrot.lane.b32.xlu0 %v3491_v53, %s5251_s5  ;;  %v3493_v63 = vadd.f32 %v3491_v53, %v6024_v41 }
0x302c   :  { %v4106_v54 = vmul.f32 -1.442695, %v3493_v63 }
0x302e   :  { %5102 = vpow2.f32 %v4106_v54 }
0x3038   :  { %v5103_v55 = vpop.eup %5102 }
0x3039   :  { %v3497_v29 = vadd.f32 1.0, %v5103_v55 }
0x303b   :  { %5104 = vrcp.f32 %v3497_v29 }
0x3045   :  { %v5105_v47 = vpop.eup %5104 }
0x3046   :  { %v3510_v57 = vsub.f32 1.0, %v5105_v47  ;;  %v3518_v61 = vmul.f32 %v5105_v47, %v3516_v20 }
0x309c   :  { %v3501_v56 = vpop.permute.xlu0 %3500 }
0x309d   :  { %v3503_v7 = vmul.f32 %v5105_v47, %v3501_v56 }
0x309f   :  { %3505 = vrot.lane.b32.xlu1 %v3503_v7, %s5251_s5 }
0x3111   :  { %v3506_v19 = vpop.permute.xlu1 %3505 }
0x3112   :  { %v3508_v49 = vadd.f32 %v3506_v19, %v6024_v41 }
0x3114   :  { %5106 = vtanh.f32 %v3508_v49 }
0x311e   :  { %v5107_v16 = vpop.eup %5106 }
0x311f   :  { %3512 = vrot.lane.b32.xlu0 %v5107_v16, %s5252_s17 }
0x3191   :  { %v3513_v58 = vpop.permute.xlu0 %3512 }
0x3192   :  { %v3515_v40 = vmul.f32 %v3513_v58, %v3510_v57 }
0x3194   :  { %v6082_v11 = vadd.f32 %v3518_v61, %v3515_v40  ;;  %v3858_v40 = vld [vmem:[%s5441_s4 + $0x8] sm:$0xff] }
0x3196   :  { %v3528_v62 = vrot.slane %v6082_v11, 6 }
0x3198   :  { %3529 = vrot.lane.b32.xlu1 %v3528_v62, %s5252_s17 }
0x320a   :  { %v3530_v0 = vpop.permute.xlu1 %3529 }
0x320b   :  { %4666 = vmatmul.mubr.msk.f32.vlgmr.msra.gmra.mrb[32].mxu0 %vm320_vm5, %v3530_v0  ;;  %v3860_v0 = vld [vmem:[%s5441_s4 + $0x18] sm:$0xff] }
0x320c   :  { %4921 = vmatpush3.bf16.msra.mxu0 %v5980_v44  ;;  %4687 = vmatprep.mubr.msk.f32.mxu0 %vm5250_vm4, %v5248_v23  ;;  %vm3298_vm4 = vcmask 256002  }
0x320d   :  { %4922 = vmatprep.subr.bf16.mxu0 %v5249_v30 }
0x3210   :  { %4924 = vmatpush3.bf16.msra.mxu0 %v5991_v12 }
0x32de   :  { %v3599_v41 = vpop.f32.mrb[32].mxu0 }
0x32df   :  { %v3600_v3 = vadd.f32 %v6017_v59, %v3599_v41  ;;  %v4667_v4 = vpop.f32.mrb[33].mxu0 }
0x32e1   :  { %3611 = vrot.lane.b32.xlu0 %v3600_v3, %s5251_s5  ;;  %v3603_v5 = vadd.f32 %v3600_v3, %v6022_v24 }
0x32e3   :  { %v4108_v8 = vmul.f32 -1.442695, %v3603_v5 }
0x32e5   :  { %5108 = vpow2.f32 %v4108_v8 }
0x32ef   :  { %v5109_v9 = vpop.eup %5108 }
0x32f0   :  { %v3607_v10 = vadd.f32 1.0, %v5109_v9 }
0x32f2   :  { %5110 = vrcp.f32 %v3607_v10 }
0x32fc   :  { %v5111_v44 = vpop.eup %5110 }
0x32fd   :  { %v3621_v14 = vsub.f32 1.0, %v5111_v44  ;;  %v3628_v18 = vmul.f32 %v5111_v44, %v3528_v62  ;;  %v3859_v62 = vld [vmem:[%s5441_s4 + $0x10] sm:$0xff] }
0x32fe   :  { %v4929_v41 = vpack.c.bf16 %v3860_v0, %v3859_v62 }
0x3353   :  { %v3612_v21 = vpop.permute.xlu0 %3611 }
0x3354   :  { %v3614_v23 = vmul.f32 %v5111_v44, %v3612_v21 }
0x3356   :  { %3616 = vrot.lane.b32.xlu1 %v3614_v23, %s5251_s5 }
0x33c8   :  { %v3617_v30 = vpop.permute.xlu1 %3616 }
0x33c9   :  { %v3619_v12 = vadd.f32 %v3617_v30, %v6022_v24 }
0x33cb   :  { %5112 = vtanh.f32 %v3619_v12  ;;  %v4113_v12 = vld [vmem:[%s5446_s7] ss:$0 sm:$0xff] }
0x33d5   :  { %v5113_v1 = vpop.eup %5112 }
0x33d6   :  { %3623 = vrot.lane.b32.xlu0 %v5113_v1, %s5252_s17 }
0x3448   :  { %v3624_v17 = vpop.permute.xlu0 %3623 }
0x3449   :  { %v3626_v36 = vmul.f32 %v3624_v17, %v3621_v14 }
0x344b   :  { %v3629_v33 = vadd.f32 %v3628_v18, %v3626_v36 }
0x344d   :  { %3631 = vrot.lane.b32.xlu1 %v3629_v33, %s5252_s17  ;;  %v3734_v42 = vrot.slane %v3629_v33, 6 }
0x34bf   :  { %v3632_v25 = vpop.permute.xlu1 %3631 }
0x34c0   :  { %3634 = vst.msk [vmem:[#allocation2 + $0x4] sm:$0x1] %vm3188_vm15, %v3632_v25  ;;  %4677 = vmatmul.mubr.msk.f32.vlgmr.msra.gmra.mrb[32].mxu1 %vm320_vm5, %v3632_v25 }
0x34c1   :  { %3635 = vst.msk [vmem:[#allocation2 + $0xa] sm:$0x2] %vm3190_vm0, %v3632_v25 }
0x3593   :  { %v3704_v22 = vpop.f32.mrb[32].mxu1 }
0x3594   :  { %v3705_v15 = vadd.f32 %v6017_v59, %v3704_v22  ;;  %v4678_v13 = vpop.f32.mrb[33].mxu1 }
0x3596   :  { %v3709_v26 = vrot.slane %v3705_v15, 6 }
0x3598   :  { %3718 = vrot.lane.b32.xlu0 %v3709_v26, %s5251_s5  ;;  %v3711_v27 = vadd.f32 %v3709_v26, %v6022_v24 }
0x359a   :  { %v4110_v6 = vmul.f32 -1.442695, %v3711_v27 }
0x359c   :  { %5114 = vpow2.f32 %v4110_v6 }
0x35a6   :  { %v5115_v28 = vpop.eup %5114 }
0x35a7   :  { %v3715_v2 = vadd.f32 1.0, %v5115_v28 }
0x35a9   :  { %5116 = vrcp.f32 %v3715_v2 }
0x35b3   :  { %v5117_v32 = vpop.eup %5116 }
0x35b4   :  { %v3728_v43 = vsub.f32 1.0, %v5117_v32  ;;  %v3736_v52 = vmul.f32 %v5117_v32, %v3734_v42 }
0x360a   :  { %v3719_v35 = vpop.permute.xlu0 %3718 }
0x360b   :  { %v3721_v37 = vmul.f32 %v5117_v32, %v3719_v35 }
0x360d   :  { %3723 = vrot.lane.b32.xlu1 %v3721_v37, %s5251_s5 }
0x367f   :  { %v3724_v39 = vpop.permute.xlu1 %3723 }
0x3680   :  { %v3726_v60 = vadd.f32 %v3724_v39, %v6022_v24 }
0x3682   :  { %5118 = vtanh.f32 %v3726_v60 }
0x368c   :  { %v5119_v34 = vpop.eup %5118 }
0x368d   :  { %3730 = vrot.lane.b32.xlu0 %v5119_v34, %s5252_s17 }
0x36ff   :  { %v3731_v48 = vpop.permute.xlu0 %3730 }
0x3700   :  { %v3733_v50 = vmul.f32 %v3731_v48, %v3728_v43 }
0x3702   :  { %v3737_v38 = vadd.f32 %v3736_v52, %v3733_v50 }
0x3704   :  { %v3744_v51 = vrot.slane %v3737_v38, 2  ;;  %v3845_v4 = vrot.slane %v3737_v38, 6 }
0x3706   :  { %3745 = vrot.lane.b32.xlu1 %v3744_v51, %s5252_s17 }
0x3778   :  { %v3746_v53 = vpop.permute.xlu1 %3745 }
0x3779   :  { %4688 = vmatmul.mubr.msk.f32.vlgmr.msra.gmra.mrb[34].mxu0 %vm320_vm5, %v3746_v53 }
0x384c   :  { %v3815_v63 = vpop.f32.mrb[34].mxu0 }
0x384d   :  { %v3816_v54 = vadd.f32 %v6017_v59, %v3815_v63  ;;  %v4689_v55 = vpop.f32.mrb[35].mxu0 }
0x384f   :  { %v3820_v29 = vrot.slane %v3816_v54, 4 }
0x3851   :  { %3829 = vrot.lane.b32.xlu0 %v3820_v29, %s5251_s5  ;;  %v3822_v47 = vadd.f32 %v3820_v29, %v6022_v24 }
0x3853   :  { %v4112_v56 = vmul.f32 -1.442695, %v3822_v47 }
0x3855   :  { %5120 = vpow2.f32 %v4112_v56 }
0x385f   :  { %v5121_v7 = vpop.eup %5120 }
0x3860   :  { %v3826_v19 = vadd.f32 1.0, %v5121_v7 }
0x3862   :  { %5122 = vrcp.f32 %v3826_v19 }
0x386c   :  { %v5123_v49 = vpop.eup %5122 }
0x386d   :  { %v3839_v3 = vsub.f32 1.0, %v5123_v49  ;;  %v3847_v8 = vmul.f32 %v5123_v49, %v3845_v4 }
0x38c3   :  { %v3830_v16 = vpop.permute.xlu0 %3829 }
0x38c4   :  { %v3832_v57 = vmul.f32 %v5123_v49, %v3830_v16 }
0x38c6   :  { %3834 = vrot.lane.b32.xlu1 %v3832_v57, %s5251_s5 }
0x38ca   :  { %3295 = vrot.lane.b32.xlu1 %v6047_v46, %s5252_s17 }
0x38ce   :  { %3521 = vrot.lane.b32.xlu1 %v6082_v11, %s5252_s17 }
0x3938   :  { %v3835_v59 = vpop.permute.xlu1 %3834 }
0x3939   :  { %v3837_v20 = vadd.f32 %v3835_v59, %v6022_v24  ;;  %v3857_v24 = vld [vmem:[%s5441_s4] sm:$0xff] }
0x393a   :  { %v4925_v11 = vpack.c.bf16 %v3858_v40, %v3857_v24 }
0x393b   :  { %5124 = vtanh.f32 %v3837_v20 }
0x393c   :  { %v3296_v58 = vpop.permute.xlu1 %3295  ;;  %4926 = vmatprep.subr.bf16.mxu1 %v4925_v11 }
0x393d   :  { %3299 = vst.msk [vmem:[#allocation2 - $0x1] sm:$0x4] %vm3298_vm4, %v3296_v58  ;;  %4928 = vmatpush3.bf16.msra.mxu1 %v4925_v11 }
0x393e   :  { %3301 = vst.msk [vmem:[#allocation2 + $0x5] sm:$0x8] %vm3300_vm1, %v3296_v58  ;;  %4930 = vmatprep.subr.bf16.mxu1 %v4929_v41 }
0x3940   :  { %v3522_v46 = vpop.permute.xlu1 %3521 }
0x3941   :  { %3525 = vst.msk [vmem:[#allocation2 - $0x3] sm:$0x40] %vm3524_vm2, %v3522_v46  ;;  %4932 = vmatpush3.bf16.msra.mxu1 %v4929_v41 }
0x3942   :  { %3527 = vst.msk [vmem:[#allocation2 + $0x3] sm:$0x80] %vm3526_vm3, %v3522_v46 }
0x3945   :  { %v5125_v61 = vpop.eup %5124 }
0x3946   :  { %3841 = vrot.lane.b32.xlu0 %v5125_v61, %s5252_s17 }
0x394a   :  { %3408 = vrot.lane.b32.xlu0 %v6065_v45, %s5252_s17 }
0x394e   :  { %3739 = vrot.lane.b32.xlu0 %v3737_v38, %s5252_s17 }
0x39b8   :  { %v3842_v5 = vpop.permute.xlu0 %3841 }
0x39b9   :  { %v3844_v9 = vmul.f32 %v3842_v5, %v3839_v3 }
0x39bb   :  { %v3848_v45 = vadd.f32 %v3847_v8, %v3844_v9 }
0x39bc   :  { %v3409_v10 = vpop.permute.xlu0 %3408 }
0x39bd   :  { %3412 = vst.msk [vmem:[#allocation2 - $0x2] sm:$0x10] %vm3411_vm6, %v3409_v10  ;;  %3850 = vrot.lane.b32.xlu1 %v3848_v45, %s5252_s17 }
0x39be   :  { %3414 = vst.msk [vmem:[#allocation2 + $0x4] sm:$0x20] %vm3413_vm7, %v3409_v10 }
0x39c0   :  { %v3740_v44 = vpop.permute.xlu0 %3739 }
0x39c1   :  { %3742 = vst.msk [vmem:[#allocation2 + $0x3] sm:$0x4] %vm3298_vm4, %v3740_v44 }
0x39c2   :  { %3743 = vst.msk [vmem:[#allocation2 + $0x9] sm:$0x8] %vm3300_vm1, %v3740_v44 }
0x3a2f   :  { %v3851_v21 = vpop.permute.xlu1 %3850 }
0x3a30   :  { %3853 = vst.msk [vmem:[#allocation2 + $0x2] sm:$0x10] %vm3411_vm6, %v3851_v21 }
0x3a31   :  { %3854 = vst.msk [vmem:[#allocation2 + $0x8] sm:$0x20] %vm3413_vm7, %v3851_v21 }
0x3a37   :  { %v3855_v23 = vld [vmem:[#allocation2] sm:$0xff] }
0x3a38   :  { %v3856_v30 = vld [vmem:[#allocation2 + $0x8] sm:$0x3f]  ;;  %4698 = vmatprep.mubr.msk.f32.mxu1 %vm320_vm5, %v3855_v23 }
0x3a39   :  { %4699 = vmatmul.mubr.msk.f32.vlgmr.msra.gmra.mrb[34].mxu1 %vm320_vm5, %v3856_v30 }
0x3b0c   :  { %v4700_v1 = vpop.f32.mrb[34].mxu1 }
0x3b0d   :  { %v3946_v14 = vadd.f32 %v4700_v1, %v4113_v12  ;;  %v3940_v17 = vpop.f32.mrb[35].mxu1 }
0x3b0e   :  { %v3941_v18 = vadd.f32 %v4113_v12, %v3940_v17 }
0x3b0f   :  { %v3951_v36 = vsel %vm1725_vm14, %v3946_v14, -inf }
0x3b10   :  { %3952 = vmax.xlane.f32.xlu0 %v3951_v36  ;;  %3949 = vmax.xlane.f32.xlu1 %v3941_v18 }
0x3b21   :  { %2873 = vrot.lane.b32.xlu1 %v5950_v31, %s5251_s5 }
0x3b9d   :  { %v3953_v33 = vpop.xlane.xlu0 %3952  ;;  %v3950_v25 = vpop.xlane.xlu1 %3949 }
0x3b9e   :  { %v3955_v22 = vsub.f32 %v3946_v14, %v3953_v33  ;;  %v3954_v15 = vsub.f32 %v3941_v18, %v3950_v25 }
0x3ba0   :  { %v3958_v13 = vmul.f32 1.442695, %v3955_v22  ;;  %v3956_v26 = vmul.f32 1.442695, %v3954_v15 }
0x3ba1   :  { %v2874_v27 = vpop.permute.xlu1 %2873 }
0x3ba2   :  { %2877 = vst.msk [vmem:[%s5456_s23] sm:$0x3] %vm2876_vm8, %v2874_v27  ;;  %5126 = vpow2.f32 %v3956_v26 }
0x3ba3   :  { %5128 = vpow2.f32 %v3958_v13 }
0x3bac   :  { %v5127_v6 = vpop.eup %5126 }
0x3bad   :  { %v5129_v28 = vpop.eup %5128  ;;  %3960 = vadd.xlane.f32.xlu0 %v5127_v6 }
0x3bae   :  { %v3962_v2 = vsel %vm1725_vm14, %v5129_v28, 0.0 }
0x3bb1   :  { %3963 = vadd.xlane.f32.xlu0 %v3962_v2 }
0x3c3a   :  { %v3961_v31 = vpop.xlane.xlu0 %3960 }
0x3c3b   :  { %5130 = vlog2.f32 %v3961_v31 }
0x3c3e   :  { %v3964_v32 = vpop.xlane.xlu0 %3963 }
0x3c3f   :  { %5132 = vlog2.f32 %v3964_v32 }
0x3c45   :  { %v5131_v35 = vpop.eup %5130 }
0x3c46   :  { %v3966_v37 = vmul.f32 0.6931472, %v5131_v35 }
0x3c48   :  { %v3969_v39 = vsub.f32 %v3954_v15, %v3966_v37 }
0x3c49   :  { %v5133_v60 = vpop.eup %5132 }
0x3c4a   :  { %3971 = vst [vmem:[%s5451_s16] sm:$0xff] %v3969_v39  ;;  %v3968_v34 = vmul.f32 0.6931472, %v5133_v60 }
0x3c4c   :  { %v3970_v42 = vsub.f32 %v3955_v22, %v3968_v34 }
0x3c4e   :  { %3972 = vst [vmem:[%s5451_s16 + $0x8] sm:$0x3f] %v3970_v42 }
0x3c4f   :  { %3985 = vsyncpa [#allocation5], 1 }
0x3c50   :  { %3986 = vsyncpa [#allocation7], 1 }

</bundles_post_ra>
